<compile_context>
chip_gen: v5e
topology: v5e:2x2
jax: 0.10.0
libtpu: 0.0.40
codegen_flags: <defaults>
</compile_context>

<pallas_src>
import functools
import math

import jax
import jax.numpy as jnp
from jax.experimental import pallas as pl
from jax.experimental.pallas import tpu as pltpu

_INV_SQRT2 = 1.0 / math.sqrt(2.0)


def _round_up(x, m):
    return ((x + m - 1) // m) * m


def _gelu(x):
    # exact (erf-based) GELU -- matches torch.nn.GELU() default
    return 0.5 * x * (1.0 + jax.lax.erf(x * _INV_SQRT2))


def _vmem_limit(bytes_per_step):
    # Double-buffered working set + headroom, never below the 32 MiB scoped
    # default and clamped so it always fits v7x's 64 MiB physical VMEM.
    return int(min(48 * 1024 * 1024,
                   max(32 * 1024 * 1024, 2 * bytes_per_step + (4 << 20))))


def _pick_m_tile(mp):
    # mp is a multiple of 128; prefer >=2 M-programs (v7x megacore) when big.
    if mp >= 1024 and mp % 512 == 0:
        return 512
    if mp >= 512 and mp % 256 == 0:
        return 256
    if mp >= 256:
        return 128
    return 64


def _pick_n_tile(n):
    assert n % 128 == 0
    if n % 512 == 0 and n >= 512:
        return 512
    if n % 256 == 0 and n >= 256:
        return 256
    return 128


# ----------------------------------------------------------------------------
# 1x1 conv as a single-K-step fused matmul kernel (bias + residual + GELU)
# ----------------------------------------------------------------------------
def _matmul_epilogue_kernel(*refs, act, has_residual):
    if has_residual:
        x_ref, w_ref, b_ref, r_ref, o_ref = refs
    else:
        x_ref, w_ref, b_ref, o_ref = refs
        r_ref = None
    acc = jnp.dot(x_ref[...], w_ref[...], preferred_element_type=jnp.float32)
    acc = acc + b_ref[...]                       # folded BatchNorm bias
    if has_residual:
        acc = acc + r_ref[...].astype(jnp.float32)
    if act == "gelu":
        acc = _gelu(acc)
    o_ref[...] = acc.astype(o_ref.dtype)


def fused_matmul(x, w, bias, residual=None, act=None, out_dtype=jnp.bfloat16):
    """out = act(x @ w + bias [+ residual]).

    x: (M, K) bf16 with K a multiple of 128 (pre-padded channels).
    w: (K, N) bf16 pre-padded with BN scale folded in, N a multiple of 128.
    bias: (1, N) f32.  Single K step: no scratch, fully parallel 2D grid.
    """
    M, K = x.shape
    Kw, N = w.shape
    assert K == Kw and K % 128 == 0 and N % 128 == 0, (x.shape, w.shape)
    assert bias.shape == (1, N)

    Mp = _round_up(M, 128)
    if Mp != M:                                  # never hit on the demo shapes
        x = jnp.pad(x, ((0, Mp - M), (0, 0)))
        if residual is not None:
            residual = jnp.pad(residual, ((0, Mp - M), (0, 0)))

    tm = _pick_m_tile(Mp)
    tn = _pick_n_tile(N)

    has_res = residual is not None
    operands = [x, w, bias]
    in_specs = [
        pl.BlockSpec((tm, K), lambda i, j: (i, 0)),
        pl.BlockSpec((K, tn), lambda i, j: (0, j)),
        pl.BlockSpec((1, tn), lambda i, j: (0, j)),
    ]
    if has_res:
        operands.append(residual)
        in_specs.append(pl.BlockSpec((tm, tn), lambda i, j: (i, j)))

    out_itemsize = jnp.dtype(out_dtype).itemsize
    step_bytes = ((tm * K + K * tn + (tm * tn if has_res else 0)) * 2
                  + tn * 4 + tm * tn * out_itemsize)
    cost = pl.CostEstimate(
        flops=2 * Mp * K * N,
        transcendentals=(Mp * N if act == "gelu" else 0),
        bytes_accessed=((Mp * K + K * N + (Mp * N if has_res else 0)) * 2
                        + Mp * N * out_itemsize))

    out = pl.pallas_call(
        functools.partial(_matmul_epilogue_kernel, act=act,
                          has_residual=has_res),
        out_shape=jax.ShapeDtypeStruct((Mp, N), out_dtype),
        grid=(Mp // tm, N // tn),
        in_specs=in_specs,
        out_specs=pl.BlockSpec((tm, tn), lambda i, j: (i, j)),
        compiler_params=pltpu.CompilerParams(
            dimension_semantics=("parallel", "parallel"),
            vmem_limit_bytes=_vmem_limit(step_bytes)),
        cost_estimate=cost,
    )(*operands)
    return out if Mp == M else out[:M]


# ----------------------------------------------------------------------------
# 3x3 conv (+ folded BN + GELU) without HBM im2col: space-to-depth once in
# XLA, then 9 shifted matmuls accumulated inside one Pallas kernel.
# ----------------------------------------------------------------------------
def _conv3x3_kernel(x_ref, w_ref, b_ref, o_ref, *, stride, ho, wo, cin_p):
    s = stride
    m = ho * wo
    tn = o_ref.shape[-1]
    # fold the BN bias into the accumulator init (one broadcast, outside loop)
    acc = jnp.broadcast_to(b_ref[...], (m, tn)).astype(jnp.float32)
    for i in range(3):
        for j in range(3):
            c0 = ((i % s) * s + (j % s)) * cin_p
            a = x_ref[i // s:i // s + ho, j // s:j // s + wo, c0:c0 + cin_p]
            # f32 detour makes the (ho, wo, c) -> (ho*wo, c) collapse a pure
            # vreg relabel (wo % 8 == 0 guaranteed by the wrapper); cast back
            # to bf16 for the MXU.
            a = a.astype(jnp.float32).reshape(m, cin_p).astype(jnp.bfloat16)
            acc = acc + jnp.dot(a, w_ref[i * 3 + j],
                                preferred_element_type=jnp.float32)
    o_ref[...] = _gelu(acc).astype(o_ref.dtype)


def _im2col(x, kh, kw, stride, pad):
    """x: (N, H, W, C) -> (N*Ho*Wo, kh*kw*C) patches (tap-major channels)."""
    if pad > 0:
        x = jnp.pad(x, ((0, 0), (pad, pad), (pad, pad), (0, 0)))
    N, Hp, Wp, C = x.shape
    Ho = (Hp - kh) // stride + 1
    Wo = (Wp - kw) // stride + 1
    cols = []
    for i in range(kh):
        for j in range(kw):
            cols.append(x[:, i:i + (Ho - 1) * stride + 1:stride,
                            j:j + (Wo - 1) * stride + 1:stride, :])
    patches = jnp.concatenate(cols, axis=-1)
    return patches.reshape(N * Ho * Wo, kh * kw * C), (N, Ho, Wo)


def conv3x3_bn_gelu(x_nhwc, w9, bias, stride):
    """3x3/stride conv (pad=1) + folded BN + GELU.

    x_nhwc: (Nb, H, W, Cp) bf16, Cp a multiple of 128.
    w9:     (9, Cp, Coutp) bf16 (tap-major, BN scale folded in).
    bias:   (1, Coutp) f32.
    Returns (Nb*Ho*Wo, Coutp) bf16.
    """
    Nb, H, W, Cp = x_nhwc.shape
    taps, Cw, Coutp = w9.shape
    assert taps == 9 and Cw == Cp and Cp % 128 == 0 and Coutp % 128 == 0
    s = stride
    Ho = (H - 1) // s + 1
    Wo = (W - 1) // s + 1

    if Wo % 8 != 0:
        # Rare fallback (very small spatial sizes): XLA im2col + 1x1 kernel.
        cols, _ = _im2col(x_nhwc, 3, 3, s, 1)
        return fused_matmul(cols, w9.reshape(9 * Cp, Coutp), bias, act="gelu")

    # One XLA pass: spatial pad (halo=1) + space-to-depth so every tap (i, j)
    # becomes a contiguous window  xs[ho + i//s, wo + j//s, ((i%s)*s+j%s)*Cp:].
    Hq = -(-(H + 2) // s)
    Wq = -(-(W + 2) // s)
    xp = jnp.pad(x_nhwc,
                 ((0, 0), (1, Hq * s - H - 1), (1, Wq * s - W - 1), (0, 0)))
    xs = xp.reshape(Nb, Hq, s, Wq, s, Cp).transpose(0, 1, 3, 2, 4, 5)
    xs = xs.reshape(Nb, Hq, Wq, s * s * Cp)

    tn = _pick_n_tile(Coutp)
    step_bytes = (Hq * Wq * s * s * Cp + 9 * Cp * tn + Ho * Wo * tn) * 2 + tn * 4
    cost = pl.CostEstimate(
        flops=2 * Nb * Ho * Wo * 9 * Cp * Coutp,
        transcendentals=Nb * Ho * Wo * Coutp,
        bytes_accessed=(Nb * Hq * Wq * s * s * Cp + 9 * Cp * Coutp
                        + Nb * Ho * Wo * Coutp) * 2)

    return pl.pallas_call(
        functools.partial(_conv3x3_kernel, stride=s, ho=Ho, wo=Wo, cin_p=Cp),
        out_shape=jax.ShapeDtypeStruct((Nb * Ho * Wo, Coutp), jnp.bfloat16),
        grid=(Nb, Coutp // tn),
        in_specs=[
            pl.BlockSpec((None, Hq, Wq, s * s * Cp),
                         lambda n, co: (n, 0, 0, 0)),
            pl.BlockSpec((9, Cp, tn), lambda n, co: (0, 0, co)),
            pl.BlockSpec((1, tn), lambda n, co: (0, co)),
        ],
        out_specs=pl.BlockSpec((Ho * Wo, tn), lambda n, co: (n, co)),
        compiler_params=pltpu.CompilerParams(
            dimension_semantics=("parallel", "parallel"),
            vmem_limit_bytes=_vmem_limit(step_bytes)),
        cost_estimate=cost,
    )(xs, w9, bias)


# ----------------------------------------------------------------------------
# Bottleneck forward (Pallas path) and a pure-JAX f32 reference
# ----------------------------------------------------------------------------
@functools.partial(jax.jit,
                   static_argnames=("stride", "has_downsample", "out_channels"))
def bottleneck_forward(params, x_nchw, *, stride, has_downsample, out_channels):
    Nb, Cin, H, W = x_nchw.shape
    cin_p = params["conv1_w"].shape[0]
    width_p = params["conv1_w"].shape[1]
    out_p = params["conv3_w"].shape[1]

    # NCHW -> NHWC, channel-pad once to the stored 128-multiple width, bf16.
    x = jnp.transpose(x_nchw, (0, 2, 3, 1)).astype(jnp.bfloat16)
    if cin_p != Cin:
        x = jnp.pad(x, ((0, 0), (0, 0), (0, 0), (0, cin_p - Cin)))

    # conv1 (1x1) + bn1 + GELU
    out = fused_matmul(x.reshape(Nb * H * W, cin_p),
                       params["conv1_w"], params["bn1_b"], act="gelu")

    # conv2 (3x3, stride, pad=1) + bn2 + GELU  (no HBM im2col)
    out = conv3x3_bn_gelu(out.reshape(Nb, H, W, width_p),
                          params["conv2_w"], params["bn2_b"], stride)

    Ho = (H - 1) // stride + 1
    Wo = (W - 1) // stride + 1

    # identity path
    if has_downsample:
        xs = x[:, ::stride, ::stride, :] if stride > 1 else x
        identity = fused_matmul(xs.reshape(Nb * Ho * Wo, cin_p),
                                params["down_w"], params["down_b"], act=None)
    else:
        identity = x.reshape(Nb * H * W, cin_p)

    # conv3 (1x1) + bn3 + residual add + GELU, fused epilogue, f32 output
    out = fused_matmul(out, params["conv3_w"], params["bn3_b"],
                       residual=identity, act="gelu", out_dtype=jnp.float32)

    out = out.reshape(Nb, Ho, Wo, out_p)
    if out_p != out_channels:
        out = out[..., :out_channels]
    return jnp.transpose(out, (0, 3, 1, 2))                    # NHWC -> NCHW


def bottleneck_reference(params, x_nchw, *, stride, has_downsample,
                         out_channels):
    """Pure-JAX f32 reference using the same folded/padded parameters."""
    Nb, Cin, H, W = x_nchw.shape
    cin_p = params["conv1_w"].shape[0]
    width_p = params["conv1_w"].shape[1]
    out_p = params["conv3_w"].shape[1]

    def mm(cols, w, b, act=None, residual=None):
        o = cols @ w.astype(jnp.float32) + b.astype(jnp.float32)
        if residual is not None:
            o = o + residual.astype(jnp.float32)
        if act == "gelu":
            o = _gelu(o)
        return o

    x = jnp.transpose(x_nchw, (0, 2, 3, 1)).astype(jnp.float32)
    x = jnp.pad(x, ((0, 0), (0, 0), (0, 0), (0, cin_p - Cin)))
    out = mm(x.reshape(Nb * H * W, cin_p), params["conv1_w"],
             params["bn1_b"], act="gelu")
    cols, (_, Ho, Wo) = _im2col(out.reshape(Nb, H, W, width_p), 3, 3, stride, 1)
    out = mm(cols, params["conv2_w"].reshape(9 * width_p, width_p),
             params["bn2_b"], act="gelu")
    if has_downsample:
        xs = x[:, ::stride, ::stride, :] if stride > 1 else x
        identity = mm(xs.reshape(Nb * Ho * Wo, cin_p),
                      params["down_w"], params["down_b"])
    else:
        identity = x.reshape(Nb * H * W, cin_p)
    out = mm(out, params["conv3_w"], params["bn3_b"], act="gelu",
             residual=identity)
    out = out.reshape(Nb, Ho, Wo, out_p)[..., :out_channels]
    return jnp.transpose(out, (0, 3, 1, 2))


# ----------------------------------------------------------------------------
# Deterministic parameter init (inference-mode BN folded, pre-padded, bf16)
# ----------------------------------------------------------------------------
def init_bottleneck_params(key, inplanes, planes, stride=1, base_width=64,
                           groups=1):
    expansion = 4
    width = int(planes * (base_width / 64.0)) * groups
    out_ch = planes * expansion
    cin_p = _round_up(inplanes, 128)
    width_p = _round_up(width, 128)
    out_p = _round_up(out_ch, 128)

    keys = iter(jax.random.split(key, 64))

    def nk():
        return next(keys)

    def conv_bn(kh, kw, cin, cout, cin_pad, cout_pad):
        std = math.sqrt(2.0 / (kh * kw * cin))
        w = jax.random.normal(nk(), (kh, kw, cin, cout), jnp.float32) * std
        gamma = 1.0 + 0.1 * jax.random.normal(nk(), (cout,), jnp.float32)
        beta = 0.1 * jax.random.normal(nk(), (cout,), jnp.float32)
        running_mean = 0.1 * jax.random.normal(nk(), (cout,), jnp.float32)
        running_var = 1.0 + 0.1 * jnp.abs(
            jax.random.normal(nk(), (cout,), jnp.float32))
        eps = 1e-5
        scale = gamma / jnp.sqrt(running_var + eps)
        bias = beta - running_mean * scale
        w = w * scale[None, None, None, :]       # fold BN scale into weights
        # pre-pad channels to 128 multiples (lane-dense MXU tiles, no per-call
        # padding in the forward); zero pads keep the math exact.
        w = jnp.pad(w, ((0, 0), (0, 0), (0, cin_pad - cin),
                        (0, cout_pad - cout)))
        bias = jnp.pad(bias, (0, cout_pad - cout)).reshape(1, cout_pad)
        if kh == 1 and kw == 1:
            w = w.reshape(cin_pad, cout_pad)
        else:
            w = w.reshape(kh * kw, cin_pad, cout_pad)
        return w.astype(jnp.bfloat16), bias.astype(jnp.float32)

    params = {}
    params["conv1_w"], params["bn1_b"] = conv_bn(1, 1, inplanes, width,
                                                 cin_p, width_p)
    params["conv2_w"], params["bn2_b"] = conv_bn(3, 3, width, width,
                                                 width_p, width_p)
    params["conv3_w"], params["bn3_b"] = conv_bn(1, 1, width, out_ch,
                                                 width_p, out_p)
    has_downsample = (stride != 1) or (inplanes != out_ch)
    if has_downsample:
        params["down_w"], params["down_b"] = conv_bn(1, 1, inplanes, out_ch,
                                                     cin_p, out_p)
    return params, has_downsample


# ----------------------------------------------------------------------------
if __name__ == "__main__":
    key = jax.random.PRNGKey(0)
    pkey, xkey = jax.random.split(key)

    # Small Bottleneck config: inplanes=64, planes=16 (width=16, out=64),
    # stride=2 -> downsample path present.  Input: NCHW (2, 64, 16, 16).
    inplanes, planes, stride = 64, 16, 2
    out_channels = planes * 4
    params, has_down = init_bottleneck_params(pkey, inplanes, planes, stride)

    x = jax.random.normal(xkey, (2, inplanes, 16, 16), jnp.float32)

    out = bottleneck_forward(params, x, stride=stride, has_downsample=has_down,
                             out_channels=out_channels)
    out = jax.block_until_ready(out)

    assert out.shape == (2, out_channels, 8, 8), out.shape
    assert bool(jnp.all(jnp.isfinite(out)))

    # f32 reference with the same folded params; tolerance covers only the
    # bf16 activation rounding of the Pallas path (tightened per review).
    ref = bottleneck_reference(params, x, stride=stride,
                               has_downsample=has_down,
                               out_channels=out_channels)
    max_err = float(jnp.max(jnp.abs(out - ref)))
    scale = float(jnp.max(jnp.abs(ref))) + 1e-6
    assert max_err / scale < 2e-2, (max_err, scale)

    print("KERNEL_OK")
</pallas_src>

<mosaic_0001>
module attributes {stable_mosaic.version = 11 : i64} {
  func.func @_matmul_epilogue_kernel(%arg0: i32, %arg1: i32, %arg2: memref<64x128xbf16, #tpu.memory_space<vmem>>, %arg3: memref<128x128xbf16, #tpu.memory_space<vmem>>, %arg4: memref<1x128xf32, #tpu.memory_space<vmem>>, %arg5: memref<64x128xbf16, #tpu.memory_space<vmem>>) attributes {dimension_semantics = [#tpu.dimension_semantics<parallel>, #tpu.dimension_semantics<parallel>], iteration_bounds = array<i64: 2, 1>, scalar_prefetch = 0 : i64, scratch_operands = 0 : i64, tpu.core_type = #tpu.core_type<tc>, window_params = [{transform_indices = @transform_0, window_bounds = array<i64: 64, 128>}, {transform_indices = @transform_1, window_bounds = array<i64: 128, 128>}, {transform_indices = @transform_2, window_bounds = array<i64: 1, 128>}, {transform_indices = @transform_3, window_bounds = array<i64: 64, 128>}]} {
    %c0 = arith.constant 0 : index
    %c0_0 = arith.constant 0 : index
    %0 = vector.load %arg2[%c0, %c0_0] : memref<64x128xbf16, #tpu.memory_space<vmem>>, vector<64x128xbf16>
    %c0_1 = arith.constant 0 : index
    %c0_2 = arith.constant 0 : index
    %1 = vector.load %arg3[%c0_1, %c0_2] : memref<128x128xbf16, #tpu.memory_space<vmem>>, vector<128x128xbf16>
    %cst = arith.constant dense<0.000000e+00> : vector<64x128xf32>
    %2 = tpu.matmul %0, %1, %cst {dimension_numbers = #tpu.dot_dimension_numbers<[1], [0], [0], [1], [0, 0, 1, 1], [], []>} : vector<64x128xbf16>, vector<128x128xbf16>, vector<64x128xf32> -> vector<64x128xf32>
    %c0_3 = arith.constant 0 : index
    %c0_4 = arith.constant 0 : index
    %3 = vector.load %arg4[%c0_3, %c0_4] : memref<1x128xf32, #tpu.memory_space<vmem>>, vector<1x128xf32>
    %4 = vector.broadcast %3 : vector<1x128xf32> to vector<64x128xf32>
    %5 = arith.addf %2, %4 : vector<64x128xf32>
    %6 = arith.truncf %5 : vector<64x128xf32> to vector<64x128xbf16>
    %c0_5 = arith.constant 0 : index
    %c0_6 = arith.constant 0 : index
    %7 = vector.load %arg5[%c0_5, %c0_6] : memref<64x128xbf16, #tpu.memory_space<vmem>>, vector<64x128xbf16>
    tpu.vector_store %arg5[%c0_5, %c0_6], %6 {strides = array<i32>} : memref<64x128xbf16, #tpu.memory_space<vmem>>, vector<64x128xbf16>,
    return
  }
  func.func @transform_0(%arg0: i32, %arg1: i32) -> (i32, i32) {
    %c0_i32 = arith.constant 0 : i32
    %c0_i32_0 = arith.constant 0 : i32
    return %arg0, %c0_i32 : i32, i32
  }
  func.func @transform_1(%arg0: i32, %arg1: i32) -> (i32, i32) {
    %c0_i32 = arith.constant 0 : i32
    %c0_i32_0 = arith.constant 0 : i32
    return %c0_i32, %arg1 : i32, i32
  }
  func.func @transform_2(%arg0: i32, %arg1: i32) -> (i32, i32) {
    %c0_i32 = arith.constant 0 : i32
    %c0_i32_0 = arith.constant 0 : i32
    return %c0_i32, %arg1 : i32, i32
  }
  func.func @transform_3(%arg0: i32, %arg1: i32) -> (i32, i32) {
    %c0_i32 = arith.constant 0 : i32
    return %arg0, %arg1 : i32, i32
  }
}

module attributes {stable_mosaic.version = 11 : i64} {
  func.func @_matmul_epilogue_kernel(%arg0: i32, %arg1: i32, %arg2: memref<256x128xbf16, #tpu.memory_space<vmem>>, %arg3: memref<128x128xbf16, #tpu.memory_space<vmem>>, %arg4: memref<1x128xf32, #tpu.memory_space<vmem>>, %arg5: memref<256x128xbf16, #tpu.memory_space<vmem>>) attributes {dimension_semantics = [#tpu.dimension_semantics<parallel>, #tpu.dimension_semantics<parallel>], iteration_bounds = array<i64: 2, 1>, scalar_prefetch = 0 : i64, scratch_operands = 0 : i64, tpu.core_type = #tpu.core_type<tc>, window_params = [{transform_indices = @transform_0, window_bounds = array<i64: 256, 128>}, {transform_indices = @transform_1, window_bounds = array<i64: 128, 128>}, {transform_indices = @transform_2, window_bounds = array<i64: 1, 128>}, {transform_indices = @transform_3, window_bounds = array<i64: 256, 128>}]} {
    %c0 = arith.constant 0 : index
    %c0_0 = arith.constant 0 : index
    %0 = vector.load %arg2[%c0, %c0_0] : memref<256x128xbf16, #tpu.memory_space<vmem>>, vector<256x128xbf16>
    %c0_1 = arith.constant 0 : index
    %c0_2 = arith.constant 0 : index
    %1 = vector.load %arg3[%c0_1, %c0_2] : memref<128x128xbf16, #tpu.memory_space<vmem>>, vector<128x128xbf16>
    %cst = arith.constant dense<0.000000e+00> : vector<256x128xf32>
    %2 = tpu.matmul %0, %1, %cst {dimension_numbers = #tpu.dot_dimension_numbers<[1], [0], [0], [1], [0, 0, 1, 1], [], []>} : vector<256x128xbf16>, vector<128x128xbf16>, vector<256x128xf32> -> vector<256x128xf32>
    %c0_3 = arith.constant 0 : index
    %c0_4 = arith.constant 0 : index
    %3 = vector.load %arg4[%c0_3, %c0_4] : memref<1x128xf32, #tpu.memory_space<vmem>>, vector<1x128xf32>
    %4 = vector.broadcast %3 : vector<1x128xf32> to vector<256x128xf32>
    %5 = arith.addf %2, %4 : vector<256x128xf32>
    %cst_5 = arith.constant 5.000000e-01 : f32
    %6 = vector.broadcast %cst_5 : f32 to vector<256x128xf32>
    %7 = arith.mulf %6, %5 : vector<256x128xf32>
    %cst_6 = arith.constant 0.707106769 : f32
    %8 = vector.broadcast %cst_6 : f32 to vector<256x128xf32>
    %9 = arith.mulf %5, %8 : vector<256x128xf32>
    %10 = math.erf %9 : vector<256x128xf32>
    %cst_7 = arith.constant 1.000000e+00 : f32
    %11 = vector.broadcast %cst_7 : f32 to vector<256x128xf32>
    %12 = arith.addf %11, %10 : vector<256x128xf32>
    %13 = arith.mulf %7, %12 : vector<256x128xf32>
    %14 = arith.truncf %13 : vector<256x128xf32> to vector<256x128xbf16>
    %c0_8 = arith.constant 0 : index
    %c0_9 = arith.constant 0 : index
    %15 = vector.load %arg5[%c0_8, %c0_9] : memref<256x128xbf16, #tpu.memory_space<vmem>>, vector<256x128xbf16>
    tpu.vector_store %arg5[%c0_8, %c0_9], %14 {strides = array<i32>} : memref<256x128xbf16, #tpu.memory_space<vmem>>, vector<256x128xbf16>,
    return
  }
  func.func @transform_0(%arg0: i32, %arg1: i32) -> (i32, i32) {
    %c0_i32 = arith.constant 0 : i32
    %c0_i32_0 = arith.constant 0 : i32
    return %arg0, %c0_i32 : i32, i32
  }
  func.func @transform_1(%arg0: i32, %arg1: i32) -> (i32, i32) {
    %c0_i32 = arith.constant 0 : i32
    %c0_i32_0 = arith.constant 0 : i32
    return %c0_i32, %arg1 : i32, i32
  }
  func.func @transform_2(%arg0: i32, %arg1: i32) -> (i32, i32) {
    %c0_i32 = arith.constant 0 : i32
    %c0_i32_0 = arith.constant 0 : i32
    return %c0_i32, %arg1 : i32, i32
  }
  func.func @transform_3(%arg0: i32, %arg1: i32) -> (i32, i32) {
    %c0_i32 = arith.constant 0 : i32
    return %arg0, %arg1 : i32, i32
  }
}

module attributes {stable_mosaic.version = 11 : i64} {
  func.func @_conv3x3_kernel(%arg0: i32, %arg1: i32, %arg2: memref<1x9x9x512xbf16, #tpu.memory_space<vmem>>, %arg3: memref<9x128x128xbf16, #tpu.memory_space<vmem>>, %arg4: memref<1x128xf32, #tpu.memory_space<vmem>>, %arg5: memref<64x128xbf16, #tpu.memory_space<vmem>>) attributes {dimension_semantics = [#tpu.dimension_semantics<parallel>, #tpu.dimension_semantics<parallel>], iteration_bounds = array<i64: 2, 1>, scalar_prefetch = 0 : i64, scratch_operands = 0 : i64, tpu.core_type = #tpu.core_type<tc>, window_params = [{transform_indices = @transform_0, window_bounds = array<i64: 1, 9, 9, 512>}, {transform_indices = @transform_1, window_bounds = array<i64: 9, 128, 128>}, {transform_indices = @transform_2, window_bounds = array<i64: 1, 128>}, {transform_indices = @transform_3, window_bounds = array<i64: 64, 128>}]} {
    %c0 = arith.constant 0 : index
    %c0_0 = arith.constant 0 : index
    %0 = vector.load %arg4[%c0, %c0_0] : memref<1x128xf32, #tpu.memory_space<vmem>>, vector<1x128xf32>
    %1 = vector.shape_cast %0 : vector<1x128xf32> to vector<1x128xf32>
    %2 = vector.broadcast %1 : vector<1x128xf32> to vector<64x128xf32>
    %c0_1 = arith.constant 0 : index
    %c0_2 = arith.constant 0 : index
    %c0_3 = arith.constant 0 : index
    %c0_4 = arith.constant 0 : index
    %3 = vector.load %arg2[%c0_1, %c0_2, %c0_3, %c0_4] : memref<1x9x9x512xbf16, #tpu.memory_space<vmem>>, vector<1x8x8x128xbf16>
    %4 = vector.shape_cast %3 : vector<1x8x8x128xbf16> to vector<8x8x128xbf16>
    %5 = arith.extf %4 : vector<8x8x128xbf16> to vector<8x8x128xf32>
    %6 = vector.shape_cast %5 : vector<8x8x128xf32> to vector<64x128xf32>
    %7 = arith.truncf %6 : vector<64x128xf32> to vector<64x128xbf16>
    %c0_5 = arith.constant 0 : index
    %c0_6 = arith.constant 0 : index
    %c0_7 = arith.constant 0 : index
    %8 = vector.load %arg3[%c0_5, %c0_6, %c0_7] : memref<9x128x128xbf16, #tpu.memory_space<vmem>>, vector<1x128x128xbf16>
    %9 = vector.shape_cast %8 : vector<1x128x128xbf16> to vector<128x128xbf16>
    %cst = arith.constant dense<0.000000e+00> : vector<64x128xf32>
    %10 = tpu.matmul %7, %9, %cst {dimension_numbers = #tpu.dot_dimension_numbers<[1], [0], [0], [1], [0, 0, 1, 1], [], []>} : vector<64x128xbf16>, vector<128x128xbf16>, vector<64x128xf32> -> vector<64x128xf32>
    %11 = arith.addf %2, %10 : vector<64x128xf32>
    %c0_8 = arith.constant 0 : index
    %c0_9 = arith.constant 0 : index
    %c0_10 = arith.constant 0 : index
    %c128 = arith.constant 128 : index
    %12 = vector.load %arg2[%c0_8, %c0_9, %c0_10, %c128] : memref<1x9x9x512xbf16, #tpu.memory_space<vmem>>, vector<1x8x8x128xbf16>
    %13 = vector.shape_cast %12 : vector<1x8x8x128xbf16> to vector<8x8x128xbf16>
    %14 = arith.extf %13 : vector<8x8x128xbf16> to vector<8x8x128xf32>
    %15 = vector.shape_cast %14 : vector<8x8x128xf32> to vector<64x128xf32>
    %16 = arith.truncf %15 : vector<64x128xf32> to vector<64x128xbf16>
    %c1 = arith.constant 1 : index
    %c0_11 = arith.constant 0 : index
    %c0_12 = arith.constant 0 : index
    %17 = vector.load %arg3[%c1, %c0_11, %c0_12] : memref<9x128x128xbf16, #tpu.memory_space<vmem>>, vector<1x128x128xbf16>
    %18 = vector.shape_cast %17 : vector<1x128x128xbf16> to vector<128x128xbf16>
    %cst_13 = arith.constant dense<0.000000e+00> : vector<64x128xf32>
    %19 = tpu.matmul %16, %18, %cst_13 {dimension_numbers = #tpu.dot_dimension_numbers<[1], [0], [0], [1], [0, 0, 1, 1], [], []>} : vector<64x128xbf16>, vector<128x128xbf16>, vector<64x128xf32> -> vector<64x128xf32>
    %20 = arith.addf %11, %19 : vector<64x128xf32>
    %c0_14 = arith.constant 0 : index
    %c0_15 = arith.constant 0 : index
    %c1_16 = arith.constant 1 : index
    %c0_17 = arith.constant 0 : index
    %21 = vector.load %arg2[%c0_14, %c0_15, %c1_16, %c0_17] : memref<1x9x9x512xbf16, #tpu.memory_space<vmem>>, vector<1x8x8x128xbf16>
    %22 = vector.shape_cast %21 : vector<1x8x8x128xbf16> to vector<8x8x128xbf16>
    %23 = arith.extf %22 : vector<8x8x128xbf16> to vector<8x8x128xf32>
    %24 = vector.shape_cast %23 : vector<8x8x128xf32> to vector<64x128xf32>
    %25 = arith.truncf %24 : vector<64x128xf32> to vector<64x128xbf16>
    %c2 = arith.constant 2 : index
    %c0_18 = arith.constant 0 : index
    %c0_19 = arith.constant 0 : index
    %26 = vector.load %arg3[%c2, %c0_18, %c0_19] : memref<9x128x128xbf16, #tpu.memory_space<vmem>>, vector<1x128x128xbf16>
    %27 = vector.shape_cast %26 : vector<1x128x128xbf16> to vector<128x128xbf16>
    %cst_20 = arith.constant dense<0.000000e+00> : vector<64x128xf32>
    %28 = tpu.matmul %25, %27, %cst_20 {dimension_numbers = #tpu.dot_dimension_numbers<[1], [0], [0], [1], [0, 0, 1, 1], [], []>} : vector<64x128xbf16>, vector<128x128xbf16>, vector<64x128xf32> -> vector<64x128xf32>
    %29 = arith.addf %20, %28 : vector<64x128xf32>
    %c0_21 = arith.constant 0 : index
    %c0_22 = arith.constant 0 : index
    %c0_23 = arith.constant 0 : index
    %c256 = arith.constant 256 : index
    %30 = vector.load %arg2[%c0_21, %c0_22, %c0_23, %c256] : memref<1x9x9x512xbf16, #tpu.memory_space<vmem>>, vector<1x8x8x128xbf16>
    %31 = vector.shape_cast %30 : vector<1x8x8x128xbf16> to vector<8x8x128xbf16>
    %32 = arith.extf %31 : vector<8x8x128xbf16> to vector<8x8x128xf32>
    %33 = vector.shape_cast %32 : vector<8x8x128xf32> to vector<64x128xf32>
    %34 = arith.truncf %33 : vector<64x128xf32> to vector<64x128xbf16>
    %c3 = arith.constant 3 : index
    %c0_24 = arith.constant 0 : index
    %c0_25 = arith.constant 0 : index
    %35 = vector.load %arg3[%c3, %c0_24, %c0_25] : memref<9x128x128xbf16, #tpu.memory_space<vmem>>, vector<1x128x128xbf16>
    %36 = vector.shape_cast %35 : vector<1x128x128xbf16> to vector<128x128xbf16>
    %cst_26 = arith.constant dense<0.000000e+00> : vector<64x128xf32>
    %37 = tpu.matmul %34, %36, %cst_26 {dimension_numbers = #tpu.dot_dimension_numbers<[1], [0], [0], [1], [0, 0, 1, 1], [], []>} : vector<64x128xbf16>, vector<128x128xbf16>, vector<64x128xf32> -> vector<64x128xf32>
    %38 = arith.addf %29, %37 : vector<64x128xf32>
    %c0_27 = arith.constant 0 : index
    %c0_28 = arith.constant 0 : index
    %c0_29 = arith.constant 0 : index
    %c384 = arith.constant 384 : index
    %39 = vector.load %arg2[%c0_27, %c0_28, %c0_29, %c384] : memref<1x9x9x512xbf16, #tpu.memory_space<vmem>>, vector<1x8x8x128xbf16>
    %40 = vector.shape_cast %39 : vector<1x8x8x128xbf16> to vector<8x8x128xbf16>
    %41 = arith.extf %40 : vector<8x8x128xbf16> to vector<8x8x128xf32>
    %42 = vector.shape_cast %41 : vector<8x8x128xf32> to vector<64x128xf32>
    %43 = arith.truncf %42 : vector<64x128xf32> to vector<64x128xbf16>
    %c4 = arith.constant 4 : index
    %c0_30 = arith.constant 0 : index
    %c0_31 = arith.constant 0 : index
    %44 = vector.load %arg3[%c4, %c0_30, %c0_31] : memref<9x128x128xbf16, #tpu.memory_space<vmem>>, vector<1x128x128xbf16>
    %45 = vector.shape_cast %44 : vector<1x128x128xbf16> to vector<128x128xbf16>
    %cst_32 = arith.constant dense<0.000000e+00> : vector<64x128xf32>
    %46 = tpu.matmul %43, %45, %cst_32 {dimension_numbers = #tpu.dot_dimension_numbers<[1], [0], [0], [1], [0, 0, 1, 1], [], []>} : vector<64x128xbf16>, vector<128x128xbf16>, vector<64x128xf32> -> vector<64x128xf32>
    %47 = arith.addf %38, %46 : vector<64x128xf32>
    %c0_33 = arith.constant 0 : index
    %c0_34 = arith.constant 0 : index
    %c1_35 = arith.constant 1 : index
    %c256_36 = arith.constant 256 : index
    %48 = vector.load %arg2[%c0_33, %c0_34, %c1_35, %c256_36] : memref<1x9x9x512xbf16, #tpu.memory_space<vmem>>, vector<1x8x8x128xbf16>
    %49 = vector.shape_cast %48 : vector<1x8x8x128xbf16> to vector<8x8x128xbf16>
    %50 = arith.extf %49 : vector<8x8x128xbf16> to vector<8x8x128xf32>
    %51 = vector.shape_cast %50 : vector<8x8x128xf32> to vector<64x128xf32>
    %52 = arith.truncf %51 : vector<64x128xf32> to vector<64x128xbf16>
    %c5 = arith.constant 5 : index
    %c0_37 = arith.constant 0 : index
    %c0_38 = arith.constant 0 : index
    %53 = vector.load %arg3[%c5, %c0_37, %c0_38] : memref<9x128x128xbf16, #tpu.memory_space<vmem>>, vector<1x128x128xbf16>
    %54 = vector.shape_cast %53 : vector<1x128x128xbf16> to vector<128x128xbf16>
    %cst_39 = arith.constant dense<0.000000e+00> : vector<64x128xf32>
    %55 = tpu.matmul %52, %54, %cst_39 {dimension_numbers = #tpu.dot_dimension_numbers<[1], [0], [0], [1], [0, 0, 1, 1], [], []>} : vector<64x128xbf16>, vector<128x128xbf16>, vector<64x128xf32> -> vector<64x128xf32>
    %56 = arith.addf %47, %55 : vector<64x128xf32>
    %c0_40 = arith.constant 0 : index
    %c1_41 = arith.constant 1 : index
    %c0_42 = arith.constant 0 : index
    %c0_43 = arith.constant 0 : index
    %57 = vector.load %arg2[%c0_40, %c1_41, %c0_42, %c0_43] : memref<1x9x9x512xbf16, #tpu.memory_space<vmem>>, vector<1x8x8x128xbf16>
    %58 = vector.shape_cast %57 : vector<1x8x8x128xbf16> to vector<8x8x128xbf16>
    %59 = arith.extf %58 : vector<8x8x128xbf16> to vector<8x8x128xf32>
    %60 = vector.shape_cast %59 : vector<8x8x128xf32> to vector<64x128xf32>
    %61 = arith.truncf %60 : vector<64x128xf32> to vector<64x128xbf16>
    %c6 = arith.constant 6 : index
    %c0_44 = arith.constant 0 : index
    %c0_45 = arith.constant 0 : index
    %62 = vector.load %arg3[%c6, %c0_44, %c0_45] : memref<9x128x128xbf16, #tpu.memory_space<vmem>>, vector<1x128x128xbf16>
    %63 = vector.shape_cast %62 : vector<1x128x128xbf16> to vector<128x128xbf16>
    %cst_46 = arith.constant dense<0.000000e+00> : vector<64x128xf32>
    %64 = tpu.matmul %61, %63, %cst_46 {dimension_numbers = #tpu.dot_dimension_numbers<[1], [0], [0], [1], [0, 0, 1, 1], [], []>} : vector<64x128xbf16>, vector<128x128xbf16>, vector<64x128xf32> -> vector<64x128xf32>
    %65 = arith.addf %56, %64 : vector<64x128xf32>
    %c0_47 = arith.constant 0 : index
    %c1_48 = arith.constant 1 : index
    %c0_49 = arith.constant 0 : index
    %c128_50 = arith.constant 128 : index
    %66 = vector.load %arg2[%c0_47, %c1_48, %c0_49, %c128_50] : memref<1x9x9x512xbf16, #tpu.memory_space<vmem>>, vector<1x8x8x128xbf16>
    %67 = vector.shape_cast %66 : vector<1x8x8x128xbf16> to vector<8x8x128xbf16>
    %68 = arith.extf %67 : vector<8x8x128xbf16> to vector<8x8x128xf32>
    %69 = vector.shape_cast %68 : vector<8x8x128xf32> to vector<64x128xf32>
    %70 = arith.truncf %69 : vector<64x128xf32> to vector<64x128xbf16>
    %c7 = arith.constant 7 : index
    %c0_51 = arith.constant 0 : index
    %c0_52 = arith.constant 0 : index
    %71 = vector.load %arg3[%c7, %c0_51, %c0_52] : memref<9x128x128xbf16, #tpu.memory_space<vmem>>, vector<1x128x128xbf16>
    %72 = vector.shape_cast %71 : vector<1x128x128xbf16> to vector<128x128xbf16>
    %cst_53 = arith.constant dense<0.000000e+00> : vector<64x128xf32>
    %73 = tpu.matmul %70, %72, %cst_53 {dimension_numbers = #tpu.dot_dimension_numbers<[1], [0], [0], [1], [0, 0, 1, 1], [], []>} : vector<64x128xbf16>, vector<128x128xbf16>, vector<64x128xf32> -> vector<64x128xf32>
    %74 = arith.addf %65, %73 : vector<64x128xf32>
    %c0_54 = arith.constant 0 : index
    %c1_55 = arith.constant 1 : index
    %c1_56 = arith.constant 1 : index
    %c0_57 = arith.constant 0 : index
    %75 = vector.load %arg2[%c0_54, %c1_55, %c1_56, %c0_57] : memref<1x9x9x512xbf16, #tpu.memory_space<vmem>>, vector<1x8x8x128xbf16>
    %76 = vector.shape_cast %75 : vector<1x8x8x128xbf16> to vector<8x8x128xbf16>
    %77 = arith.extf %76 : vector<8x8x128xbf16> to vector<8x8x128xf32>
    %78 = vector.shape_cast %77 : vector<8x8x128xf32> to vector<64x128xf32>
    %79 = arith.truncf %78 : vector<64x128xf32> to vector<64x128xbf16>
    %c8 = arith.constant 8 : index
    %c0_58 = arith.constant 0 : index
    %c0_59 = arith.constant 0 : index
    %80 = vector.load %arg3[%c8, %c0_58, %c0_59] : memref<9x128x128xbf16, #tpu.memory_space<vmem>>, vector<1x128x128xbf16>
    %81 = vector.shape_cast %80 : vector<1x128x128xbf16> to vector<128x128xbf16>
    %cst_60 = arith.constant dense<0.000000e+00> : vector<64x128xf32>
    %82 = tpu.matmul %79, %81, %cst_60 {dimension_numbers = #tpu.dot_dimension_numbers<[1], [0], [0], [1], [0, 0, 1, 1], [], []>} : vector<64x128xbf16>, vector<128x128xbf16>, vector<64x128xf32> -> vector<64x128xf32>
    %83 = arith.addf %74, %82 : vector<64x128xf32>
    %cst_61 = arith.constant 5.000000e-01 : f32
    %84 = vector.broadcast %cst_61 : f32 to vector<64x128xf32>
    %85 = arith.mulf %84, %83 : vector<64x128xf32>
    %cst_62 = arith.constant 0.707106769 : f32
    %86 = vector.broadcast %cst_62 : f32 to vector<64x128xf32>
    %87 = arith.mulf %83, %86 : vector<64x128xf32>
    %88 = math.erf %87 : vector<64x128xf32>
    %cst_63 = arith.constant 1.000000e+00 : f32
    %89 = vector.broadcast %cst_63 : f32 to vector<64x128xf32>
    %90 = arith.addf %89, %88 : vector<64x128xf32>
    %91 = arith.mulf %85, %90 : vector<64x128xf32>
    %92 = arith.truncf %91 : vector<64x128xf32> to vector<64x128xbf16>
    %c0_64 = arith.constant 0 : index
    %c0_65 = arith.constant 0 : index
    %93 = vector.load %arg5[%c0_64, %c0_65] : memref<64x128xbf16, #tpu.memory_space<vmem>>, vector<64x128xbf16>
    tpu.vector_store %arg5[%c0_64, %c0_65], %92 {strides = array<i32>} : memref<64x128xbf16, #tpu.memory_space<vmem>>, vector<64x128xbf16>,
    return
  }
  func.func @transform_0(%arg0: i32, %arg1: i32) -> (i32, i32, i32, i32) {
    %c0_i32 = arith.constant 0 : i32
    %c0_i32_0 = arith.constant 0 : i32
    %c0_i32_1 = arith.constant 0 : i32
    %c0_i32_2 = arith.constant 0 : i32
    return %arg0, %c0_i32, %c0_i32_0, %c0_i32_1 : i32, i32, i32, i32
  }
  func.func @transform_1(%arg0: i32, %arg1: i32) -> (i32, i32, i32) {
    %c0_i32 = arith.constant 0 : i32
    %c0_i32_0 = arith.constant 0 : i32
    %c0_i32_1 = arith.constant 0 : i32
    return %c0_i32, %c0_i32_0, %arg1 : i32, i32, i32
  }
  func.func @transform_2(%arg0: i32, %arg1: i32) -> (i32, i32) {
    %c0_i32 = arith.constant 0 : i32
    %c0_i32_0 = arith.constant 0 : i32
    return %c0_i32, %arg1 : i32, i32
  }
  func.func @transform_3(%arg0: i32, %arg1: i32) -> (i32, i32) {
    %c0_i32 = arith.constant 0 : i32
    return %arg0, %arg1 : i32, i32
  }
}

module attributes {stable_mosaic.version = 11 : i64} {
  func.func @_matmul_epilogue_kernel(%arg0: i32, %arg1: i32, %arg2: memref<64x128xbf16, #tpu.memory_space<vmem>>, %arg3: memref<128x128xbf16, #tpu.memory_space<vmem>>, %arg4: memref<1x128xf32, #tpu.memory_space<vmem>>, %arg5: memref<64x128xbf16, #tpu.memory_space<vmem>>, %arg6: memref<64x128xf32, #tpu.memory_space<vmem>>) attributes {dimension_semantics = [#tpu.dimension_semantics<parallel>, #tpu.dimension_semantics<parallel>], iteration_bounds = array<i64: 2, 1>, scalar_prefetch = 0 : i64, scratch_operands = 0 : i64, tpu.core_type = #tpu.core_type<tc>, window_params = [{transform_indices = @transform_0, window_bounds = array<i64: 64, 128>}, {transform_indices = @transform_1, window_bounds = array<i64: 128, 128>}, {transform_indices = @transform_2, window_bounds = array<i64: 1, 128>}, {transform_indices = @transform_3, window_bounds = array<i64: 64, 128>}, {transform_indices = @transform_4, window_bounds = array<i64: 64, 128>}]} {
    %c0 = arith.constant 0 : index
    %c0_0 = arith.constant 0 : index
    %0 = vector.load %arg2[%c0, %c0_0] : memref<64x128xbf16, #tpu.memory_space<vmem>>, vector<64x128xbf16>
    %c0_1 = arith.constant 0 : index
    %c0_2 = arith.constant 0 : index
    %1 = vector.load %arg3[%c0_1, %c0_2] : memref<128x128xbf16, #tpu.memory_space<vmem>>, vector<128x128xbf16>
    %cst = arith.constant dense<0.000000e+00> : vector<64x128xf32>
    %2 = tpu.matmul %0, %1, %cst {dimension_numbers = #tpu.dot_dimension_numbers<[1], [0], [0], [1], [0, 0, 1, 1], [], []>} : vector<64x128xbf16>, vector<128x128xbf16>, vector<64x128xf32> -> vector<64x128xf32>
    %c0_3 = arith.constant 0 : index
    %c0_4 = arith.constant 0 : index
    %3 = vector.load %arg4[%c0_3, %c0_4] : memref<1x128xf32, #tpu.memory_space<vmem>>, vector<1x128xf32>
    %4 = vector.broadcast %3 : vector<1x128xf32> to vector<64x128xf32>
    %5 = arith.addf %2, %4 : vector<64x128xf32>
    %c0_5 = arith.constant 0 : index
    %c0_6 = arith.constant 0 : index
    %6 = vector.load %arg5[%c0_5, %c0_6] : memref<64x128xbf16, #tpu.memory_space<vmem>>, vector<64x128xbf16>
    %7 = arith.extf %6 : vector<64x128xbf16> to vector<64x128xf32>
    %8 = arith.addf %5, %7 : vector<64x128xf32>
    %cst_7 = arith.constant 5.000000e-01 : f32
    %9 = vector.broadcast %cst_7 : f32 to vector<64x128xf32>
    %10 = arith.mulf %9, %8 : vector<64x128xf32>
    %cst_8 = arith.constant 0.707106769 : f32
    %11 = vector.broadcast %cst_8 : f32 to vector<64x128xf32>
    %12 = arith.mulf %8, %11 : vector<64x128xf32>
    %13 = math.erf %12 : vector<64x128xf32>
    %cst_9 = arith.constant 1.000000e+00 : f32
    %14 = vector.broadcast %cst_9 : f32 to vector<64x128xf32>
    %15 = arith.addf %14, %13 : vector<64x128xf32>
    %16 = arith.mulf %10, %15 : vector<64x128xf32>
    %c0_10 = arith.constant 0 : index
    %c0_11 = arith.constant 0 : index
    %17 = vector.load %arg6[%c0_10, %c0_11] : memref<64x128xf32, #tpu.memory_space<vmem>>, vector<64x128xf32>
    tpu.vector_store %arg6[%c0_10, %c0_11], %16 {strides = array<i32>} : memref<64x128xf32, #tpu.memory_space<vmem>>, vector<64x128xf32>,
    return
  }
  func.func @transform_0(%arg0: i32, %arg1: i32) -> (i32, i32) {
    %c0_i32 = arith.constant 0 : i32
    %c0_i32_0 = arith.constant 0 : i32
    return %arg0, %c0_i32 : i32, i32
  }
  func.func @transform_1(%arg0: i32, %arg1: i32) -> (i32, i32) {
    %c0_i32 = arith.constant 0 : i32
    %c0_i32_0 = arith.constant 0 : i32
    return %c0_i32, %arg1 : i32, i32
  }
  func.func @transform_2(%arg0: i32, %arg1: i32) -> (i32, i32) {
    %c0_i32 = arith.constant 0 : i32
    %c0_i32_0 = arith.constant 0 : i32
    return %c0_i32, %arg1 : i32, i32
  }
  func.func @transform_3(%arg0: i32, %arg1: i32) -> (i32, i32) {
    %c0_i32 = arith.constant 0 : i32
    return %arg0, %arg1 : i32, i32
  }
  func.func @transform_4(%arg0: i32, %arg1: i32) -> (i32, i32) {
    %c0_i32 = arith.constant 0 : i32
    return %arg0, %arg1 : i32, i32
  }
}

</mosaic_0001>

<bundles_post_ra>
// kernel: bottleneck_forward.6
= control target key start
LH: loop header
LB: loop body
LE: loop exit
PB: predicated region body
PF: predicated region fallthrough
CT: control target
= control target key end

     0   :  { %s661_s12 = smov 0   ;;  %s663_s13 = smov 0   ;;  %s731_s0 = inlined_call_operand.vmem [shape: bf16[128,128], index: 0, kind: input, shape index: {}]   ;;  %s732_s1 = inlined_call_operand.vmem [shape: bf16[128,128], index: 1, kind: input, shape index: {}]   ;;  %s733_s2 = inlined_call_operand.vmem [shape: f32[1,128], index: 2, kind: input, shape index: {}]   ;;  %s734_s3 = inlined_call_operand.vmem [shape: bf16[128,128], index: 3, kind: output, shape index: {}]  }
   0x1   :  { %s665_s14 = smov 0  }
   0x2 LB: > { %s25_s15 = sadd.s32 1, %s635_s13  ;;  %p478_p0 = scmp.ge.s32.totalorder %s639_s14, 1  ;;  %s639_s14 = sphi %s665_s14, %s13_s14   ;;  %s635_s13 = sphi %s663_s13, %s736_s13   ;;  %s631_s12 = sphi %s661_s12, %s735_s12  }
   0x3   : > { %p27_p1 = scmp.ge.s32.totalorder %s25_s15, 2  ;;  %p169_p2 = scmp.lt.s32.totalorder %s639_s14, 3 }
   0x5   : > { %s738_s15 = smov (%p27_p1, %s25_s15), 0  ;;  %p170_p3 = pnand %p478_p0, %p169_p2 }
   0x6   : > { %s479_s24 = sshll.u32 (!%p170_p3), %s631_s12, 3 }
   0x7   : > { %173 = sbr.rel (%p170_p3) target bundleno = 191 (0xbf), region = 32  ;;  %p204_p4 = scmp.lt.s32.totalorder (!%p170_p3), %s479_s24, 15 }
   0xc   : > { %v544_v0 = vld [vmem:[%s732_s1 + $0x38] sm:$0xff]  ;;  %v543_v1 = vld [vmem:[%s732_s1 + $0x30] sm:$0xff]  ;;  %v542_v2 = vld [vmem:[%s732_s1 + $0x28] sm:$0xff]  ;;  %s740_s24 = smov (!%p204_p4, %s479_s24), 15 }
   0xd   : > { %325 = vmatpush.bf16.msra.mxu0 %v544_v0  ;;  %568 = vmatpush.bf16.msra.mxu1 %v544_v0  ;;  %v541_v3 = vld [vmem:[%s732_s1 + $0x20] sm:$0xff]  ;;  %v540_v4 = vld [vmem:[%s732_s1 + $0x18] sm:$0xff]  ;;  %v539_v5 = vld [vmem:[%s732_s1 + $0x10] sm:$0xff]  ;;  %s480_s4 = sshll.u32 %s740_s24, 2 }
   0xe   : > { %569 = vmatpush.bf16.msra.mxu2 %v544_v0  ;;  %570 = vmatpush.bf16.msra.mxu3 %v544_v0  ;;  %v538_v6 = vld [vmem:[%s732_s1 + $0x8] sm:$0xff]  ;;  %v537_v7 = vld [vmem:[%s732_s1] sm:$0xff]  ;;  %s207_s9 = scalar_lea.vmem %s731_s0, %s480_s4  ;;  %s223_s17 = scalar_lea.vmem %s734_s3, %s480_s4 }
   0xf   : > { %v533_v8 = vld [vmem:[%s207_s9] sm:$0xff]  ;;  %v534_v9 = vld [vmem:[%s207_s9 + $0x8] sm:$0xff]  ;;  %v535_v10 = vld [vmem:[%s207_s9 + $0x10] sm:$0xff] }
  0x10   : > { %v536_v11 = vld [vmem:[%s207_s9 + $0x18] sm:$0xff]  ;;  %v616_v14 = vld [vmem:[%s733_s2] ss:$0 sm:$0xff] }
  0x11   : > { %326 = vmatpush.bf16.msra.mxu0 %v543_v1  ;;  %571 = vmatpush.bf16.msra.mxu1 %v543_v1 }
  0x12   : > { %572 = vmatpush.bf16.msra.mxu2 %v543_v1  ;;  %573 = vmatpush.bf16.msra.mxu3 %v543_v1 }
  0x15   : > { %327 = vmatpush.bf16.msra.mxu0 %v542_v2  ;;  %574 = vmatpush.bf16.msra.mxu1 %v542_v2 }
  0x16   : > { %575 = vmatpush.bf16.msra.mxu2 %v542_v2  ;;  %576 = vmatpush.bf16.msra.mxu3 %v542_v2 }
  0x19   : > { %328 = vmatpush.bf16.msra.mxu0 %v541_v3  ;;  %577 = vmatpush.bf16.msra.mxu1 %v541_v3 }
  0x1a   : > { %578 = vmatpush.bf16.msra.mxu2 %v541_v3  ;;  %579 = vmatpush.bf16.msra.mxu3 %v541_v3 }
  0x1d   : > { %329 = vmatpush.bf16.msra.mxu0 %v540_v4  ;;  %580 = vmatpush.bf16.msra.mxu1 %v540_v4 }
  0x1e   : > { %581 = vmatpush.bf16.msra.mxu2 %v540_v4  ;;  %582 = vmatpush.bf16.msra.mxu3 %v540_v4 }
  0x21   : > { %330 = vmatpush.bf16.msra.mxu0 %v539_v5  ;;  %583 = vmatpush.bf16.msra.mxu1 %v539_v5 }
  0x22   : > { %584 = vmatpush.bf16.msra.mxu2 %v539_v5  ;;  %585 = vmatpush.bf16.msra.mxu3 %v539_v5 }
  0x25   : > { %331 = vmatpush.bf16.msra.mxu0 %v538_v6  ;;  %586 = vmatpush.bf16.msra.mxu1 %v538_v6 }
  0x26   : > { %587 = vmatpush.bf16.msra.mxu2 %v538_v6  ;;  %588 = vmatpush.bf16.msra.mxu3 %v538_v6 }
  0x29   : > { %332 = vmatpush.bf16.msra.mxu0 %v537_v7  ;;  %589 = vmatpush.bf16.msra.mxu1 %v537_v7 }
  0x2a   : > { %590 = vmatpush.bf16.msra.mxu2 %v537_v7  ;;  %591 = vmatpush.bf16.msra.mxu3 %v537_v7 }
  0x2c   : > { %333 = vmatmul.bf16.vlgmr.msra.gmra.mxu0 %v533_v8  ;;  %338 = vmatmul.bf16.vlgmr.msra.gmra.mxu1 %v534_v9 }
  0x2d   : > { %343 = vmatmul.bf16.vlgmr.msra.gmra.mxu2 %v535_v10  ;;  %348 = vmatmul.bf16.vlgmr.msra.gmra.mxu3 %v536_v11 }
  0xa9   : > { %v334_v12 = vpop.f32.mrf.mxu0  ;;  %v339_v13 = vpop.f32.mrf.mxu1 }
  0xaa   : > { %v335_v19 = vadd.f32 %v616_v14, %v334_v12  ;;  %v340_v20 = vadd.f32 %v616_v14, %v339_v13 }
  0xb0   : > { %v344_v15 = vpop.f32.mrf.mxu2  ;;  %v349_v16 = vpop.f32.mrf.mxu3 }
  0xb1   : > { %v336_v17 = vpop.f32.mrf.mxu0  ;;  %v341_v18 = vpop.f32.mrf.mxu1  ;;  %v345_v27 = vadd.f32 %v616_v14, %v344_v15  ;;  %v350_v28 = vadd.f32 %v616_v14, %v349_v16 }
  0xb2   : > { %v337_v21 = vadd.f32 %v616_v14, %v336_v17  ;;  %v342_v22 = vadd.f32 %v616_v14, %v341_v18 }
  0xb4   : > { %v548_v23 = vpack.c.bf16 %v337_v21, %v335_v19  ;;  %v553_v24 = vpack.c.bf16 %v342_v22, %v340_v20 }
  0xb6   : > { %549 = vst [vmem:[%s223_s17] sm:$0xff] %v548_v23  }
  0xb7   : > { %565 = vst [vmem:[%s223_s17 + $0x8] sm:$0xff] %v553_v24  }
  0xb8   : > { %v346_v25 = vpop.f32.mrf.mxu2  ;;  %v351_v26 = vpop.f32.mrf.mxu3 }
  0xb9   : > { %v347_v29 = vadd.f32 %v616_v14, %v346_v25  ;;  %v352_v30 = vadd.f32 %v616_v14, %v351_v26 }
  0xbb   : > { %v558_v31 = vpack.c.bf16 %v347_v29, %v345_v27  ;;  %v563_v32 = vpack.c.bf16 %v352_v30, %v350_v28 }
  0xbd   : > { %566 = vst [vmem:[%s223_s17 + $0x10] sm:$0xff] %v558_v31  }
  0xbe   : > { %567 = vst [vmem:[%s223_s17 + $0x18] sm:$0xff] %v563_v32  }
  0xbf PF: > { %s13_s14 = sadd.s32 1, %s639_s14   ;;  %s735_s12 = smov %s635_s13 }
  0xc0   : > { %p10_p5 = scmp.ge.s32.totalorder %s13_s14, 4   ;;  %s736_s13 = smov %s738_s15 }
  0xc2   :  { %12 = sbr.rel (!%p10_p5) target bundleno = 2 (0x2), region = 68 }

// kernel: bottleneck_forward.4
= control target key start
LH: loop header
LB: loop body
LE: loop exit
PB: predicated region body
PF: predicated region fallthrough
CT: control target
= control target key end

     0   :  { %s2503_s12 = smov 0   ;;  %s2505_s13 = smov 0   ;;  %s3973_s0 = inlined_call_operand.vmem [shape: bf16[512,128], index: 0, kind: input, shape index: {}]   ;;  %s3974_s1 = inlined_call_operand.vmem [shape: bf16[128,128], index: 1, kind: input, shape index: {}]   ;;  %s3975_s2 = inlined_call_operand.vmem [shape: f32[1,128], index: 2, kind: input, shape index: {}]   ;;  %s3976_s3 = inlined_call_operand.vmem [shape: bf16[512,128], index: 3, kind: output, shape index: {}]  }
   0x1   :  { %s2507_s14 = smov 0  }
   0x2 LB: > { %s25_s15 = sadd.s32 1, %s2477_s13  ;;  %p2090_p0 = scmp.ge.s32.totalorder %s2481_s14, 1  ;;  %s2481_s14 = sphi %s2507_s14, %s13_s14   ;;  %s2477_s13 = sphi %s2505_s13, %s4028_s13   ;;  %s2473_s12 = sphi %s2503_s12, %s4027_s12  }
   0x3   : > { %p27_p1 = scmp.ge.s32.totalorder %s25_s15, 2  ;;  %p169_p2 = scmp.lt.s32.totalorder %s2481_s14, 3 }
   0x5   : > { %s4030_s15 = smov (%p27_p1, %s25_s15), 0  ;;  %p170_p3 = pnand %p2090_p0, %p169_p2 }
   0x6   : > { %s2091_s24 = sshll.u32 (!%p170_p3), %s2473_s12, 5 }
   0x7   : > { %173 = sbr.rel (%p170_p3) target bundleno = 536 (0x218), region = 32  ;;  %p204_p4 = scmp.lt.s32.totalorder (!%p170_p3), %s2091_s24, 63 }
   0xc   : > { %v2248_v0 = vld [vmem:[%s3974_s1 + $0x38] sm:$0xff]  ;;  %v2247_v1 = vld [vmem:[%s3974_s1 + $0x30] sm:$0xff]  ;;  %v2246_v2 = vld [vmem:[%s3974_s1 + $0x28] sm:$0xff]  ;;  %s4032_s24 = smov (!%p204_p4, %s2091_s24), 63 }
   0xd   : > { %421 = vmatpush.bf16.msra.mxu0 %v2248_v0  ;;  %2344 = vmatpush.bf16.msra.mxu1 %v2248_v0  ;;  %v2245_v3 = vld [vmem:[%s3974_s1 + $0x20] sm:$0xff]  ;;  %v2244_v4 = vld [vmem:[%s3974_s1 + $0x18] sm:$0xff]  ;;  %v2243_v5 = vld [vmem:[%s3974_s1 + $0x10] sm:$0xff]  ;;  %s2092_s4 = sshll.u32 %s4032_s24, 2 }
   0xe   : > { %2345 = vmatpush.bf16.msra.mxu2 %v2248_v0  ;;  %2346 = vmatpush.bf16.msra.mxu3 %v2248_v0  ;;  %v2242_v6 = vld [vmem:[%s3974_s1 + $0x8] sm:$0xff]  ;;  %v2241_v7 = vld [vmem:[%s3974_s1] sm:$0xff]  ;;  %s2556_s9 = scalar_lea.vmem %s3973_s0, %s2092_s4  ;;  %s2918_s17 = scalar_lea.vmem %s3976_s3, %s2092_s4 }
   0xf   : > { %v2225_v8 = vld [vmem:[%s2556_s9] sm:$0xff]  ;;  %v2226_v12 = vld [vmem:[%s2556_s9 + $0x8] sm:$0xff]  ;;  %v2227_v16 = vld [vmem:[%s2556_s9 + $0x10] sm:$0xff] }
  0x10   : > { %v2229_v9 = vld [vmem:[%s2556_s9 + $0x20] sm:$0xff]  ;;  %v2230_v13 = vld [vmem:[%s2556_s9 + $0x28] sm:$0xff]  ;;  %v2231_v17 = vld [vmem:[%s2556_s9 + $0x30] sm:$0xff] }
  0x11   : > { %422 = vmatpush.bf16.msra.mxu0 %v2247_v1  ;;  %2347 = vmatpush.bf16.msra.mxu1 %v2247_v1  ;;  %v2233_v10 = vld [vmem:[%s2556_s9 + $0x40] sm:$0xff]  ;;  %v2234_v14 = vld [vmem:[%s2556_s9 + $0x48] sm:$0xff]  ;;  %v2235_v18 = vld [vmem:[%s2556_s9 + $0x50] sm:$0xff] }
  0x12   : > { %2348 = vmatpush.bf16.msra.mxu2 %v2247_v1  ;;  %2349 = vmatpush.bf16.msra.mxu3 %v2247_v1  ;;  %v2237_v11 = vld [vmem:[%s2556_s9 + $0x60] sm:$0xff]  ;;  %v2238_v15 = vld [vmem:[%s2556_s9 + $0x68] sm:$0xff]  ;;  %v2239_v19 = vld [vmem:[%s2556_s9 + $0x70] sm:$0xff] }
  0x13   : > { %v2228_v20 = vld [vmem:[%s2556_s9 + $0x18] sm:$0xff]  ;;  %v2577_v24 = vld [vmem:[%s3975_s2] ss:$0 sm:$0xff] }
  0x14   : > { %v2232_v21 = vld [vmem:[%s2556_s9 + $0x38] sm:$0xff] }
  0x15   : > { %423 = vmatpush.bf16.msra.mxu0 %v2246_v2  ;;  %2350 = vmatpush.bf16.msra.mxu1 %v2246_v2  ;;  %v2236_v22 = vld [vmem:[%s2556_s9 + $0x58] sm:$0xff] }
  0x16   : > { %2351 = vmatpush.bf16.msra.mxu2 %v2246_v2  ;;  %2352 = vmatpush.bf16.msra.mxu3 %v2246_v2  ;;  %v2240_v23 = vld [vmem:[%s2556_s9 + $0x78] sm:$0xff] }
  0x19   : > { %424 = vmatpush.bf16.msra.mxu0 %v2245_v3  ;;  %2353 = vmatpush.bf16.msra.mxu1 %v2245_v3 }
  0x1a   : > { %2354 = vmatpush.bf16.msra.mxu2 %v2245_v3  ;;  %2355 = vmatpush.bf16.msra.mxu3 %v2245_v3 }
  0x1d   : > { %425 = vmatpush.bf16.msra.mxu0 %v2244_v4  ;;  %2356 = vmatpush.bf16.msra.mxu1 %v2244_v4 }
  0x1e   : > { %2357 = vmatpush.bf16.msra.mxu2 %v2244_v4  ;;  %2358 = vmatpush.bf16.msra.mxu3 %v2244_v4 }
  0x21   : > { %426 = vmatpush.bf16.msra.mxu0 %v2243_v5  ;;  %2359 = vmatpush.bf16.msra.mxu1 %v2243_v5 }
  0x22   : > { %2360 = vmatpush.bf16.msra.mxu2 %v2243_v5  ;;  %2361 = vmatpush.bf16.msra.mxu3 %v2243_v5 }
  0x25   : > { %427 = vmatpush.bf16.msra.mxu0 %v2242_v6  ;;  %2362 = vmatpush.bf16.msra.mxu1 %v2242_v6 }
  0x26   : > { %2363 = vmatpush.bf16.msra.mxu2 %v2242_v6  ;;  %2364 = vmatpush.bf16.msra.mxu3 %v2242_v6 }
  0x29   : > { %428 = vmatpush.bf16.msra.mxu0 %v2241_v7  ;;  %2365 = vmatpush.bf16.msra.mxu1 %v2241_v7 }
  0x2a   : > { %2366 = vmatpush.bf16.msra.mxu2 %v2241_v7  ;;  %2367 = vmatpush.bf16.msra.mxu3 %v2241_v7 }
  0x2c   : > { %429 = vmatmul.bf16.vlgmr.msra.gmra.mxu0 %v2225_v8  ;;  %449 = vmatmul.bf16.vlgmr.msra.gmra.mxu1 %v2229_v9 }
  0x2d   : > { %469 = vmatmul.bf16.vlgmr.msra.gmra.mxu2 %v2233_v10  ;;  %489 = vmatmul.bf16.vlgmr.msra.gmra.mxu3 %v2237_v11 }
  0x3c   : > { %434 = vmatmul.bf16.gmra.mxu0 %v2226_v12  ;;  %454 = vmatmul.bf16.gmra.mxu1 %v2230_v13 }
  0x3d   : > { %474 = vmatmul.bf16.gmra.mxu2 %v2234_v14  ;;  %494 = vmatmul.bf16.gmra.mxu3 %v2238_v15 }
  0x4c   : > { %439 = vmatmul.bf16.gmra.mxu0 %v2227_v16  ;;  %459 = vmatmul.bf16.gmra.mxu1 %v2231_v17 }
  0x4d   : > { %479 = vmatmul.bf16.gmra.mxu2 %v2235_v18  ;;  %499 = vmatmul.bf16.gmra.mxu3 %v2239_v19 }
  0x5c   : > { %444 = vmatmul.bf16.gmra.mxu0 %v2228_v20  ;;  %464 = vmatmul.bf16.gmra.mxu1 %v2232_v21 }
  0x5d   : > { %484 = vmatmul.bf16.gmra.mxu2 %v2236_v22  ;;  %504 = vmatmul.bf16.gmra.mxu3 %v2240_v23 }
  0xa9   : > { %v430_v25 = vpop.f32.mrf.mxu0  ;;  %v450_v26 = vpop.f32.mrf.mxu1 }
  0xaa   : > { %v2580_v27 = vadd.f32 %v2577_v24, %v430_v25  ;;  %v2583_v28 = vadd.f32 %v2577_v24, %v450_v26 }
  0xac   : > { %v2586_v29 = vmul.f32 0.70710677, %v2580_v27  ;;  %v2589_v30 = vmul.f32 0.70710677, %v2583_v28 }
  0xae   : > { %v574_v31 = vmul.f32 %v2586_v29, %v2586_v29  ;;  %v894_v32 = vmul.f32 %v2589_v30, %v2589_v30 }
  0xb0   : > { %v2595_v33 = vmin.f32 %v574_v31, 16.0  ;;  %v2597_v34 = vmin.f32 %v894_v32, 16.0  ;;  %v470_v35 = vpop.f32.mrf.mxu2  ;;  %v490_v36 = vpop.f32.mrf.mxu3 }
  0xb1   : > { %v2600_v37 = vadd.f32 %v2577_v24, %v470_v35  ;;  %v2603_v38 = vadd.f32 %v2577_v24, %v490_v36  ;;  %v432_v2 = vpop.f32.mrf.mxu0 }
  0xb2   : > { %v576_v39 = vmul.f32 2.1237322e-06, %v2595_v33  ;;  %v587_v40 = vmul.f32 3.8918573e-05, %v2595_v33  ;;  %v896_v41 = vmul.f32 2.1237322e-06, %v2597_v34  ;;  %v433_v11 = vadd.f32 %v2577_v24, %v432_v2 }
  0xb3   : > { %v907_v42 = vmul.f32 3.8918573e-05, %v2597_v34  ;;  %v2610_v43 = vmul.f32 0.70710677, %v2600_v37  ;;  %v2615_v49 = vmul.f32 0.70710677, %v2603_v38 }
  0xb4   : > { %v577_v44 = vadd.f32 0.00028619796, %v576_v39  ;;  %v588_v45 = vadd.f32 0.001143296, %v587_v40  ;;  %v897_v46 = vadd.f32 0.00028619796, %v896_v41 }
  0xb5   : > { %v908_v47 = vadd.f32 0.001143296, %v907_v42  ;;  %v1214_v48 = vmul.f32 %v2610_v43, %v2610_v43  ;;  %v1534_v55 = vmul.f32 %v2615_v49, %v2615_v49  ;;  %v2642_v23 = vmul.f32 0.70710677, %v433_v11 }
  0xb6   : > { %v578_v50 = vmul.f32 %v577_v44, %v2595_v33  ;;  %v589_v51 = vmul.f32 %v588_v45, %v2595_v33  ;;  %v898_v52 = vmul.f32 %v897_v46, %v2597_v34  ;;  %v452_v46 = vpop.f32.mrf.mxu1  ;;  %v2674_v2 = vmul.f32 0.5, %v433_v11 }
  0xb7   : > { %v909_v53 = vmul.f32 %v908_v47, %v2597_v34  ;;  %v2621_v54 = vmin.f32 %v1214_v48, 16.0  ;;  %v2630_v1 = vmin.f32 %v1534_v55, 16.0  ;;  %v614_v45 = vmul.f32 %v2642_v23, %v2642_v23 }
  0xb8   : > { %v579_v56 = vadd.f32 0.0036580483, %v578_v50  ;;  %v590_v57 = vadd.f32 0.014752088, %v589_v51  ;;  %v899_v58 = vadd.f32 0.0036580483, %v898_v52 }
  0xb9   : > { %v910_v59 = vadd.f32 0.014752088, %v909_v53  ;;  %v1216_v60 = vmul.f32 2.1237322e-06, %v2621_v54  ;;  %v1227_v61 = vmul.f32 3.8918573e-05, %v2621_v54  ;;  %v453_v53 = vadd.f32 %v2577_v24, %v452_v46 }
  0xba   : > { %v580_v62 = vmul.f32 %v579_v56, %v2595_v33  ;;  %v591_v63 = vmul.f32 %v590_v57, %v2595_v33  ;;  %v900_v0 = vmul.f32 %v899_v58, %v2597_v34  ;;  %v1536_v10 = vmul.f32 2.1237322e-06, %v2630_v1  ;;  %v472_v58 = vpop.f32.mrf.mxu2 }
  0xbb   : > { %v911_v3 = vmul.f32 %v910_v59, %v2597_v34  ;;  %v1217_v4 = vadd.f32 0.00028619796, %v1216_v60  ;;  %v1228_v5 = vadd.f32 0.001143296, %v1227_v61  ;;  %v1547_v15 = vmul.f32 3.8918573e-05, %v2630_v1 }
  0xbc   : > { %v581_v6 = vadd.f32 0.05243302, %v580_v62  ;;  %v592_v7 = vadd.f32 0.112945676, %v591_v63  ;;  %v901_v13 = vadd.f32 0.05243302, %v900_v0 }
  0xbd   : > { %v912_v8 = vadd.f32 0.112945676, %v911_v3  ;;  %v1229_v9 = vmul.f32 %v1228_v5, %v2621_v54  ;;  %v1218_v14 = vmul.f32 %v1217_v4, %v2621_v54  ;;  %v1537_v20 = vadd.f32 0.00028619796, %v1536_v10 }
  0xbe   : > { %v593_v12 = vmul.f32 %v592_v7, %v2595_v33  ;;  %v582_v16 = vmul.f32 %v581_v6, %v2595_v33  ;;  %v902_v26 = vmul.f32 %v901_v13, %v2597_v34  ;;  %v1548_v32 = vadd.f32 0.001143296, %v1547_v15 }
  0xbf   : > { %v913_v17 = vmul.f32 %v912_v8, %v2597_v34  ;;  %v1230_v18 = vadd.f32 0.014752088, %v1229_v9  ;;  %v1219_v31 = vadd.f32 0.0036580483, %v1218_v14  ;;  %v1538_v41 = vmul.f32 %v1537_v20, %v2630_v1 }
  0xc0   : > { %v594_v19 = vadd.f32 0.4994258, %v593_v12  ;;  %v583_v35 = vadd.f32 0.18741608, %v582_v16  ;;  %v903_v47 = vadd.f32 0.18741608, %v902_v26  ;;  %v1549_v50 = vmul.f32 %v1548_v32, %v2630_v1 }
  0xc1   : > { %v914_v21 = vadd.f32 0.4994258, %v913_v17  ;;  %v1231_v22 = vmul.f32 %v1230_v18, %v2621_v54  ;;  %v1220_v48 = vmul.f32 %v1219_v31, %v2621_v54  ;;  %v1539_v52 = vadd.f32 0.0036580483, %v1538_v41 }
  0xc2   : > { %v595_v25 = vmul.f32 %v594_v19, %v2595_v33  ;;  %v584_v51 = vmul.f32 %v583_v35, %v2595_v33  ;;  %v2662_v55 = vmul.f32 0.5, %v2580_v27  ;;  %v2664_v57 = vmin.f32 %v614_v45, 16.0 }
  0xc3   : > { %v915_v36 = vmul.f32 %v914_v21, %v2597_v34  ;;  %v1232_v39 = vadd.f32 0.112945676, %v1231_v22  ;;  %v2667_v59 = vmul.f32 0.5, %v2583_v28  ;;  %v904_v60 = vmul.f32 %v903_v47, %v2597_v34 }
  0xc4   : > { %v2647_v40 = vadd.f32 1.0, %v595_v25  ;;  %v1221_v61 = vadd.f32 0.05243302, %v1220_v48  ;;  %v1550_v62 = vadd.f32 0.014752088, %v1549_v50  ;;  %v2671_v63 = vmul.f32 0.5, %v2600_v37 }
  0xc5   : > { %v2650_v42 = vadd.f32 1.0, %v915_v36  ;;  %v1233_v44 = vmul.f32 %v1232_v39, %v2621_v54  ;;  %v585_v33 = vadd.f32 1.1283791, %v584_v51  ;;  %v1540_v3 = vmul.f32 %v1539_v52, %v2630_v1 }
  0xc6   : > { %2393 = vrcp.f32 %v2647_v40  ;;  %v1551_v4 = vmul.f32 %v1550_v62, %v2630_v1  ;;  %v2680_v28 = vmul.f32 0.5, %v453_v53  ;;  %v2683_v34 = vadd.f32 %v2577_v24, %v472_v58 }
  0xc7   : > { %2395 = vrcp.f32 %v2650_v42  ;;  %v1234_v56 = vadd.f32 0.4994258, %v1233_v44  ;;  %v616_v7 = vmul.f32 2.1237322e-06, %v2664_v57  ;;  %v627_v8 = vmul.f32 3.8918573e-05, %v2664_v57 }
  0xc8   : > { %v905_v9 = vadd.f32 1.1283791, %v904_v60  ;;  %v1222_v11 = vmul.f32 %v1221_v61, %v2621_v54  ;;  %v1552_v12 = vadd.f32 0.112945676, %v1551_v4  ;;  %v2697_v13 = vmul.f32 %v585_v33, %v2586_v29 }
  0xc9   : > { %v1235_v0 = vmul.f32 %v1234_v56, %v2621_v54  ;;  %v2700_v15 = vmul.f32 0.70710677, %v453_v53  ;;  %v606_v16 = vand.u32 2147483647, %v2647_v40  ;;  %v608_v17 = vand.u32 2147483648, %v2647_v40 }
  0xca   : > { %v1553_v19 = vmul.f32 %v1552_v12, %v2630_v1  ;;  %vm602_vm0 = vweird.f32 %v2647_v40  ;;  %v1541_v20 = vadd.f32 0.05243302, %v1540_v3  ;;  %v617_v21 = vadd.f32 0.00028619796, %v616_v7 }
  0xcb   : > { %v2689_v6 = vadd.f32 1.0, %v1235_v0  ;;  %v628_v22 = vadd.f32 0.001143296, %v627_v8  ;;  %v2707_v29 = vmul.f32 %v905_v9, %v2589_v30  ;;  %vm922_vm1 = vweird.f32 %v2650_v42 }
  0xcc   : > { %v2676_v27 = vpop.eup %2393  ;;  %v1223_v25 = vadd.f32 0.18741608, %v1222_v11  ;;  %v1554_v26 = vadd.f32 0.4994258, %v1553_v19  ;;  %v618_v32 = vmul.f32 %v617_v21, %v2664_v57  ;;  %v934_v36 = vmul.f32 %v2700_v15, %v2700_v15 }
  0xcd   : > { %v2685_v5 = vpop.eup %2395  ;;  %v598_v37 = vmul.f32 %v2676_v27, %v2647_v40  ;;  %2397 = vrcp.f32 %v2689_v6  ;;  %v629_v35 = vmul.f32 %v628_v22, %v2664_v57  ;;  %v926_v41 = vand.u32 2147483647, %v2650_v42 }
  0xce   : > { %v918_v10 = vmul.f32 %v2685_v5, %v2650_v42  ;;  %v928_v30 = vand.u32 2147483648, %v2650_v42  ;;  %v1555_v44 = vmul.f32 %v1554_v26, %v2630_v1  ;;  %v1542_v46 = vmul.f32 %v1541_v20, %v2630_v1 }
  0xcf   : > { %v599_v14 = vsub.f32 1.0, %v598_v37  ;;  %v619_v47 = vadd.f32 0.0036580483, %v618_v32  ;;  %v630_v48 = vadd.f32 0.014752088, %v629_v35  ;;  %v2722_v50 = vmin.f32 %v934_v36, 16.0 }
  0xd0   : > { %v919_v18 = vsub.f32 1.0, %v918_v10  ;;  %vm603_vm2 = vweird.f32 %v2676_v27  ;;  %v1224_v51 = vmul.f32 %v1223_v25, %v2621_v54  ;;  %v2729_v53 = vmul.f32 0.70710677, %v2683_v34 }
  0xd1   : > { %v600_v31 = vmul.f32 %v2676_v27, %v599_v14  ;;  %vm923_vm3 = vweird.f32 %v2685_v5  ;;  %v2733_v58 = vadd.f32 1.0, %v1555_v44  ;;  %v620_v60 = vmul.f32 %v619_v47, %v2664_v57  ;;  %vm2748_vm5 = vmor %vm602_vm0, %vm603_vm2 }
  0xd2   : > { %v920_v39 = vmul.f32 %v2685_v5, %v919_v18  ;;  %v631_v33 = vmul.f32 %v630_v48, %v2664_v57  ;;  %v936_v54 = vmul.f32 2.1237322e-06, %v2722_v50  ;;  %vm2739_vm4 = vcmp.eq.f32.partialorder %v606_v16, 8.507059e+37  ;;  %vm2766_vm7 = vmor %vm922_vm1, %vm923_vm3 }
  0xd3   : > { %v2719_v45 = vpop.eup %2397  ;;  %v601_v56 = vadd.f32 %v2676_v27, %v600_v31  ;;  %v609_v3 = vor.u32 1.1754944e-38, %v608_v17  ;;  %v1543_v4 = vadd.f32 0.18741608, %v1542_v46  ;;  %2399 = vrcp.f32 %v2733_v58 }
  0xd4   : > { %v1238_v52 = vmul.f32 %v2719_v45, %v2689_v6  ;;  %v921_v61 = vadd.f32 %v2685_v5, %v920_v39  ;;  %vm2752_vm6 = vcmp.eq.f32.partialorder %v926_v41, 8.507059e+37  ;;  %v621_v9 = vadd.f32 0.05243302, %v620_v60  ;;  %v492_v60 = vpop.f32.mrf.mxu3 }
  0xd5   : > { %v1254_v10 = vmul.f32 %v2729_v53, %v2729_v53  ;;  %v605_v11 = vsel %vm2748_vm5, %v2676_v27, %v601_v56  ;;  %v929_v12 = vor.u32 1.1754944e-38, %v928_v30  ;;  %v632_v14 = vadd.f32 0.112945676, %v631_v33 }
  0xd6   : > { %v1239_v62 = vsub.f32 1.0, %v1238_v52  ;;  %v937_v16 = vadd.f32 0.00028619796, %v936_v54  ;;  %v925_v17 = vsel %vm2766_vm7, %v2685_v5, %v921_v61  ;;  %v1225_v18 = vadd.f32 1.1283791, %v1224_v51 }
  0xd7   : > { %v1248_v19 = vand.u32 2147483648, %v2689_v6  ;;  %v622_v27 = vmul.f32 %v621_v9, %v2664_v57  ;;  %v1544_v20 = vmul.f32 %v1543_v4, %v2630_v1  ;;  %v633_v42 = vmul.f32 %v632_v14, %v2664_v57 }
  0xd8   : > { %v1240_v8 = vmul.f32 %v2719_v45, %v1239_v62  ;;  %v938_v21 = vmul.f32 %v937_v16, %v2722_v50  ;;  %v947_v22 = vmul.f32 3.8918573e-05, %v2722_v50  ;;  %v610_v25 = vsel %vm2739_vm4, %v609_v3, %v605_v11 }
  0xd9   : > { %vm1243_vm8 = vweird.f32 %v2719_v45  ;;  %v2783_v5 = vmin.f32 %v1254_v10, 16.0  ;;  %v2785_v31 = vpop.eup %2399  ;;  %v930_v1 = vsel %vm2752_vm6, %v929_v12, %v925_v17  ;;  %v634_v32 = vadd.f32 0.4994258, %v633_v42 }
  0xda   : > { %v1241_v26 = vadd.f32 %v2719_v45, %v1240_v8  ;;  %v939_v35 = vadd.f32 0.0036580483, %v938_v21  ;;  %v948_v36 = vadd.f32 0.001143296, %v947_v22  ;;  %vm1242_vm9 = vweird.f32 %v2689_v6 }
  0xdb   : > { %v1246_v39 = vand.u32 2147483647, %v2689_v6  ;;  %v1249_v41 = vor.u32 1.1754944e-38, %v1248_v19  ;;  %v623_v30 = vadd.f32 0.18741608, %v622_v27  ;;  %v611_v44 = vmul.f32 %v610_v25, %v2697_v13  ;;  %vm2792_vm10 = vmor %vm1242_vm9, %vm1243_vm8 }
  0xdc   : > { %v635_v47 = vmul.f32 %v634_v32, %v2664_v57  ;;  %v949_v48 = vmul.f32 %v948_v36, %v2722_v50  ;;  %v1256_v51 = vmul.f32 2.1237322e-06, %v2783_v5  ;;  %v931_v52 = vmul.f32 %v930_v1, %v2707_v29 }
  0xdd   : > { %v1245_v6 = vsel %vm2792_vm10, %v2719_v45, %v1241_v26  ;;  %v1545_v56 = vadd.f32 1.1283791, %v1544_v20  ;;  %v1558_v13 = vmul.f32 %v2785_v31, %v2733_v58  ;;  %v940_v62 = vmul.f32 %v939_v35, %v2722_v50 }
  0xde   : > { %v2805_v61 = vadd.f32 1.0, %v635_v47  ;;  %v950_v33 = vadd.f32 0.014752088, %v949_v48  ;;  %v1267_v54 = vmul.f32 3.8918573e-05, %v2783_v5  ;;  %v1226_v0 = vmul.f32 %v1225_v18, %v2610_v43 }
  0xdf   : > { %vm1247_vm11 = vcmp.eq.f32.partialorder %v1246_v39, 8.507059e+37  ;;  %v624_v29 = vmul.f32 %v623_v30, %v2664_v57  ;;  %v1257_v3 = vadd.f32 0.00028619796, %v1256_v51  ;;  %v2191_v4 = vclamps-f32 %v611_v44, 1.0 }
  0xe0   : > { %v1250_v45 = vsel %vm1247_vm11, %v1249_v41, %v1245_v6  ;;  %2401 = vrcp.f32 %v2805_v61  ;;  %v2813_v37 = vadd.f32 %v2577_v24, %v492_v60  ;;  %v2199_v7 = vclamps-f32 %v931_v52, 1.0 }
  0xe1   : > { %v1559_v8 = vsub.f32 1.0, %v1558_v13  ;;  %v1568_v9 = vand.u32 2147483648, %v2733_v58  ;;  %v951_v10 = vmul.f32 %v950_v33, %v2722_v50  ;;  %v2818_v11 = vmul.f32 %v1545_v56, %v2615_v49  ;;  %v435_v49 = vpop.f32.mrf.mxu0 }
  0xe2   : > { %v941_v43 = vadd.f32 0.05243302, %v940_v62  ;;  %v1258_v57 = vmul.f32 %v1257_v3, %v2783_v5  ;;  %v1268_v40 = vadd.f32 0.001143296, %v1267_v54  ;;  %v2821_v12 = vmul.f32 %v1250_v45, %v1226_v0  ;;  %v455_v3 = vpop.f32.mrf.mxu1 }
  0xe3   : > { %v1566_v14 = vand.u32 2147483647, %v2733_v58  ;;  %v625_v16 = vadd.f32 1.1283791, %v624_v29  ;;  %v952_v17 = vadd.f32 0.112945676, %v951_v10  ;;  %vm1562_vm12 = vweird.f32 %v2733_v58 }
  0xe4   : > { %v1854_v18 = vadd.f32 1.0, %v2191_v4  ;;  %v1259_v19 = vadd.f32 0.0036580483, %v1258_v57  ;;  %v1269_v27 = vmul.f32 %v1268_v40, %v2783_v5  ;;  %v2827_v20 = vmul.f32 0.70710677, %v2813_v37 }
  0xe5   : > { %v1862_v42 = vadd.f32 1.0, %v2199_v7  ;;  %v1560_v21 = vmul.f32 %v2785_v31, %v1559_v8  ;;  %v1569_v22 = vor.u32 1.1754944e-38, %v1568_v9  ;;  %v953_v25 = vmul.f32 %v952_v17, %v2722_v50 }
  0xe6   : > { %v2402_v26 = vpop.eup %2401  ;;  %vm1563_vm13 = vweird.f32 %v2785_v31  ;;  %v942_v1 = vmul.f32 %v941_v43, %v2722_v50  ;;  %v1270_v32 = vadd.f32 0.014752088, %v1269_v27  ;;  %v1574_v35 = vmul.f32 %v2827_v20, %v2827_v20 }
  0xe7   : > { %v2207_v36 = vclamps-f32 %v2821_v12, 1.0  ;;  %v626_v39 = vmul.f32 %v625_v16, %v2642_v23  ;;  %v638_v41 = vmul.f32 %v2402_v26, %v2805_v61  ;;  %v2839_v30 = vadd.f32 %v2577_v24, %v435_v49  ;;  %vm2865_vm0 = vmor %vm1562_vm12, %vm1563_vm13 }
  0xe8   : > { %v954_v44 = vadd.f32 0.4994258, %v953_v25  ;;  %v1260_v46 = vmul.f32 %v1259_v19, %v2783_v5  ;;  %v1271_v47 = vmul.f32 %v1270_v32, %v2783_v5  ;;  %v2843_v48 = vmin.f32 %v1574_v35, 16.0 }
  0xe9   : > { %v1561_v51 = vadd.f32 %v2785_v31, %v1560_v21  ;;  %v639_v52 = vsub.f32 1.0, %v638_v41  ;;  %v646_v6 = vand.u32 2147483647, %v2805_v61  ;;  %v648_v56 = vand.u32 2147483648, %v2805_v61 }
  0xea   : > { %vm2848_vm14 = vcmp.eq.f32.partialorder %v1566_v14, 8.507059e+37  ;;  %v943_v13 = vadd.f32 0.18741608, %v942_v1  ;;  %v955_v60 = vmul.f32 %v954_v44, %v2722_v50  ;;  %v1272_v62 = vadd.f32 0.112945676, %v1271_v47 }
  0xeb   : > { %v1576_v33 = vmul.f32 2.1237322e-06, %v2843_v48  ;;  %v640_v54 = vmul.f32 %v2402_v26, %v639_v52  ;;  %vm643_vm15 = vweird.f32 %v2402_v26  ;;  %v1587_v0 = vmul.f32 3.8918573e-05, %v2843_v48 }
  0xec   : > { %v2856_v29 = vmul.f32 0.70710677, %v2839_v30  ;;  %v2858_v4 = vadd.f32 1.0, %v955_v60  ;;  %v1261_v45 = vadd.f32 0.05243302, %v1260_v46  ;;  %v1273_v7 = vmul.f32 %v1272_v62, %v2783_v5 }
  0xed   : > { %v1577_v8 = vadd.f32 0.00028619796, %v1576_v33  ;;  %v641_v10 = vadd.f32 %v2402_v26, %v640_v54  ;;  %vm642_vm1 = vweird.f32 %v2805_v61  ;;  %vm647_vm2 = vcmp.eq.f32.partialorder %v646_v6, 8.507059e+37 }
  0xee   : > { %v1588_v43 = vadd.f32 0.001143296, %v1587_v0  ;;  %vm644_vm3 = vmor %vm642_vm1, %vm643_vm15  ;;  %v649_v57 = vor.u32 1.1754944e-38, %v648_v56  ;;  %2403 = vrcp.f32 %v2858_v4  ;;  %v654_v40 = vmul.f32 %v2856_v29, %v2856_v29 }
  0xef   : > { %v2874_v12 = vadd.f32 %v2577_v24, %v455_v3  ;;  %v1565_v58 = vsel %vm2865_vm0, %v2785_v31, %v1561_v51  ;;  %v645_v14 = vsel %vm644_vm3, %v2402_v26, %v641_v10  ;;  %v1274_v16 = vadd.f32 0.4994258, %v1273_v7 }
  0xf0   : > { %v1578_v61 = vmul.f32 %v1577_v8, %v2843_v48  ;;  %v650_v17 = vsel %vm647_vm2, %v649_v57, %v645_v14  ;;  %v944_v19 = vmul.f32 %v943_v13, %v2722_v50  ;;  %v1262_v27 = vmul.f32 %v1261_v45, %v2783_v5  ;;  %v475_v8 = vpop.f32.mrf.mxu2 }
  0xf1   : > { %v1589_v49 = vmul.f32 %v1588_v43, %v2843_v48  ;;  %v1886_v21 = vmul.f32 %v1854_v18, %v2662_v55  ;;  %v651_v25 = vmul.f32 %v650_v17, %v626_v39  ;;  %v1275_v1 = vmul.f32 %v1274_v16, %v2783_v5 }
  0xf2   : > { %v1579_v32 = vadd.f32 0.0036580483, %v1578_v61  ;;  %v2886_v35 = vmul.f32 %v1862_v42, %v2667_v59  ;;  %v2888_v26 = vmin.f32 %v654_v40, 16.0  ;;  %v2891_v41 = vmul.f32 0.70710677, %v2874_v12 }
  0xf3   : > { %v1590_v31 = vadd.f32 0.014752088, %v1589_v49  ;;  %v2893_v50 = vadd.f32 1.0, %v2207_v36  ;;  %v1570_v44 = vsel %vm2848_vm14, %v1569_v22, %v1565_v58  ;;  %v2192_v46 = vclamps-f32 %v651_v25, 1.0 }
  0xf4   : > { %v2897_v55 = vadd.f32 1.0, %v1275_v1  ;;  %v2404_v18 = vpop.eup %2403  ;;  %v945_v39 = vadd.f32 1.1283791, %v944_v19  ;;  %v1263_v47 = vadd.f32 0.18741608, %v1262_v27  ;;  %v1580_v36 = vmul.f32 %v1579_v32, %v2843_v48 }
  0xf5   : > { %v1591_v59 = vmul.f32 %v1590_v31, %v2843_v48  ;;  %v667_v42 = vmul.f32 3.8918573e-05, %v2888_v26  ;;  %v1855_v51 = vadd.f32 1.0, %v2192_v46  ;;  %v958_v52 = vmul.f32 %v2404_v18, %v2858_v4 }
  0xf6   : > { %2405 = vrcp.f32 %v2897_v55  ;;  %v2905_v22 = vmul.f32 %v1570_v44, %v2818_v11  ;;  %v966_v6 = vand.u32 2147483647, %v2858_v4  ;;  %v968_v56 = vand.u32 2147483648, %v2858_v4 }
  0xf7   : > { %v974_v23 = vmul.f32 %v2891_v41, %v2891_v41  ;;  %v1887_v13 = vmul.f32 %v1855_v51, %v2674_v2  ;;  %v959_v60 = vsub.f32 1.0, %v958_v52  ;;  %v1592_v62 = vadd.f32 0.112945676, %v1591_v59 }
  0xf8   : > { %v656_v33 = vmul.f32 2.1237322e-06, %v2888_v26  ;;  %v946_v11 = vmul.f32 %v945_v39, %v2700_v15  ;;  %vm963_vm4 = vweird.f32 %v2404_v18  ;;  %v1264_v54 = vmul.f32 %v1263_v47, %v2783_v5 }
  0xf9   : > { %v668_v0 = vadd.f32 0.001143296, %v667_v42  ;;  %v2252_v3 = vpack.c.bf16 %v1887_v13, %v1886_v21  ;;  %v960_v45 = vmul.f32 %v2404_v18, %v959_v60  ;;  %v1581_v2 = vadd.f32 0.05243302, %v1580_v36 }
  0xfa   : > { %v1593_v7 = vmul.f32 %v1592_v62, %v2843_v48  ;;  %vm962_vm5 = vweird.f32 %v2858_v4  ;;  %vm2924_vm6 = vcmp.eq.f32.partialorder %v966_v6, 8.507059e+37  ;;  %v2929_v43 = vmin.f32 %v974_v23, 16.0 }
  0xfb   : > { %v669_v10 = vmul.f32 %v668_v0, %v2888_v26  ;;  %2253 = vst [vmem:[%s2918_s17] sm:$0xff] %v2252_v3   ;;  %v961_v5 = vadd.f32 %v2404_v18, %v960_v45  ;;  %v969_v57 = vor.u32 1.1754944e-38, %v968_v56  ;;  %v657_v58 = vadd.f32 0.00028619796, %v656_v33  ;;  %vm964_vm7 = vmor %vm962_vm5, %vm963_vm4 }
  0xfc   : > { %v2406_v15 = vpop.eup %2405  ;;  %v1594_v40 = vadd.f32 0.4994258, %v1593_v7  ;;  %v1265_v14 = vadd.f32 1.1283791, %v1264_v54  ;;  %v2935_v61 = vadd.f32 %v2577_v24, %v475_v8  ;;  %v1286_v19 = vand.u32 2147483647, %v2897_v55 }
  0xfd   : > { %v1278_v16 = vmul.f32 %v2406_v15, %v2897_v55  ;;  %v670_v4 = vadd.f32 0.014752088, %v669_v10  ;;  %v965_v17 = vsel %vm964_vm7, %v2404_v18, %v961_v5  ;;  %v1582_v27 = vmul.f32 %v1581_v2, %v2843_v48 }
  0xfe   : > { %v1595_v49 = vmul.f32 %v1594_v40, %v2843_v48  ;;  %v970_v21 = vsel %vm2924_vm6, %v969_v57, %v965_v17  ;;  %v976_v32 = vmul.f32 2.1237322e-06, %v2929_v43  ;;  %v1288_v44 = vand.u32 2147483648, %v2897_v55 }
  0xff   : > { %v1279_v25 = vsub.f32 1.0, %v1278_v16  ;;  %v671_v1 = vmul.f32 %v670_v4, %v2888_v26  ;;  %v971_v31 = vmul.f32 %v970_v21, %v946_v11  ;;  %v658_v18 = vmul.f32 %v657_v58, %v2888_v26 }
 0x100   : > { %v2945_v46 = vadd.f32 1.0, %v1595_v49  ;;  %vm1283_vm8 = vweird.f32 %v2406_v15  ;;  %v987_v59 = vmul.f32 3.8918573e-05, %v2929_v43  ;;  %vm1282_vm9 = vweird.f32 %v2897_v55 }
 0x101   : > { %v1280_v39 = vmul.f32 %v2406_v15, %v1279_v25  ;;  %v672_v47 = vadd.f32 0.112945676, %v671_v1  ;;  %v2200_v42 = vclamps-f32 %v971_v31, 1.0  ;;  %v1583_v51 = vadd.f32 0.18741608, %v1582_v27  ;;  %vm1284_vm10 = vmor %vm1282_vm9, %vm1283_vm8 }
 0x102   : > { %2407 = vrcp.f32 %v2945_v46  ;;  %v977_v6 = vadd.f32 0.00028619796, %v976_v32  ;;  %v2953_v56 = vmul.f32 0.70710677, %v2935_v61  ;;  %v1289_v13 = vor.u32 1.1754944e-38, %v1288_v44 }
 0x103   : > { %v1281_v52 = vadd.f32 %v2406_v15, %v1280_v39  ;;  %v673_v36 = vmul.f32 %v672_v47, %v2888_v26  ;;  %v1863_v23 = vadd.f32 1.0, %v2200_v42  ;;  %v659_v60 = vadd.f32 0.0036580483, %v658_v18 }
 0x104   : > { %v988_v62 = vadd.f32 0.001143296, %v987_v59  ;;  %v1266_v33 = vmul.f32 %v1265_v14, %v2729_v53  ;;  %vm1287_vm11 = vcmp.eq.f32.partialorder %v1286_v19, 8.507059e+37  ;;  %v1584_v3 = vmul.f32 %v1583_v51, %v2843_v48  ;;  %v495_v14 = vpop.f32.mrf.mxu3 }
 0x105   : > { %v1285_v11 = vsel %vm1284_vm10, %v2406_v15, %v1281_v52  ;;  %v674_v55 = vadd.f32 0.4994258, %v673_v36  ;;  %v1895_v54 = vmul.f32 %v1863_v23, %v2680_v28  ;;  %v978_v8 = vmul.f32 %v977_v6, %v2929_v43 }
 0x106   : > { %v1290_v0 = vsel %vm1287_vm11, %v1289_v13, %v1285_v11  ;;  %v989_v45 = vmul.f32 %v988_v62, %v2929_v43  ;;  %v1294_v9 = vmul.f32 %v2953_v56, %v2953_v56  ;;  %v527_v15 = vmul.f32 0.5, %v2683_v34  ;;  %v437_v13 = vpop.f32.mrf.mxu0 }
 0x107   : > { %v1291_v2 = vmul.f32 %v1290_v0, %v1266_v33  ;;  %v675_v7 = vmul.f32 %v674_v55, %v2888_v26  ;;  %v2272_v10 = vpack.c.bf16 %v1895_v54, %v2886_v35  ;;  %v660_v28 = vmul.f32 %v659_v60, %v2888_v26 }
 0x108   : > { %v2408_v53 = vpop.eup %2407  ;;  %v990_v5 = vadd.f32 0.014752088, %v989_v45  ;;  %v1902_v48 = vmul.f32 %v2893_v50, %v2671_v63  ;;  %v2215_v57 = vclamps-f32 %v2905_v22, 1.0  ;;  %v1608_v16 = vand.u32 2147483648, %v2945_v46 }
 0x109   : > { %v2208_v40 = vclamps-f32 %v1291_v2, 1.0  ;;  %v1598_v58 = vmul.f32 %v2408_v53, %v2945_v46  ;;  %2332 = vst [vmem:[%s2918_s17 + $0x20] sm:$0xff] %v2272_v10   ;;  %v2972_v4 = vadd.f32 1.0, %v675_v7  ;;  %v2975_v34 = vmin.f32 %v1294_v9, 16.0 }
 0x10a   : > { %v991_v35 = vmul.f32 %v990_v5, %v2929_v43  ;;  %v1585_v19 = vadd.f32 1.1283791, %v1584_v3  ;;  %v979_v49 = vadd.f32 0.0036580483, %v978_v8  ;;  %v1606_v63 = vand.u32 2147483647, %v2945_v46 }
 0x10b   : > { %v1871_v17 = vadd.f32 1.0, %v2208_v40  ;;  %v1599_v27 = vsub.f32 1.0, %v1598_v58  ;;  %v661_v50 = vadd.f32 0.05243302, %v660_v28  ;;  %2409 = vrcp.f32 %v2972_v4 }
 0x10c   : > { %v2980_v22 = vadd.f32 %v2577_v24, %v495_v14  ;;  %vm1603_vm12 = vweird.f32 %v2408_v53  ;;  %v992_v1 = vadd.f32 0.112945676, %v991_v35  ;;  %vm1602_vm13 = vweird.f32 %v2945_v46 }
 0x10d   : > { %v1903_v21 = vmul.f32 %v1871_v17, %v527_v15  ;;  %v1600_v25 = vmul.f32 %v2408_v53, %v1599_v27  ;;  %v1609_v32 = vor.u32 1.1754944e-38, %v1608_v16  ;;  %v1296_v31 = vmul.f32 2.1237322e-06, %v2975_v34  ;;  %vm1604_vm14 = vmor %vm1602_vm13, %vm1603_vm12 }
 0x10e   : > { %v1307_v44 = vmul.f32 3.8918573e-05, %v2975_v34  ;;  %v980_v47 = vmul.f32 %v979_v49, %v2929_v43  ;;  %v993_v59 = vmul.f32 %v992_v1, %v2929_v43  ;;  %v1586_v42 = vmul.f32 %v1585_v19, %v2827_v20 }
 0x10f   : > { %v2292_v18 = vpack.c.bf16 %v1903_v21, %v1902_v48  ;;  %v1601_v39 = vadd.f32 %v2408_v53, %v1600_v25  ;;  %v1297_v51 = vadd.f32 0.00028619796, %v1296_v31  ;;  %v2989_v36 = vmul.f32 0.70710677, %v2980_v22 }
 0x110   : > { %v1308_v52 = vadd.f32 0.001143296, %v1307_v44  ;;  %vm1607_vm15 = vcmp.eq.f32.partialorder %v1606_v63, 8.507059e+37  ;;  %v662_v6 = vmul.f32 %v661_v50, %v2888_v26  ;;  %v994_v23 = vadd.f32 0.4994258, %v993_v59 }
 0x111   : > { %2336 = vst [vmem:[%s2918_s17 + $0x40] sm:$0xff] %v2292_v18   ;;  %v1605_v46 = vsel %vm1604_vm14, %v2408_v53, %v1601_v39  ;;  %v2993_v60 = vpop.eup %2409  ;;  %v1298_v33 = vmul.f32 %v1297_v51, %v2975_v34  ;;  %v1614_v11 = vmul.f32 %v2989_v36, %v2989_v36  ;;  %v534_v55 = vmul.f32 0.5, %v2603_v38 }
 0x112   : > { %v1610_v62 = vsel %vm1607_vm15, %v1609_v32, %v1605_v46  ;;  %v1309_v20 = vmul.f32 %v1308_v52, %v2975_v34  ;;  %v678_v0 = vmul.f32 %v2993_v60, %v2972_v4  ;;  %v981_v3 = vadd.f32 0.05243302, %v980_v47 }
 0x113   : > { %v1611_v54 = vmul.f32 %v1610_v62, %v1586_v42  ;;  %v995_v45 = vmul.f32 %v994_v23, %v2929_v43  ;;  %v3003_v7 = vmin.f32 %v1614_v11, 16.0  ;;  %v3006_v8 = vadd.f32 %v2577_v24, %v437_v13 }
 0x114   : > { %v1310_v2 = vadd.f32 0.014752088, %v1309_v20  ;;  %v1878_v9 = vadd.f32 1.0, %v2215_v57  ;;  %v679_v10 = vsub.f32 1.0, %v678_v0  ;;  %v1299_v15 = vadd.f32 0.0036580483, %v1298_v33 }
 0x115   : > { %v2216_v53 = vclamps-f32 %v1611_v54, 1.0  ;;  %v663_v28 = vadd.f32 0.18741608, %v662_v6  ;;  %v3008_v5 = vadd.f32 1.0, %v995_v45  ;;  %v1616_v48 = vmul.f32 2.1237322e-06, %v3003_v7  ;;  %v457_v6 = vpop.f32.mrf.mxu1 }
 0x116   : > { %v1311_v38 = vmul.f32 %v1310_v2, %v2975_v34  ;;  %v535_v40 = vmul.f32 0.5, %v2813_v37  ;;  %v680_v14 = vmul.f32 %v2993_v60, %v679_v10  ;;  %v1627_v16 = vmul.f32 3.8918573e-05, %v3003_v7 }
 0x117   : > { %v1879_v58 = vadd.f32 1.0, %v2216_v53  ;;  %v982_v35 = vmul.f32 %v981_v3, %v2929_v43  ;;  %2411 = vrcp.f32 %v3008_v5  ;;  %v3018_v57 = vmul.f32 0.70710677, %v3006_v8  ;;  %v477_v53 = vpop.f32.mrf.mxu2 }
 0x118   : > { %v1910_v17 = vmul.f32 %v1878_v9, %v534_v55  ;;  %v1300_v27 = vmul.f32 %v1299_v15, %v2975_v34  ;;  %v1312_v49 = vadd.f32 0.112945676, %v1311_v38  ;;  %v664_v37 = vmul.f32 %v663_v28, %v2888_v26 }
 0x119   : > { %v1911_v19 = vmul.f32 %v1879_v58, %v535_v40  ;;  %v688_v63 = vand.u32 2147483648, %v2972_v4  ;;  %v1617_v50 = vadd.f32 0.00028619796, %v1616_v48  ;;  %v1628_v21 = vadd.f32 0.001143296, %v1627_v16 }
 0x11a   : > { %v681_v1 = vadd.f32 %v2993_v60, %v680_v14  ;;  %vm683_vm0 = vweird.f32 %v2993_v60  ;;  %v1313_v32 = vmul.f32 %v1312_v49, %v2975_v34  ;;  %v686_v31 = vand.u32 2147483647, %v2972_v4 }
 0x11b   : > { %v2312_v25 = vpack.c.bf16 %v1911_v19, %v1910_v17  ;;  %v983_v44 = vadd.f32 0.18741608, %v982_v35  ;;  %v1629_v18 = vmul.f32 %v1628_v21, %v3003_v7  ;;  %v694_v39 = vmul.f32 %v3018_v57, %v3018_v57 }
 0x11c   : > { %vm682_vm1 = vweird.f32 %v2972_v4  ;;  %v1301_v26 = vadd.f32 0.05243302, %v1300_v27  ;;  %v1314_v47 = vadd.f32 0.4994258, %v1313_v32  ;;  %v1618_v59 = vmul.f32 %v1617_v50, %v3003_v7 }
 0x11d   : > { %2340 = vst [vmem:[%s2918_s17 + $0x60] sm:$0xff] %v2312_v25   ;;  %v3033_v42 = vpop.eup %2411  ;;  %vm3035_vm2 = vmor %vm682_vm1, %vm683_vm0  ;;  %v1630_v52 = vadd.f32 0.014752088, %v1629_v18  ;;  %v3039_v46 = vmin.f32 %v694_v39, 16.0  ;;  %v665_v23 = vadd.f32 1.1283791, %v664_v37  ;;  %v984_v33 = vmul.f32 %v983_v44, %v2929_v43 }
 0x11e   : > { %v685_v13 = vsel %vm3035_vm2, %v2993_v60, %v681_v1  ;;  %v689_v4 = vor.u32 1.1754944e-38, %v688_v63  ;;  %v998_v62 = vmul.f32 %v3033_v42, %v3008_v5  ;;  %v1315_v20 = vmul.f32 %v1314_v47, %v2975_v34 }
 0x11f   : > { %v1631_v11 = vmul.f32 %v1630_v52, %v3003_v7  ;;  %v696_v55 = vmul.f32 2.1237322e-06, %v3039_v46  ;;  %vm687_vm3 = vcmp.eq.f32.partialorder %v686_v31, 8.507059e+37  ;;  %v1302_v54 = vmul.f32 %v1301_v26, %v2975_v34 }
 0x120   : > { %v1619_v0 = vadd.f32 0.0036580483, %v1618_v59  ;;  %v458_v3 = vadd.f32 %v2577_v24, %v457_v6  ;;  %v690_v45 = vsel %vm687_vm3, %v689_v4, %v685_v13  ;;  %v3052_v60 = vadd.f32 1.0, %v1315_v20 }
 0x121   : > { %v1632_v2 = vadd.f32 0.112945676, %v1631_v11  ;;  %v707_v9 = vmul.f32 3.8918573e-05, %v3039_v46  ;;  %v3056_v43 = vmul.f32 0.5, %v2839_v30  ;;  %v666_v10 = vmul.f32 %v665_v23, %v2856_v29 }
 0x122   : > { %v999_v15 = vsub.f32 1.0, %v998_v62  ;;  %v697_v28 = vadd.f32 0.00028619796, %v696_v55  ;;  %v3060_v38 = vmul.f32 0.5, %v2874_v12  ;;  %v985_v48 = vadd.f32 1.1283791, %v984_v33 }
 0x123   : > { %v3063_v40 = vmul.f32 0.5, %v2935_v61  ;;  %2413 = vrcp.f32 %v3052_v60  ;;  %v691_v58 = vmul.f32 %v690_v45, %v666_v10  ;;  %v1633_v14 = vmul.f32 %v1632_v2, %v3003_v7 }
 0x124   : > { %v698_v16 = vmul.f32 %v697_v28, %v3039_v46  ;;  %v3069_v30 = vadd.f32 %v2577_v24, %v477_v53  ;;  %v1303_v29 = vadd.f32 0.18741608, %v1302_v54  ;;  %v1620_v35 = vmul.f32 %v1619_v0, %v3003_v7  ;;  %v497_v54 = vpop.f32.mrf.mxu3 }
 0x125   : > { %v708_v17 = vadd.f32 0.001143296, %v707_v9  ;;  %v3072_v12 = vmul.f32 0.70710677, %v458_v3  ;;  %v1000_v19 = vmul.f32 %v3033_v42, %v999_v15  ;;  %v1006_v61 = vand.u32 2147483647, %v3008_v5 }
 0x126   : > { %v1634_v27 = vadd.f32 0.4994258, %v1633_v14  ;;  %v3077_v49 = vmul.f32 0.5, %v3006_v8  ;;  %v1008_v37 = vand.u32 2147483648, %v3008_v5  ;;  %v699_v63 = vadd.f32 0.0036580483, %v698_v16 }
 0x127   : > { %v709_v24 = vmul.f32 %v708_v17, %v3039_v46  ;;  %v1014_v50 = vmul.f32 %v3072_v12, %v3072_v12  ;;  %v2193_v21 = vclamps-f32 %v691_v58, 1.0  ;;  %vm1002_vm4 = vweird.f32 %v3008_v5 }
 0x128   : > { %v1635_v25 = vmul.f32 %v1634_v27, %v3003_v7  ;;  %v3086_v1 = vmul.f32 0.70710677, %v3069_v30  ;;  %v1304_v8 = vmul.f32 %v1303_v29, %v2975_v34  ;;  %v1621_v31 = vadd.f32 0.05243302, %v1620_v35 }
 0x129   : > { %v3088_v32 = vpop.eup %2413  ;;  %v710_v44 = vadd.f32 0.014752088, %v709_v24  ;;  %v3091_v18 = vmin.f32 %v1014_v50, 16.0  ;;  %v1001_v39 = vadd.f32 %v3033_v42, %v1000_v19  ;;  %vm1003_vm5 = vweird.f32 %v3033_v42 }
 0x12a   : > { %vm3095_vm6 = vcmp.eq.f32.partialorder %v1006_v61, 8.507059e+37  ;;  %v1318_v47 = vmul.f32 %v3088_v32, %v3052_v60  ;;  %v1009_v59 = vor.u32 1.1754944e-38, %v1008_v37  ;;  %v700_v51 = vmul.f32 %v699_v63, %v3039_v46  ;;  %vm3111_vm7 = vmor %vm1002_vm4, %vm1003_vm5 }
 0x12b   : > { %v711_v34 = vmul.f32 %v710_v44, %v3039_v46  ;;  %v1016_v52 = vmul.f32 2.1237322e-06, %v3091_v18  ;;  %v3104_v23 = vadd.f32 1.0, %v1635_v25  ;;  %v1027_v13 = vmul.f32 3.8918573e-05, %v3091_v18 }
 0x12c   : > { %v1319_v6 = vsub.f32 1.0, %v1318_v47  ;;  %v1334_v4 = vmul.f32 %v3086_v1, %v3086_v1  ;;  %v1856_v62 = vadd.f32 1.0, %v2193_v21  ;;  %v1305_v20 = vadd.f32 1.1283791, %v1304_v8 }
 0x12d   : > { %v1622_v11 = vmul.f32 %v1621_v31, %v3003_v7  ;;  %v3116_v55 = vmul.f32 0.5, %v458_v3  ;;  %v1005_v0 = vsel %vm3111_vm7, %v3033_v42, %v1001_v39  ;;  %v1328_v2 = vand.u32 2147483648, %v3052_v60  ;;  %v3131_v42 = vld [vmem:[%s3975_s2] ss:$0 sm:$0xff] }
 0x12e   : > { %v1320_v45 = vmul.f32 %v3088_v32, %v1319_v6  ;;  %v712_v9 = vadd.f32 0.112945676, %v711_v34  ;;  %v986_v5 = vmul.f32 %v985_v48, %v2891_v41  ;;  %v701_v53 = vadd.f32 0.05243302, %v700_v51 }
 0x12f   : > { %v1017_v10 = vadd.f32 0.00028619796, %v1016_v52  ;;  %v1028_v15 = vadd.f32 0.001143296, %v1027_v13  ;;  %2415 = vrcp.f32 %v3104_v23  ;;  %v3126_v28 = vmin.f32 %v1334_v4, 16.0 }
 0x130   : > { %v713_v3 = vmul.f32 %v712_v9, %v3039_v46  ;;  %v3134_v58 = vadd.f32 %v3131_v42, %v497_v54  ;;  %v1010_v41 = vsel %vm3095_vm6, %v1009_v59, %v1005_v0  ;;  %v1623_v48 = vadd.f32 0.18741608, %v1622_v11 }
 0x131   : > { %v1018_v14 = vmul.f32 %v1017_v10, %v3091_v18  ;;  %v1029_v16 = vmul.f32 %v1028_v15, %v3091_v18  ;;  %v1321_v29 = vadd.f32 %v3088_v32, %v1320_v45  ;;  %vm1323_vm8 = vweird.f32 %v3088_v32 }
 0x132   : > { %v714_v35 = vadd.f32 0.4994258, %v713_v3  ;;  %v1336_v17 = vmul.f32 2.1237322e-06, %v3126_v28  ;;  %v702_v19 = vmul.f32 %v701_v53, %v3039_v46  ;;  %v1347_v37 = vmul.f32 3.8918573e-05, %v3126_v28 }
 0x133   : > { %v1019_v61 = vadd.f32 0.0036580483, %v1018_v14  ;;  %v1030_v27 = vadd.f32 0.014752088, %v1029_v16  ;;  %v1011_v63 = vmul.f32 %v1010_v41, %v986_v5  ;;  %vm1322_vm9 = vweird.f32 %v3052_v60 }
 0x134   : > { %v1326_v24 = vand.u32 2147483647, %v3052_v60  ;;  %v3148_v50 = vmul.f32 0.70710677, %v3134_v58  ;;  %vm3150_vm10 = vmor %vm1322_vm9, %vm1323_vm8  ;;  %v1624_v25 = vmul.f32 %v1623_v48, %v3003_v7  ;;  %v715_v8 = vmul.f32 %v714_v35, %v3039_v46 }
 0x135   : > { %v1031_v31 = vmul.f32 %v1030_v27, %v3091_v18  ;;  %v1337_v44 = vadd.f32 0.00028619796, %v1336_v17  ;;  %v3157_v39 = vpop.eup %2415  ;;  %v1325_v60 = vsel %vm3150_vm10, %v3088_v32, %v1321_v29  ;;  %v1329_v26 = vor.u32 1.1754944e-38, %v1328_v2 }
 0x136   : > { %v1020_v47 = vmul.f32 %v1019_v61, %v3091_v18  ;;  %v1348_v59 = vadd.f32 0.001143296, %v1347_v37  ;;  %v703_v51 = vadd.f32 0.18741608, %v702_v19  ;;  %v3163_v34 = vadd.f32 1.0, %v715_v8 }
 0x137   : > { %v1032_v52 = vadd.f32 0.112945676, %v1031_v31  ;;  %v1338_v7 = vmul.f32 %v1337_v44, %v3126_v28  ;;  %v2201_v6 = vclamps-f32 %v1011_v63, 1.0  ;;  %vm1327_vm11 = vcmp.eq.f32.partialorder %v1326_v24, 8.507059e+37  ;;  %v440_v63 = vpop.f32.mrf.mxu0 }
 0x138   : > { %v1349_v13 = vmul.f32 %v1348_v59, %v3126_v28  ;;  %v1654_v4 = vmul.f32 %v3148_v50, %v3148_v50  ;;  %v1330_v33 = vsel %vm1327_vm11, %v1329_v26, %v1325_v60  ;;  %v1625_v11 = vadd.f32 1.1283791, %v1624_v25 }
 0x139   : > { %v1638_v32 = vmul.f32 %v3157_v39, %v3104_v23  ;;  %2417 = vrcp.f32 %v3163_v34  ;;  %v1306_v54 = vmul.f32 %v1305_v20, %v2953_v56  ;;  %v1021_v0 = vadd.f32 0.05243302, %v1020_v47 }
 0x13a   : > { %v1033_v45 = vmul.f32 %v1032_v52, %v3091_v18  ;;  %v3175_v2 = vmul.f32 0.5, %v3069_v30  ;;  %v3178_v9 = vmul.f32 %v1856_v62, %v3056_v43  ;;  %v704_v5 = vmul.f32 %v703_v51, %v3039_v46 }
 0x13b   : > { %v1339_v53 = vadd.f32 0.0036580483, %v1338_v7  ;;  %v1350_v10 = vadd.f32 0.014752088, %v1349_v13  ;;  %v1864_v15 = vadd.f32 1.0, %v2201_v6  ;;  %v1331_v3 = vmul.f32 %v1330_v33, %v1306_v54 }
 0x13c   : > { %v1034_v41 = vadd.f32 0.4994258, %v1033_v45  ;;  %v3181_v48 = vmin.f32 %v1654_v4, 16.0  ;;  %v3184_v56 = vmul.f32 %v1625_v11, %v2989_v36  ;;  %v1639_v20 = vsub.f32 1.0, %v1638_v32 }
 0x13d   : > { %v1646_v14 = vand.u32 2147483647, %v3104_v23  ;;  %v1351_v30 = vmul.f32 %v1350_v10, %v3126_v28  ;;  %v1648_v43 = vand.u32 2147483648, %v3104_v23  ;;  %v1022_v62 = vmul.f32 %v1021_v0, %v3091_v18 }
 0x13e   : > { %v1035_v46 = vmul.f32 %v1034_v41, %v3091_v18  ;;  %v1656_v16 = vmul.f32 2.1237322e-06, %v3181_v48  ;;  %v705_v35 = vadd.f32 1.1283791, %v704_v5  ;;  %v1340_v17 = vmul.f32 %v1339_v53, %v3126_v28 }
 0x13f   : > { %v2418_v29 = vpop.eup %2417  ;;  %v1352_v19 = vadd.f32 0.112945676, %v1351_v30  ;;  %v1667_v36 = vmul.f32 3.8918573e-05, %v3181_v48  ;;  %v3195_v61 = vmul.f32 %v1864_v15, %v3060_v38  ;;  %v2209_v27 = vclamps-f32 %v1331_v3, 1.0 }
 0x140   : > { %vm1643_vm12 = vweird.f32 %v3157_v39  ;;  %v718_v37 = vmul.f32 %v2418_v29, %v3163_v34  ;;  %v1640_v24 = vmul.f32 %v3157_v39, %v1639_v20  ;;  %vm1642_vm13 = vweird.f32 %v3104_v23 }
 0x141   : > { %v3201_v21 = vadd.f32 1.0, %v1035_v46  ;;  %v1353_v25 = vmul.f32 %v1352_v19, %v3126_v28  ;;  %v1657_v8 = vadd.f32 0.00028619796, %v1656_v16  ;;  %v728_v44 = vand.u32 2147483648, %v3163_v34  ;;  %vm3240_vm3 = vmor %vm1642_vm13, %vm1643_vm12 }
 0x142   : > { %v719_v31 = vsub.f32 1.0, %v718_v37  ;;  %v1023_v38 = vadd.f32 0.18741608, %v1022_v62  ;;  %v1668_v60 = vadd.f32 0.001143296, %v1667_v36  ;;  %v706_v26 = vmul.f32 %v705_v35, %v3018_v57  ;;  %v460_v57 = vpop.f32.mrf.mxu1 }
 0x143   : > { %2419 = vrcp.f32 %v3201_v21  ;;  %v1341_v47 = vadd.f32 0.05243302, %v1340_v17  ;;  %v3208_v59 = vadd.f32 %v3131_v42, %v440_v63  ;;  %vm723_vm14 = vweird.f32 %v2418_v29 }
 0x144   : > { %v720_v51 = vmul.f32 %v2418_v29, %v719_v31  ;;  %v726_v52 = vand.u32 2147483647, %v3163_v34  ;;  %v1354_v7 = vadd.f32 0.4994258, %v1353_v25  ;;  %v1641_v6 = vadd.f32 %v3157_v39, %v1640_v24 }
 0x145   : > { %vm722_vm15 = vweird.f32 %v3163_v34  ;;  %v1658_v13 = vmul.f32 %v1657_v8, %v3181_v48  ;;  %v1669_v4 = vmul.f32 %v1668_v60, %v3181_v48  ;;  %vm3215_vm0 = vcmp.eq.f32.partialorder %v1646_v14, 8.507059e+37 }
 0x146   : > { %v721_v11 = vadd.f32 %v2418_v29, %v720_v51  ;;  %v729_v32 = vor.u32 1.1754944e-38, %v728_v44  ;;  %v1024_v54 = vmul.f32 %v1023_v38, %v3091_v18  ;;  %v1355_v0 = vmul.f32 %v1354_v7, %v3126_v28  ;;  %vm724_vm1 = vmor %vm722_vm15, %vm723_vm14 }
 0x147   : > { %v1342_v45 = vmul.f32 %v1341_v47, %v3126_v28  ;;  %v1659_v5 = vadd.f32 0.0036580483, %v1658_v13  ;;  %v1670_v34 = vadd.f32 0.014752088, %v1669_v4  ;;  %v3223_v53 = vmul.f32 0.70710677, %v3208_v59 }
 0x148   : > { %v725_v10 = vsel %vm724_vm1, %v2418_v29, %v721_v11  ;;  %vm727_vm2 = vcmp.eq.f32.partialorder %v726_v52, 8.507059e+37  ;;  %v3225_v15 = vadd.f32 1.0, %v1355_v0  ;;  %v3228_v3 = vadd.f32 %v3131_v42, %v460_v57 }
 0x149   : > { %v2420_v41 = vpop.eup %2419  ;;  %v730_v20 = vsel %vm727_vm2, %v729_v32, %v725_v10  ;;  %v1660_v18 = vmul.f32 %v1659_v5, %v3181_v48  ;;  %v1671_v14 = vmul.f32 %v1670_v34, %v3181_v48  ;;  %v734_v30 = vmul.f32 %v3223_v53, %v3223_v53  ;;  %v480_v10 = vpop.f32.mrf.mxu2 }
 0x14a   : > { %v3234_v62 = vadd.f32 1.0, %v2209_v27  ;;  %v1649_v16 = vor.u32 1.1754944e-38, %v1648_v43  ;;  %v731_v29 = vmul.f32 %v730_v20, %v706_v26  ;;  %v1038_v35 = vmul.f32 %v2420_v41, %v3201_v21 }
 0x14b   : > { %v1645_v17 = vsel %vm3240_vm3, %v3157_v39, %v1641_v6  ;;  %v1025_v19 = vadd.f32 1.1283791, %v1024_v54  ;;  %v1343_v36 = vadd.f32 0.18741608, %v1342_v45  ;;  %2421 = vrcp.f32 %v3225_v15 }
 0x14c   : > { %v2194_v27 = vclamps-f32 %v731_v29, 1.0  ;;  %v1039_v37 = vsub.f32 1.0, %v1038_v35  ;;  %v1046_v23 = vand.u32 2147483647, %v3201_v21  ;;  %v1672_v63 = vadd.f32 0.112945676, %v1671_v14 }
 0x14d   : > { %v1048_v24 = vand.u32 2147483648, %v3201_v21  ;;  %v1661_v25 = vadd.f32 0.05243302, %v1660_v18  ;;  %v3251_v43 = vmin.f32 %v734_v30, 16.0  ;;  %v3254_v8 = vmul.f32 0.70710677, %v3228_v3 }
 0x14e   : > { %v1857_v31 = vadd.f32 1.0, %v2194_v27  ;;  %v1040_v44 = vmul.f32 %v2420_v41, %v1039_v37  ;;  %vm1043_vm4 = vweird.f32 %v2420_v41  ;;  %v1673_v39 = vmul.f32 %v1672_v63, %v3181_v48 }
 0x14f   : > { %v3259_v38 = vsel %vm3215_vm0, %v1649_v16, %v1645_v17  ;;  %v1344_v60 = vmul.f32 %v1343_v36, %v3126_v28  ;;  %v747_v26 = vmul.f32 3.8918573e-05, %v3251_v43  ;;  %v1054_v47 = vmul.f32 %v3254_v8, %v3254_v8  ;;  %v500_v16 = vpop.f32.mrf.mxu3 }
 0x150   : > { %v1889_v51 = vmul.f32 %v1857_v31, %v3077_v49  ;;  %v1041_v52 = vadd.f32 %v2420_v41, %v1040_v44  ;;  %vm1042_vm5 = vweird.f32 %v3201_v21  ;;  %v1674_v7 = vadd.f32 0.4994258, %v1673_v39 }
 0x151   : > { %v2422_v6 = vpop.eup %2421  ;;  %v1026_v13 = vmul.f32 %v1025_v19, %v3072_v12  ;;  %vm1044_vm6 = vmor %vm1042_vm5, %vm1043_vm4  ;;  %v1049_v4 = vor.u32 1.1754944e-38, %v1048_v24  ;;  %v1662_v57 = vmul.f32 %v1661_v25, %v3181_v48  ;;  %v748_v28 = vadd.f32 0.001143296, %v747_v26 }
 0x152   : > { %v2257_v33 = vpack.c.bf16 %v1889_v51, %v3178_v9  ;;  %v1045_v11 = vsel %vm1044_vm6, %v2420_v41, %v1041_v52  ;;  %vm1047_vm7 = vcmp.eq.f32.partialorder %v1046_v23, 8.507059e+37  ;;  %v1358_v32 = vmul.f32 %v2422_v6, %v3225_v15 }
 0x153   : > { %v1050_v49 = vsel %vm1047_vm7, %v1049_v4, %v1045_v11  ;;  %v1345_v54 = vadd.f32 1.1283791, %v1344_v60  ;;  %v1675_v21 = vmul.f32 %v1674_v7, %v3181_v48  ;;  %v3272_v0 = vmin.f32 %v1054_v47, 16.0 }
 0x154   : > { %2329 = vst [vmem:[%s2918_s17 + $0x8] sm:$0xff] %v2257_v33   ;;  %v1051_v45 = vmul.f32 %v1050_v49, %v1026_v13  ;;  %v1359_v12 = vsub.f32 1.0, %v1358_v32  ;;  %v736_v5 = vmul.f32 2.1237322e-06, %v3251_v43  ;;  %v749_v34 = vmul.f32 %v748_v28, %v3251_v43 }
 0x155   : > { %v1366_v9 = vand.u32 2147483647, %v3225_v15  ;;  %v1368_v41 = vand.u32 2147483648, %v3225_v15  ;;  %v1663_v20 = vadd.f32 0.18741608, %v1662_v57  ;;  %v3279_v18 = vadd.f32 1.0, %v1675_v21 }
 0x156   : > { %v2202_v14 = vclamps-f32 %v1051_v45, 1.0  ;;  %v1360_v30 = vmul.f32 %v2422_v6, %v1359_v12  ;;  %vm1363_vm8 = vweird.f32 %v2422_v6  ;;  %v750_v46 = vadd.f32 0.014752088, %v749_v34 }
 0x157   : > { %v1346_v29 = vmul.f32 %v1345_v54, %v3086_v1  ;;  %2423 = vrcp.f32 %v3279_v18  ;;  %v1056_v35 = vmul.f32 2.1237322e-06, %v3272_v0  ;;  %v3285_v17 = vadd.f32 %v3131_v42, %v480_v10 }
 0x158   : > { %v1865_v19 = vadd.f32 1.0, %v2202_v14  ;;  %v1361_v36 = vadd.f32 %v2422_v6, %v1360_v30  ;;  %vm1362_vm9 = vweird.f32 %v3225_v15  ;;  %v737_v27 = vadd.f32 0.00028619796, %v736_v5 }
 0x159   : > { %vm1364_vm10 = vmor %vm1362_vm9, %vm1363_vm8  ;;  %v1369_v37 = vor.u32 1.1754944e-38, %v1368_v41  ;;  %v751_v23 = vmul.f32 %v750_v46, %v3251_v43  ;;  %v1067_v63 = vmul.f32 3.8918573e-05, %v3272_v0  ;;  %v3291_v1 = vadd.f32 %v3131_v42, %v500_v16 }
 0x15a   : > { %v1897_v24 = vmul.f32 %v1865_v19, %v3116_v55  ;;  %v1365_v25 = vsel %vm1364_vm10, %v2422_v6, %v1361_v36  ;;  %vm1367_vm11 = vcmp.eq.f32.partialorder %v1366_v9, 8.507059e+37  ;;  %v1664_v31 = vmul.f32 %v1663_v20, %v3181_v48 }
 0x15b   : > { %v1370_v44 = vsel %vm1367_vm11, %v1369_v37, %v1365_v25  ;;  %v752_v39 = vadd.f32 0.112945676, %v751_v23  ;;  %v1057_v15 = vadd.f32 0.00028619796, %v1056_v35  ;;  %v1068_v60 = vadd.f32 0.001143296, %v1067_v63 }
 0x15c   : > { %v2277_v26 = vpack.c.bf16 %v1897_v24, %v3195_v61  ;;  %v1371_v47 = vmul.f32 %v1370_v44, %v1346_v29  ;;  %v738_v51 = vmul.f32 %v737_v27, %v3251_v43  ;;  %v3298_v52 = vmul.f32 0.70710677, %v3285_v17 }
 0x15d   : > { %v2424_v7 = vpop.eup %2423  ;;  %v1904_v55 = vmul.f32 %v3234_v62, %v3063_v40  ;;  %v753_v6 = vmul.f32 %v752_v39, %v3251_v43  ;;  %v1069_v48 = vmul.f32 %v1068_v60, %v3272_v0  ;;  %v3305_v13 = vmul.f32 0.70710677, %v3291_v1 }
 0x15e   : > { %v1651_v61 = vmul.f32 %v3259_v38, %v3184_v56  ;;  %2333 = vst [vmem:[%s2918_s17 + $0x28] sm:$0xff] %v2277_v26   ;;  %v2210_v4 = vclamps-f32 %v1371_v47, 1.0  ;;  %v1665_v57 = vadd.f32 1.1283791, %v1664_v31  ;;  %v1678_v28 = vmul.f32 %v2424_v7, %v3279_v18 }
 0x15f   : > { %v754_v33 = vadd.f32 0.4994258, %v753_v6  ;;  %v1058_v11 = vmul.f32 %v1057_v15, %v3272_v0  ;;  %v1070_v32 = vadd.f32 0.014752088, %v1069_v48  ;;  %v1374_v40 = vmul.f32 %v3298_v52, %v3298_v52 }
 0x160   : > { %v1873_v62 = vadd.f32 1.0, %v2210_v4  ;;  %v1679_v49 = vsub.f32 1.0, %v1678_v28  ;;  %v1688_v54 = vand.u32 2147483648, %v3279_v18  ;;  %v739_v21 = vadd.f32 0.0036580483, %v738_v51 }
 0x161   : > { %v755_v45 = vmul.f32 %v754_v33, %v3251_v43  ;;  %v1071_v56 = vmul.f32 %v1070_v32, %v3272_v0  ;;  %v3317_v38 = vmin.f32 %v1374_v40, 16.0  ;;  %v1694_v12 = vmul.f32 %v3305_v13, %v3305_v13 }
 0x162   : > { %v1905_v5 = vmul.f32 %v1873_v62, %v3175_v2  ;;  %v1680_v34 = vmul.f32 %v2424_v7, %v1679_v49  ;;  %vm1683_vm12 = vweird.f32 %v2424_v7  ;;  %v1686_v10 = vand.u32 2147483647, %v3279_v18 }
 0x163   : > { %v2217_v9 = vclamps-f32 %v1651_v61, 1.0  ;;  %v3323_v41 = vadd.f32 1.0, %v755_v45  ;;  %v1059_v20 = vadd.f32 0.0036580483, %v1058_v11  ;;  %v1072_v14 = vadd.f32 0.112945676, %v1071_v56  ;;  %v442_v61 = vpop.f32.mrf.mxu0 }
 0x164   : > { %v2297_v30 = vpack.c.bf16 %v1905_v5, %v1904_v55  ;;  %v1681_v46 = vadd.f32 %v2424_v7, %v1680_v34  ;;  %vm1682_vm13 = vweird.f32 %v3279_v18  ;;  %v1376_v16 = vmul.f32 2.1237322e-06, %v3317_v38 }
 0x165   : > { %vm1684_vm14 = vmor %vm1682_vm13, %vm1683_vm12  ;;  %v1689_v29 = vor.u32 1.1754944e-38, %v1688_v54  ;;  %v740_v2 = vmul.f32 %v739_v21, %v3251_v43  ;;  %2425 = vrcp.f32 %v3323_v41  ;;  %v3329_v35 = vmin.f32 %v1694_v12, 16.0  ;;  %v462_v54 = vpop.f32.mrf.mxu1 }
 0x166   : > { %2337 = vst [vmem:[%s2918_s17 + $0x48] sm:$0xff] %v2297_v30   ;;  %v1666_v19 = vmul.f32 %v1665_v57, %v3148_v50  ;;  %v1685_v36 = vsel %vm1684_vm14, %v2424_v7, %v1681_v46  ;;  %vm1687_vm15 = vcmp.eq.f32.partialorder %v1686_v10, 8.507059e+37  ;;  %v1073_v27 = vmul.f32 %v1072_v14, %v3272_v0 }
 0x167   : > { %v1690_v37 = vsel %vm1687_vm15, %v1689_v29, %v1685_v36  ;;  %v1060_v18 = vmul.f32 %v1059_v20, %v3272_v0  ;;  %v1387_v23 = vmul.f32 3.8918573e-05, %v3317_v38  ;;  %v1880_v63 = vadd.f32 1.0, %v2217_v9 }
 0x168   : > { %v1691_v24 = vmul.f32 %v1690_v37, %v1666_v19  ;;  %v1074_v25 = vadd.f32 0.4994258, %v1073_v27  ;;  %v1377_v31 = vadd.f32 0.00028619796, %v1376_v16  ;;  %v741_v44 = vadd.f32 0.05243302, %v740_v2 }
 0x169   : > { %v1388_v39 = vadd.f32 0.001143296, %v1387_v23  ;;  %v1707_v15 = vmul.f32 3.8918573e-05, %v3329_v35  ;;  %v536_v60 = vmul.f32 0.5, %v2980_v22  ;;  %v537_v7 = vmul.f32 0.5, %v3134_v58 }
 0x16a   : > { %v2218_v50 = vclamps-f32 %v1691_v24, 1.0  ;;  %v1075_v26 = vmul.f32 %v1074_v25, %v3272_v0  ;;  %v1696_v47 = vmul.f32 2.1237322e-06, %v3329_v35  ;;  %v1061_v55 = vadd.f32 0.05243302, %v1060_v18 }
 0x16b   : > { %v3340_v51 = vpop.eup %2425  ;;  %v1389_v6 = vmul.f32 %v1388_v39, %v3317_v38  ;;  %v1708_v48 = vadd.f32 0.001143296, %v1707_v15  ;;  %v1378_v22 = vmul.f32 %v1377_v31, %v3317_v38  ;;  %v1912_v33 = vmul.f32 %v1880_v63, %v536_v60 }
 0x16c   : > { %v1881_v4 = vadd.f32 1.0, %v2218_v50  ;;  %v758_v57 = vmul.f32 %v3340_v51, %v3323_v41  ;;  %v3346_v28 = vadd.f32 1.0, %v1075_v26  ;;  %v742_v11 = vmul.f32 %v741_v44, %v3251_v43 }
 0x16d   : > { %v1390_v32 = vadd.f32 0.014752088, %v1389_v6  ;;  %v1709_v58 = vmul.f32 %v1708_v48, %v3329_v35  ;;  %v1697_v62 = vadd.f32 0.00028619796, %v1696_v47  ;;  %v3353_v49 = vadd.f32 %v3131_v42, %v442_v61 }
 0x16e   : > { %v1913_v40 = vmul.f32 %v1881_v4, %v537_v7  ;;  %2427 = vrcp.f32 %v3346_v28  ;;  %v1062_v21 = vmul.f32 %v1061_v55, %v3272_v0  ;;  %v759_v12 = vsub.f32 1.0, %v758_v57 }
 0x16f   : > { %v1391_v45 = vmul.f32 %v1390_v32, %v3317_v38  ;;  %v1379_v5 = vadd.f32 0.0036580483, %v1378_v22  ;;  %v1710_v34 = vadd.f32 0.014752088, %v1709_v58  ;;  %v743_v10 = vadd.f32 0.18741608, %v742_v11 }
 0x170   : > { %v2317_v56 = vpack.c.bf16 %v1913_v40, %v1912_v33  ;;  %v3358_v20 = vadd.f32 %v3131_v42, %v462_v54  ;;  %v1698_v14 = vmul.f32 %v1697_v62, %v3329_v35  ;;  %v3364_v46 = vmul.f32 0.70710677, %v3353_v49 }
 0x171   : > { %v1392_v9 = vadd.f32 0.112945676, %v1391_v45  ;;  %v1711_v30 = vmul.f32 %v1710_v34, %v3329_v35  ;;  %v1063_v16 = vadd.f32 0.18741608, %v1062_v21  ;;  %v760_v19 = vmul.f32 %v3340_v51, %v759_v12 }
 0x172   : > { %2341 = vst [vmem:[%s2918_s17 + $0x68] sm:$0xff] %v2317_v56   ;;  %v1380_v36 = vmul.f32 %v1379_v5, %v3317_v38  ;;  %v774_v37 = vmul.f32 %v3364_v46, %v3364_v46  ;;  %v744_v18 = vmul.f32 %v743_v10, %v3251_v43  ;;  %v3375_v23 = vmul.f32 0.70710677, %v3358_v20 }
 0x173   : > { %v1393_v29 = vmul.f32 %v1392_v9, %v3317_v38  ;;  %v1712_v27 = vadd.f32 0.112945676, %v1711_v30  ;;  %v1699_v25 = vadd.f32 0.0036580483, %v1698_v14  ;;  %v766_v44 = vand.u32 2147483647, %v3323_v41  ;;  %v482_v30 = vpop.f32.mrf.mxu2 }
 0x174   : > { %v3367_v2 = vpop.eup %2427  ;;  %v768_v39 = vand.u32 2147483648, %v3323_v41  ;;  %v1064_v15 = vmul.f32 %v1063_v16, %v3272_v0  ;;  %v3383_v60 = vmin.f32 %v774_v37, 16.0  ;;  %v761_v43 = vadd.f32 %v3340_v51, %v760_v19 }
 0x175   : > { %v1078_v63 = vmul.f32 %v3367_v2, %v3346_v28  ;;  %v1394_v24 = vadd.f32 0.4994258, %v1393_v29  ;;  %v1713_v31 = vmul.f32 %v1712_v27, %v3329_v35  ;;  %vm763_vm0 = vweird.f32 %v3340_v51 }
 0x176   : > { %v1381_v50 = vadd.f32 0.05243302, %v1380_v36  ;;  %v776_v7 = vmul.f32 2.1237322e-06, %v3383_v60  ;;  %v787_v55 = vmul.f32 3.8918573e-05, %v3383_v60  ;;  %v1094_v6 = vmul.f32 %v3375_v23, %v3375_v23 }
 0x177   : > { %v1395_v26 = vmul.f32 %v1394_v24, %v3317_v38  ;;  %v1714_v47 = vadd.f32 0.4994258, %v1713_v31  ;;  %vm762_vm1 = vweird.f32 %v3323_v41  ;;  %v1079_v0 = vsub.f32 1.0, %v1078_v63 }
 0x178   : > { %v1700_v48 = vmul.f32 %v1699_v25, %v3329_v35  ;;  %v3395_v61 = vmul.f32 0.5, %v3208_v59  ;;  %vm3397_vm2 = vmor %vm762_vm1, %vm763_vm0  ;;  %v777_v22 = vadd.f32 0.00028619796, %v776_v7  ;;  %v788_v33 = vadd.f32 0.001143296, %v787_v55 }
 0x179   : > { %v3401_v57 = vadd.f32 1.0, %v1395_v26  ;;  %v745_v11 = vadd.f32 1.1283791, %v744_v18  ;;  %v765_v32 = vsel %vm3397_vm2, %v3340_v51, %v761_v43  ;;  %v1065_v41 = vadd.f32 1.1283791, %v1064_v15 }
 0x17a   : > { %v1382_v58 = vmul.f32 %v1381_v50, %v3317_v38  ;;  %vm767_vm3 = vcmp.eq.f32.partialorder %v766_v44, 8.507059e+37  ;;  %v769_v40 = vor.u32 1.1754944e-38, %v768_v39  ;;  %v1715_v59 = vmul.f32 %v1714_v47, %v3329_v35  ;;  %v445_v44 = vpop.f32.mrf.mxu0 }
 0x17b   : > { %v3408_v62 = vmin.f32 %v1094_v6, 16.0  ;;  %v1080_v54 = vmul.f32 %v3367_v2, %v1079_v0  ;;  %v1701_v21 = vadd.f32 0.05243302, %v1700_v48  ;;  %v778_v45 = vmul.f32 %v777_v22, %v3383_v60 }
 0x17c   : > { %v789_v56 = vmul.f32 %v788_v33, %v3383_v60  ;;  %v770_v12 = vsel %vm767_vm3, %v769_v40, %v765_v32  ;;  %v3414_v5 = vmul.f32 0.5, %v3228_v3  ;;  %v3417_v51 = vmul.f32 0.5, %v3285_v17 }
 0x17d   : > { %2429 = vrcp.f32 %v3401_v57  ;;  %v746_v34 = vmul.f32 %v745_v11, %v3223_v53  ;;  %v1066_v10 = vmul.f32 %v1065_v41, %v3254_v8  ;;  %v1383_v9 = vadd.f32 0.18741608, %v1382_v58  ;;  %v502_v11 = vpop.f32.mrf.mxu3 }
 0x17e   : > { %v779_v14 = vadd.f32 0.0036580483, %v778_v45  ;;  %vm1083_vm4 = vweird.f32 %v3367_v2  ;;  %v3423_v16 = vadd.f32 1.0, %v1715_v59  ;;  %v790_v29 = vadd.f32 0.014752088, %v789_v56 }
 0x17f   : > { %v1096_v3 = vmul.f32 2.1237322e-06, %v3408_v62  ;;  %v771_v19 = vmul.f32 %v770_v12, %v746_v34  ;;  %v1081_v17 = vadd.f32 %v3367_v2, %v1080_v54  ;;  %v1702_v36 = vmul.f32 %v1701_v21, %v3329_v35 }
 0x180   : > { %v1107_v27 = vmul.f32 3.8918573e-05, %v3408_v62  ;;  %vm1082_vm5 = vweird.f32 %v3346_v28  ;;  %v780_v53 = vmul.f32 %v779_v14, %v3383_v60  ;;  %v791_v8 = vmul.f32 %v790_v29, %v3383_v60 }
 0x181   : > { %v3433_v37 = vadd.f32 %v3131_v42, %v482_v30  ;;  %v1088_v18 = vand.u32 2147483648, %v3346_v28  ;;  %v1384_v63 = vmul.f32 %v1383_v9, %v3317_v38  ;;  %v1097_v24 = vadd.f32 0.00028619796, %v1096_v3  ;;  %vm3441_vm6 = vmor %vm1082_vm5, %vm1083_vm4 }
 0x182   : > { %v1108_v25 = vadd.f32 0.001143296, %v1107_v27  ;;  %v1086_v39 = vand.u32 2147483647, %v3346_v28  ;;  %2431 = vrcp.f32 %v3423_v16  ;;  %v3448_v15 = vmul.f32 0.5, %v3353_v49 }
 0x183   : > { %v3437_v31 = vpop.eup %2429  ;;  %v792_v43 = vadd.f32 0.112945676, %v791_v8  ;;  %v2195_v50 = vclamps-f32 %v771_v19, 1.0  ;;  %v1085_v38 = vsel %vm3441_vm6, %v3367_v2, %v1081_v17  ;;  %v1703_v26 = vadd.f32 0.18741608, %v1702_v36 }
 0x184   : > { %v1098_v47 = vmul.f32 %v1097_v24, %v3408_v62  ;;  %v781_v7 = vadd.f32 0.05243302, %v780_v53  ;;  %v1109_v6 = vmul.f32 %v1108_v25, %v3408_v62  ;;  %v3457_v28 = vmul.f32 0.70710677, %v3433_v37 }
 0x185   : > { %v793_v55 = vmul.f32 %v792_v43, %v3383_v60  ;;  %v1089_v0 = vor.u32 1.1754944e-38, %v1088_v18  ;;  %v1385_v49 = vadd.f32 1.1283791, %v1384_v63  ;;  %v1398_v48 = vmul.f32 %v3437_v31, %v3401_v57 }
 0x186   : > { %v1099_v4 = vadd.f32 0.0036580483, %v1098_v47  ;;  %vm1087_vm7 = vcmp.eq.f32.partialorder %v1086_v39, 8.507059e+37  ;;  %v1110_v2 = vadd.f32 0.014752088, %v1109_v6  ;;  %v1414_v33 = vmul.f32 %v3457_v28, %v3457_v28 }
 0x187   : > { %v794_v22 = vadd.f32 0.4994258, %v793_v55  ;;  %v1858_v32 = vadd.f32 1.0, %v2195_v50  ;;  %v1090_v41 = vsel %vm1087_vm7, %v1089_v0, %v1085_v38  ;;  %v1704_v58 = vmul.f32 %v1703_v26, %v3329_v35 }
 0x188   : > { %v3465_v40 = vmul.f32 0.5, %v3358_v20  ;;  %v3467_v59 = vpop.eup %2431  ;;  %v782_v54 = vmul.f32 %v781_v7, %v3383_v60  ;;  %v1111_v45 = vmul.f32 %v1110_v2, %v3408_v62  ;;  %v3472_v56 = vmin.f32 %v1414_v33, 16.0 }
 0x189   : > { %v795_v21 = vmul.f32 %v794_v22, %v3383_v60  ;;  %v3475_v12 = vmul.f32 %v1385_v49, %v3298_v52  ;;  %v1399_v34 = vsub.f32 1.0, %v1398_v48  ;;  %v1100_v9 = vmul.f32 %v1099_v4, %v3408_v62 }
 0x18a   : > { %v3479_v35 = vadd.f32 %v3131_v42, %v502_v11  ;;  %v1408_v20 = vand.u32 2147483648, %v3401_v57  ;;  %v1112_v30 = vadd.f32 0.112945676, %v1111_v45  ;;  %v1416_v29 = vmul.f32 2.1237322e-06, %v3472_v56 }
 0x18b   : > { %v3482_v14 = vadd.f32 1.0, %v795_v21  ;;  %v1091_v3 = vmul.f32 %v1090_v41, %v1066_v10  ;;  %v1705_v19 = vadd.f32 1.1283791, %v1704_v58  ;;  %v1718_v17 = vmul.f32 %v3467_v59, %v3423_v16 }
 0x18c   : > { %v1427_v52 = vmul.f32 3.8918573e-05, %v3472_v56  ;;  %v3489_v36 = vmul.f32 %v1858_v32, %v3395_v61  ;;  %vm1402_vm8 = vweird.f32 %v3401_v57  ;;  %v783_v27 = vadd.f32 0.18741608, %v782_v54 }
 0x18d   : > { %2433 = vrcp.f32 %v3482_v14  ;;  %v1400_v53 = vmul.f32 %v3437_v31, %v1399_v34  ;;  %v1406_v8 = vand.u32 2147483647, %v3401_v57  ;;  %v1101_v18 = vadd.f32 0.05243302, %v1100_v9 }
 0x18e   : > { %v3496_v10 = vmul.f32 0.70710677, %v3479_v35  ;;  %v3498_v63 = vor.u32 1.1754944e-38, %v1408_v20  ;;  %v1113_v24 = vmul.f32 %v1112_v30, %v3408_v62  ;;  %v1417_v25 = vadd.f32 0.00028619796, %v1416_v29 }
 0x18f   : > { %v1428_v61 = vadd.f32 0.001143296, %v1427_v52  ;;  %v2203_v39 = vclamps-f32 %v1091_v3, 1.0  ;;  %vm1403_vm9 = vweird.f32 %v3437_v31  ;;  %v3503_v43 = vmul.f32 %v1705_v19, %v3305_v13 }
 0x190   : > { %v1719_v50 = vsub.f32 1.0, %v1718_v17  ;;  %v784_v38 = vmul.f32 %v783_v27, %v3383_v60  ;;  %v1114_v26 = vadd.f32 0.4994258, %v1113_v24  ;;  %v1418_v47 = vmul.f32 %v1417_v25, %v3472_v56  ;;  %vm3530_vm11 = vmor %vm1402_vm8, %vm1403_vm9 }
 0x191   : > { %v1429_v7 = vmul.f32 %v1428_v61, %v3472_v56  ;;  %v1401_v55 = vadd.f32 %v3437_v31, %v1400_v53  ;;  %v1102_v6 = vmul.f32 %v1101_v18, %v3408_v62  ;;  %v1734_v0 = vmul.f32 %v3496_v10, %v3496_v10 }
 0x192   : > { %v3513_v49 = vadd.f32 %v3131_v42, %v445_v44  ;;  %v1726_v48 = vand.u32 2147483647, %v3423_v16  ;;  %v1728_v60 = vand.u32 2147483648, %v3423_v16  ;;  %v1115_v4 = vmul.f32 %v1114_v26, %v3408_v62 }
 0x193   : > { %v2434_v13 = vpop.eup %2433  ;;  %v1430_v22 = vadd.f32 0.014752088, %v1429_v7  ;;  %v3518_v2 = vadd.f32 1.0, %v2203_v39  ;;  %vm3520_vm10 = vcmp.eq.f32.partialorder %v1406_v8, 8.507059e+37  ;;  %v1720_v11 = vmul.f32 %v3467_v59, %v1719_v50 }
 0x194   : > { %v798_v32 = vmul.f32 %v2434_v13, %v3482_v14  ;;  %v1419_v41 = vadd.f32 0.0036580483, %v1418_v47  ;;  %v785_v54 = vadd.f32 1.1283791, %v784_v38  ;;  %v3534_v21 = vadd.f32 1.0, %v1115_v4  ;;  %v465_v47 = vpop.f32.mrf.mxu1 }
 0x195   : > { %v1431_v45 = vmul.f32 %v1430_v22, %v3472_v56  ;;  %v3537_v34 = vmin.f32 %v1734_v0, 16.0  ;;  %v1405_v9 = vsel %vm3530_vm11, %v3437_v31, %v1401_v55  ;;  %v1103_v30 = vadd.f32 0.18741608, %v1102_v6 }
 0x196   : > { %v799_v20 = vsub.f32 1.0, %v798_v32  ;;  %v3543_v29 = vmul.f32 0.70710677, %v3513_v49  ;;  %vm803_vm12 = vweird.f32 %v2434_v13  ;;  %v806_v57 = vand.u32 2147483647, %v3482_v14 }
 0x197   : > { %v808_v3 = vand.u32 2147483648, %v3482_v14  ;;  %2435 = vrcp.f32 %v3534_v21  ;;  %v1420_v17 = vmul.f32 %v1419_v41, %v3472_v56  ;;  %v1432_v52 = vadd.f32 0.112945676, %v1431_v45 }
 0x198   : > { %v800_v19 = vmul.f32 %v2434_v13, %v799_v20  ;;  %v1736_v27 = vmul.f32 2.1237322e-06, %v3537_v34  ;;  %v786_v31 = vmul.f32 %v785_v54, %v3364_v46  ;;  %vm802_vm13 = vweird.f32 %v3482_v14 }
 0x199   : > { %v1747_v53 = vmul.f32 3.8918573e-05, %v3537_v34  ;;  %v814_v8 = vmul.f32 %v3543_v29, %v3543_v29  ;;  %v1104_v24 = vmul.f32 %v1103_v30, %v3408_v62  ;;  %v1433_v25 = vmul.f32 %v1432_v52, %v3472_v56  ;;  %vm804_vm14 = vmor %vm802_vm13, %vm803_vm12 }
 0x19a   : > { %v801_v18 = vadd.f32 %v2434_v13, %v800_v19  ;;  %v1737_v61 = vadd.f32 0.00028619796, %v1736_v27  ;;  %vm807_vm15 = vcmp.eq.f32.partialorder %v806_v57, 8.507059e+37  ;;  %v809_v44 = vor.u32 1.1754944e-38, %v808_v3 }
 0x19b   : > { %v1748_v39 = vadd.f32 0.001143296, %v1747_v53  ;;  %v3558_v50 = vmin.f32 %v814_v8, 16.0  ;;  %v1421_v14 = vadd.f32 0.05243302, %v1420_v17  ;;  %v1410_v62 = vsel %vm3520_vm10, %v3498_v63, %v1405_v9 }
 0x19c   : > { %v805_v46 = vsel %vm804_vm14, %v2434_v13, %v801_v18  ;;  %v1434_v38 = vadd.f32 0.4994258, %v1433_v25  ;;  %v1738_v26 = vmul.f32 %v1737_v61, %v3537_v34  ;;  %v3567_v4 = vadd.f32 %v3467_v59, %v1720_v11 }
 0x19d   : > { %v2436_v7 = vpop.eup %2435  ;;  %v810_v55 = vsel %vm807_vm15, %v809_v44, %v805_v46  ;;  %v1749_v6 = vmul.f32 %v1748_v39, %v3537_v34  ;;  %v827_v0 = vmul.f32 3.8918573e-05, %v3558_v50  ;;  %vm1723_vm0 = vweird.f32 %v3467_v59 }
 0x19e   : > { %v811_v13 = vmul.f32 %v810_v55, %v786_v31  ;;  %v1105_v22 = vadd.f32 1.1283791, %v1104_v24  ;;  %v1118_v32 = vmul.f32 %v2436_v7, %v3534_v21  ;;  %v1435_v41 = vmul.f32 %v1434_v38, %v3472_v56 }
 0x19f   : > { %v1739_v58 = vadd.f32 0.0036580483, %v1738_v26  ;;  %v1750_v54 = vadd.f32 0.014752088, %v1749_v6  ;;  %v3573_v63 = vadd.f32 %v3131_v42, %v465_v47  ;;  %v1422_v9 = vmul.f32 %v1421_v14, %v3472_v56 }
 0x1a0   : > { %v2196_v33 = vclamps-f32 %v811_v13, 1.0  ;;  %v1119_v45 = vsub.f32 1.0, %v1118_v32  ;;  %v828_v20 = vadd.f32 0.001143296, %v827_v0  ;;  %v1126_v11 = vand.u32 2147483647, %v3534_v21 }
 0x1a1   : > { %v1128_v30 = vand.u32 2147483648, %v3534_v21  ;;  %v3578_v57 = vadd.f32 1.0, %v1435_v41  ;;  %v1751_v3 = vmul.f32 %v1750_v54, %v3537_v34  ;;  %vm1123_vm1 = vweird.f32 %v2436_v7 }
 0x1a2   : > { %v1859_v19 = vadd.f32 1.0, %v2196_v33  ;;  %v1120_v17 = vmul.f32 %v2436_v7, %v1119_v45  ;;  %v829_v52 = vmul.f32 %v828_v20, %v3558_v50  ;;  %vm1122_vm2 = vweird.f32 %v3534_v21 }
 0x1a3   : > { %2437 = vrcp.f32 %v3578_v57  ;;  %v1740_v42 = vmul.f32 %v1739_v58, %v3537_v34  ;;  %v3586_v27 = vmul.f32 0.70710677, %v3573_v63  ;;  %v1423_v8 = vadd.f32 0.18741608, %v1422_v9  ;;  %vm1124_vm3 = vmor %vm1122_vm2, %vm1123_vm1 }
 0x1a4   : > { %v1891_v31 = vmul.f32 %v1859_v19, %v3448_v15  ;;  %v1121_v53 = vadd.f32 %v2436_v7, %v1120_v17  ;;  %v1752_v18 = vadd.f32 0.112945676, %v1751_v3  ;;  %v1411_v24 = vmul.f32 %v1410_v62, %v3475_v12  ;;  %v485_v62 = vpop.f32.mrf.mxu2 }
 0x1a5   : > { %v1106_v25 = vmul.f32 %v1105_v22, %v3375_v23  ;;  %v1129_v61 = vor.u32 1.1754944e-38, %v1128_v30  ;;  %v830_v21 = vadd.f32 0.014752088, %v829_v52  ;;  %vm1127_vm4 = vcmp.eq.f32.partialorder %v1126_v11, 8.507059e+37 }
 0x1a6   : > { %v2262_v44 = vpack.c.bf16 %v1891_v31, %v3489_v36  ;;  %v1125_v39 = vsel %vm1124_vm3, %v2436_v7, %v1121_v53  ;;  %v1753_v46 = vmul.f32 %v1752_v18, %v3537_v34  ;;  %v1741_v38 = vadd.f32 0.05243302, %v1740_v42  ;;  %v505_v42 = vpop.f32.mrf.mxu3 }
 0x1a7   : > { %v1130_v14 = vsel %vm1127_vm4, %v1129_v61, %v1125_v39  ;;  %v831_v15 = vmul.f32 %v830_v21, %v3558_v50  ;;  %v1134_v26 = vmul.f32 %v3586_v27, %v3586_v27  ;;  %vm1722_vm5 = vweird.f32 %v3423_v16 }
 0x1a8   : > { %2330 = vst [vmem:[%s2918_s17 + $0x10] sm:$0xff] %v2262_v44   ;;  %v1131_v23 = vmul.f32 %v1130_v14, %v1106_v25  ;;  %v1424_v12 = vmul.f32 %v1423_v8, %v3472_v56  ;;  %v1754_v47 = vadd.f32 0.4994258, %v1753_v46  ;;  %vm3601_vm6 = vmor %vm1722_vm5, %vm1723_vm0  ;;  %vm3607_vm7 = vcmp.eq.f32.partialorder %v1726_v48, 8.507059e+37 }
 0x1a9   : > { %v2438_v36 = vpop.eup %2437  ;;  %v1729_v6 = vor.u32 1.1754944e-38, %v1728_v60  ;;  %v832_v0 = vadd.f32 0.112945676, %v831_v15  ;;  %v3613_v56 = vmin.f32 %v1134_v26, 16.0  ;;  %v1898_v13 = vmul.f32 %v3518_v2, %v3414_v5  ;;  %v3627_v60 = vld [vmem:[%s3975_s2] ss:$0 sm:$0xff] }
 0x1aa   : > { %v1725_v22 = vsel %vm3601_vm6, %v3467_v59, %v3567_v4  ;;  %v2204_v32 = vclamps-f32 %v1131_v23, 1.0  ;;  %v1438_v48 = vmul.f32 %v2438_v36, %v3578_v57  ;;  %v2211_v41 = vclamps-f32 %v1411_v24, 1.0 }
 0x1ab   : > { %v1742_v58 = vmul.f32 %v1741_v38, %v3537_v34  ;;  %v1755_v16 = vmul.f32 %v1754_v47, %v3537_v34  ;;  %v3630_v5 = vadd.f32 %v3627_v60, %v485_v62  ;;  %v1425_v54 = vadd.f32 1.1283791, %v1424_v12 }
 0x1ac   : > { %v1867_v2 = vadd.f32 1.0, %v2204_v32  ;;  %v1439_v33 = vsub.f32 1.0, %v1438_v48  ;;  %v816_v59 = vmul.f32 2.1237322e-06, %v3558_v50  ;;  %v1448_v4 = vand.u32 2147483648, %v3578_v57 }
 0x1ad   : > { %v3634_v45 = vadd.f32 1.0, %v1755_v16  ;;  %v833_v9 = vmul.f32 %v832_v0, %v3558_v50  ;;  %v1147_v20 = vmul.f32 3.8918573e-05, %v3613_v56  ;;  %vm1443_vm8 = vweird.f32 %v2438_v36 }
 0x1ae   : > { %v1899_v11 = vmul.f32 %v1867_v2, %v3465_v40  ;;  %v1440_v30 = vmul.f32 %v2438_v36, %v1439_v33  ;;  %v1446_v3 = vand.u32 2147483647, %v3578_v57  ;;  %v1874_v19 = vadd.f32 1.0, %v2211_v41 }
 0x1af   : > { %v1730_v17 = vsel %vm3607_vm7, %v1729_v6, %v1725_v22  ;;  %v1743_v52 = vadd.f32 0.18741608, %v1742_v58  ;;  %2439 = vrcp.f32 %v3634_v45  ;;  %vm1442_vm9 = vweird.f32 %v3578_v57 }
 0x1b0   : > { %v2282_v31 = vpack.c.bf16 %v1899_v11, %v1898_v13  ;;  %v1441_v53 = vadd.f32 %v2438_v36, %v1440_v30  ;;  %v817_v8 = vadd.f32 0.00028619796, %v816_v59  ;;  %v1426_v40 = vmul.f32 %v1425_v54, %v3457_v28  ;;  %vm1444_vm10 = vmor %vm1442_vm9, %vm1443_vm8 }
 0x1b1   : > { %v1449_v18 = vor.u32 1.1754944e-38, %v1448_v4  ;;  %v834_v24 = vadd.f32 0.4994258, %v833_v9  ;;  %v1148_v25 = vadd.f32 0.001143296, %v1147_v20  ;;  %vm1447_vm11 = vcmp.eq.f32.partialorder %v1446_v3, 8.507059e+37 }
 0x1b2   : > { %2334 = vst [vmem:[%s2918_s17 + $0x30] sm:$0xff] %v2282_v31   ;;  %v1445_v61 = vsel %vm1444_vm10, %v2438_v36, %v1441_v53  ;;  %v3647_v21 = vmul.f32 0.70710677, %v3630_v5  ;;  %v3650_v44 = vadd.f32 %v3627_v60, %v505_v42  ;;  %v1744_v46 = vmul.f32 %v1743_v52, %v3537_v34 }
 0x1b3   : > { %v1450_v39 = vsel %vm1447_vm11, %v1449_v18, %v1445_v61  ;;  %v1136_v57 = vmul.f32 2.1237322e-06, %v3613_v56  ;;  %v1149_v28 = vmul.f32 %v1148_v25, %v3613_v56  ;;  %v531_v14 = vmul.f32 0.5, %v3433_v37 }
 0x1b4   : > { %v1451_v38 = vmul.f32 %v1450_v39, %v1426_v40  ;;  %v1906_v26 = vmul.f32 %v1874_v19, %v3417_v51  ;;  %v1731_v23 = vmul.f32 %v1730_v17, %v3503_v43  ;;  %v835_v12 = vmul.f32 %v834_v24, %v3558_v50 }
 0x1b5   : > { %v2440_v15 = vpop.eup %2439  ;;  %v1150_v47 = vadd.f32 0.014752088, %v1149_v28  ;;  %v1454_v34 = vmul.f32 %v3647_v21, %v3647_v21  ;;  %v3663_v7 = vmul.f32 0.70710677, %v3650_v44  ;;  %v1745_v55 = vadd.f32 1.1283791, %v1744_v46 }
 0x1b6   : > { %v2212_v62 = vclamps-f32 %v1451_v38, 1.0  ;;  %v1758_v36 = vmul.f32 %v2440_v15, %v3634_v45  ;;  %v818_v37 = vmul.f32 %v817_v8, %v3558_v50  ;;  %v1137_v6 = vadd.f32 0.00028619796, %v1136_v57 }
 0x1b7   : > { %v1151_v51 = vmul.f32 %v1150_v47, %v3613_v56  ;;  %v1766_v13 = vand.u32 2147483647, %v3634_v45  ;;  %v3668_v22 = vmin.f32 %v1454_v34, 16.0  ;;  %vm1763_vm12 = vweird.f32 %v2440_v15 }
 0x1b8   : > { %v1875_v0 = vadd.f32 1.0, %v2212_v62  ;;  %v1759_v43 = vsub.f32 1.0, %v1758_v36  ;;  %v1768_v32 = vand.u32 2147483648, %v3634_v45  ;;  %v3671_v48 = vadd.f32 1.0, %v835_v12  ;;  %v467_v12 = vpop.f32.mrf.mxu1 }
 0x1b9   : > { %v1152_v41 = vadd.f32 0.112945676, %v1151_v51  ;;  %v1467_v2 = vmul.f32 3.8918573e-05, %v3668_v22  ;;  %v1774_v54 = vmul.f32 %v3663_v7, %v3663_v7  ;;  %v2219_v33 = vclamps-f32 %v1731_v23, 1.0 }
 0x1ba   : > { %v1907_v58 = vmul.f32 %v1875_v0, %v531_v14  ;;  %v1760_v16 = vmul.f32 %v2440_v15, %v1759_v43  ;;  %v819_v59 = vadd.f32 0.0036580483, %v818_v37  ;;  %vm1762_vm13 = vweird.f32 %v3634_v45 }
 0x1bb   : > { %v1153_v4 = vmul.f32 %v1152_v41, %v3613_v56  ;;  %v1468_v11 = vadd.f32 0.001143296, %v1467_v2  ;;  %v1746_v30 = vmul.f32 %v1745_v55, %v3496_v10  ;;  %vm1764_vm14 = vmor %vm1762_vm13, %vm1763_vm12  ;;  %v1769_v3 = vor.u32 1.1754944e-38, %v1768_v32  ;;  %v447_v10 = vpop.f32.mrf.mxu0 }
 0x1bc   : > { %v2302_v9 = vpack.c.bf16 %v1907_v58, %v1906_v26  ;;  %v1761_v20 = vadd.f32 %v2440_v15, %v1760_v16  ;;  %v1138_v19 = vmul.f32 %v1137_v6, %v3613_v56  ;;  %vm1767_vm15 = vcmp.eq.f32.partialorder %v1766_v13, 8.507059e+37 }
 0x1bd   : > { %v1154_v17 = vadd.f32 0.4994258, %v1153_v4  ;;  %2441 = vrcp.f32 %v3671_v48  ;;  %v3683_v42 = vmin.f32 %v1774_v54, 16.0  ;;  %v820_v53 = vmul.f32 %v819_v59, %v3558_v50 }
 0x1be   : > { %2338 = vst [vmem:[%s2918_s17 + $0x50] sm:$0xff] %v2302_v9   ;;  %v1765_v52 = vsel %vm1764_vm14, %v2440_v15, %v1761_v20  ;;  %v1469_v8 = vmul.f32 %v1468_v11, %v3668_v22  ;;  %v1139_v40 = vadd.f32 0.0036580483, %v1138_v19  ;;  %v1882_v24 = vadd.f32 1.0, %v2219_v33 }
 0x1bf   : > { %v1770_v31 = vsel %vm1767_vm15, %v1769_v3, %v1765_v52  ;;  %v1155_v18 = vmul.f32 %v1154_v17, %v3613_v56  ;;  %v1787_v61 = vmul.f32 3.8918573e-05, %v3683_v42  ;;  %v821_v39 = vadd.f32 0.05243302, %v820_v53 }
 0x1c0   : > { %v1771_v45 = vmul.f32 %v1770_v31, %v1746_v30  ;;  %v3690_v46 = vadd.f32 %v3627_v60, %v447_v10  ;;  %v538_v28 = vmul.f32 0.5, %v3291_v1  ;;  %v539_v14 = vmul.f32 0.5, %v3479_v35 }
 0x1c1   : > { %v1470_v15 = vadd.f32 0.014752088, %v1469_v8  ;;  %v1140_v26 = vmul.f32 %v1139_v40, %v3613_v56  ;;  %v3697_v23 = vadd.f32 1.0, %v1155_v18  ;;  %v1456_v36 = vmul.f32 2.1237322e-06, %v3668_v22 }
 0x1c2   : > { %v2220_v25 = vclamps-f32 %v1771_v45, 1.0  ;;  %v1914_v47 = vmul.f32 %v1882_v24, %v538_v28  ;;  %v1788_v34 = vadd.f32 0.001143296, %v1787_v61  ;;  %v822_v55 = vmul.f32 %v821_v39, %v3558_v50 }
 0x1c3   : > { %v3692_v57 = vpop.eup %2441  ;;  %v3704_v35 = vmul.f32 0.70710677, %v3690_v46  ;;  %v1471_v6 = vmul.f32 %v1470_v15, %v3668_v22  ;;  %v3709_v0 = vadd.f32 %v3627_v60, %v467_v12  ;;  %v1141_v43 = vadd.f32 0.05243302, %v1140_v26 }
 0x1c4   : > { %v1883_v38 = vadd.f32 1.0, %v2220_v25  ;;  %v838_v1 = vmul.f32 %v3692_v57, %v3671_v48  ;;  %v1789_v51 = vmul.f32 %v1788_v34, %v3683_v42  ;;  %2443 = vrcp.f32 %v3697_v23 }
 0x1c5   : > { %v854_v13 = vmul.f32 %v3704_v35, %v3704_v35  ;;  %v1457_v32 = vadd.f32 0.00028619796, %v1456_v36  ;;  %v823_v58 = vadd.f32 0.18741608, %v822_v55  ;;  %v1472_v54 = vadd.f32 0.112945676, %v1471_v6 }
 0x1c6   : > { %v1915_v62 = vmul.f32 %v1883_v38, %v539_v14  ;;  %v1790_v41 = vadd.f32 0.014752088, %v1789_v51  ;;  %v839_v16 = vsub.f32 1.0, %v838_v1  ;;  %v3719_v59 = vmul.f32 0.70710677, %v3709_v0  ;;  %v487_v1 = vpop.f32.mrf.mxu2 }
 0x1c7   : > { %v3715_v2 = vmin.f32 %v854_v13, 16.0  ;;  %v1142_v4 = vmul.f32 %v1141_v43, %v3613_v56  ;;  %v1458_v11 = vmul.f32 %v1457_v32, %v3668_v22  ;;  %v824_v19 = vmul.f32 %v823_v58, %v3558_v50 }
 0x1c8   : > { %v2322_v37 = vpack.c.bf16 %v1915_v62, %v1914_v47  ;;  %v1791_v33 = vmul.f32 %v1790_v41, %v3683_v42  ;;  %v1174_v30 = vmul.f32 %v3719_v59, %v3719_v59  ;;  %v840_v17 = vmul.f32 %v3692_v57, %v839_v16 }
 0x1c9   : > { %v856_v9 = vmul.f32 2.1237322e-06, %v3715_v2  ;;  %v867_v20 = vmul.f32 3.8918573e-05, %v3715_v2  ;;  %vm842_vm0 = vweird.f32 %v3671_v48  ;;  %v846_v52 = vand.u32 2147483647, %v3671_v48 }
 0x1ca   : > { %2342 = vst [vmem:[%s2918_s17 + $0x70] sm:$0xff] %v2322_v37   ;;  %v3727_v3 = vpop.eup %2443  ;;  %v1473_v31 = vmul.f32 %v1472_v54, %v3668_v22  ;;  %v1776_v53 = vmul.f32 2.1237322e-06, %v3683_v42  ;;  %v1792_v45 = vadd.f32 0.112945676, %v1791_v33  ;;  %v848_v10 = vand.u32 2147483648, %v3671_v48 }
 0x1cb   : > { %v857_v8 = vadd.f32 0.00028619796, %v856_v9  ;;  %v1143_v40 = vadd.f32 0.18741608, %v1142_v4  ;;  %v868_v18 = vadd.f32 0.001143296, %v867_v20  ;;  %vm843_vm1 = vweird.f32 %v3692_v57 }
 0x1cc   : > { %v3736_v24 = vmin.f32 %v1174_v30, 16.0  ;;  %v1158_v50 = vmul.f32 %v3727_v3, %v3697_v23  ;;  %v1459_v25 = vadd.f32 0.0036580483, %v1458_v11  ;;  %v841_v39 = vadd.f32 %v3692_v57, %v840_v17  ;;  %vm3752_vm2 = vmor %vm842_vm0, %vm843_vm1 }
 0x1cd   : > { %v858_v61 = vmul.f32 %v857_v8, %v3715_v2  ;;  %v869_v28 = vmul.f32 %v868_v18, %v3715_v2  ;;  %v1474_v15 = vadd.f32 0.4994258, %v1473_v31  ;;  %v1777_v26 = vadd.f32 0.00028619796, %v1776_v53 }
 0x1ce   : > { %v1176_v14 = vmul.f32 2.1237322e-06, %v3736_v24  ;;  %v1187_v38 = vmul.f32 3.8918573e-05, %v3736_v24  ;;  %v1793_v12 = vmul.f32 %v1792_v45, %v3683_v42  ;;  %v1144_v62 = vmul.f32 %v1143_v40, %v3613_v56 }
 0x1cf   : > { %v859_v47 = vadd.f32 0.0036580483, %v858_v61  ;;  %v870_v36 = vadd.f32 0.014752088, %v869_v28  ;;  %v825_v37 = vadd.f32 1.1283791, %v824_v19  ;;  %v1460_v13 = vmul.f32 %v1459_v25, %v3668_v22  ;;  %v507_v25 = vpop.f32.mrf.mxu3 }
 0x1d0   : > { %v1177_v34 = vadd.f32 0.00028619796, %v1176_v14  ;;  %v1188_v55 = vadd.f32 0.001143296, %v1187_v38  ;;  %v849_v51 = vor.u32 1.1754944e-38, %v848_v10  ;;  %v1159_v43 = vsub.f32 1.0, %v1158_v50 }
 0x1d1   : > { %v845_v56 = vsel %vm3752_vm2, %v3692_v57, %v841_v39  ;;  %v860_v32 = vmul.f32 %v859_v47, %v3715_v2  ;;  %v871_v41 = vmul.f32 %v870_v36, %v3715_v2  ;;  %v1475_v48 = vmul.f32 %v1474_v15, %v3668_v22 }
 0x1d2   : > { %v1178_v58 = vmul.f32 %v1177_v34, %v3736_v24  ;;  %v1794_v16 = vadd.f32 0.4994258, %v1793_v12  ;;  %v1189_v54 = vmul.f32 %v1188_v55, %v3736_v24  ;;  %v3766_v33 = vadd.f32 %v3627_v60, %v487_v1 }
 0x1d3   : > { %v3769_v4 = vmul.f32 0.5, %v3513_v49  ;;  %vm847_vm3 = vcmp.eq.f32.partialorder %v846_v52, 8.507059e+37  ;;  %v1145_v9 = vadd.f32 1.1283791, %v1144_v62  ;;  %v1778_v57 = vmul.f32 %v1777_v26, %v3683_v42 }
 0x1d4   : > { %v850_v20 = vsel %vm847_vm3, %v849_v51, %v845_v56  ;;  %v1160_v11 = vmul.f32 %v3727_v3, %v1159_v43  ;;  %v861_v30 = vadd.f32 0.05243302, %v860_v32  ;;  %v872_v19 = vadd.f32 0.112945676, %v871_v41 }
 0x1d5   : > { %v826_v17 = vmul.f32 %v825_v37, %v3543_v29  ;;  %v1461_v31 = vadd.f32 0.05243302, %v1460_v13  ;;  %v1179_v53 = vadd.f32 0.0036580483, %v1178_v58  ;;  %v1190_v45 = vadd.f32 0.014752088, %v1189_v54 }
 0x1d6   : > { %v3774_v8 = vadd.f32 1.0, %v1475_v48  ;;  %v1795_v10 = vmul.f32 %v1794_v16, %v3683_v42  ;;  %v873_v49 = vmul.f32 %v872_v19, %v3715_v2  ;;  %v3779_v52 = vmul.f32 0.70710677, %v3766_v33 }
 0x1d7   : > { %v851_v40 = vmul.f32 %v850_v20, %v826_v17  ;;  %vm1163_vm4 = vweird.f32 %v3727_v3  ;;  %v1779_v18 = vadd.f32 0.0036580483, %v1778_v57  ;;  %v1191_v50 = vmul.f32 %v1190_v45, %v3736_v24 }
 0x1d8   : > { %v1161_v29 = vadd.f32 %v3727_v3, %v1160_v11  ;;  %v862_v61 = vmul.f32 %v861_v30, %v3715_v2  ;;  %v874_v39 = vadd.f32 0.4994258, %v873_v49  ;;  %v1494_v28 = vmul.f32 %v3779_v52, %v3779_v52 }
 0x1d9   : > { %vm1162_vm5 = vweird.f32 %v3697_v23  ;;  %v1168_v14 = vand.u32 2147483648, %v3697_v23  ;;  %v1180_v38 = vmul.f32 %v1179_v53, %v3736_v24  ;;  %v1192_v15 = vadd.f32 0.112945676, %v1191_v50 }
 0x1da   : > { %v1166_v26 = vand.u32 2147483647, %v3697_v23  ;;  %2445 = vrcp.f32 %v3774_v8  ;;  %v3792_v12 = vadd.f32 1.0, %v1795_v10  ;;  %v3795_v47 = vadd.f32 %v3627_v60, %v507_v25  ;;  %vm3799_vm6 = vmor %vm1162_vm5, %vm1163_vm4 }
 0x1db   : > { %v1462_v36 = vmul.f32 %v1461_v31, %v3668_v22  ;;  %v875_v34 = vmul.f32 %v874_v39, %v3715_v2  ;;  %v1193_v55 = vmul.f32 %v1192_v15, %v3736_v24  ;;  %v3806_v23 = vmin.f32 %v1494_v28, 16.0 }
 0x1dc   : > { %v2197_v1 = vclamps-f32 %v851_v40, 1.0  ;;  %v1165_v60 = vsel %vm3799_vm6, %v3727_v3, %v1161_v29  ;;  %v1780_v37 = vmul.f32 %v1779_v18, %v3683_v42  ;;  %v863_v6 = vadd.f32 0.18741608, %v862_v61 }
 0x1dd   : > { %v1169_v51 = vor.u32 1.1754944e-38, %v1168_v14  ;;  %v3812_v43 = vadd.f32 1.0, %v875_v34  ;;  %v1181_v13 = vadd.f32 0.05243302, %v1180_v38  ;;  %v1194_v56 = vadd.f32 0.4994258, %v1193_v55 }
 0x1de   : > { %vm1167_vm7 = vcmp.eq.f32.partialorder %v1166_v26, 8.507059e+37  ;;  %2447 = vrcp.f32 %v3792_v12  ;;  %v1496_v32 = vmul.f32 2.1237322e-06, %v3806_v23  ;;  %v3817_v41 = vmul.f32 0.70710677, %v3795_v47 }
 0x1df   : > { %v3820_v58 = vmul.f32 0.5, %v3573_v63  ;;  %v1170_v3 = vsel %vm1167_vm7, %v1169_v51, %v1165_v60  ;;  %v1463_v48 = vadd.f32 0.18741608, %v1462_v36  ;;  %2449 = vrcp.f32 %v3812_v43 }
 0x1e0   : > { %v3823_v16 = vpop.eup %2445  ;;  %v1860_v54 = vadd.f32 1.0, %v2197_v1  ;;  %v1146_v57 = vmul.f32 %v1145_v9, %v3586_v27  ;;  %v1781_v20 = vadd.f32 0.05243302, %v1780_v37  ;;  %v1195_v11 = vmul.f32 %v1194_v56, %v3736_v24 }
 0x1e1   : > { %v864_v30 = vmul.f32 %v863_v6, %v3715_v2  ;;  %v1182_v19 = vmul.f32 %v1181_v13, %v3736_v24  ;;  %v1497_v17 = vadd.f32 0.00028619796, %v1496_v32  ;;  %v1507_v63 = vmul.f32 3.8918573e-05, %v3806_v23 }
 0x1e2   : > { %v3830_v31 = vmul.f32 %v1170_v3, %v1146_v57  ;;  %v3833_v53 = vmul.f32 0.5, %v3690_v46  ;;  %v3835_v45 = vadd.f32 1.0, %v1195_v11  ;;  %v1814_v27 = vmul.f32 %v3817_v41, %v3817_v41 }
 0x1e3   : > { %v3840_v9 = vmul.f32 %v1463_v48, %v3668_v22  ;;  %v1478_v2 = vmul.f32 %v3823_v16, %v3774_v8  ;;  %v1498_v10 = vmul.f32 %v1497_v17, %v3806_v23  ;;  %v1508_v49 = vadd.f32 0.001143296, %v1507_v63 }
 0x1e4   : > { %v3845_v40 = vpop.eup %2447  ;;  %v3848_v18 = vmul.f32 %v1860_v54, %v3769_v4  ;;  %v1486_v46 = vand.u32 2147483647, %v3774_v8  ;;  %v3852_v50 = vmul.f32 %v1781_v20, %v3683_v42  ;;  %2451 = vrcp.f32 %v3835_v45 }
 0x1e5   : > { %v2450_v22 = vpop.eup %2449  ;;  %v1488_v25 = vand.u32 2147483648, %v3774_v8  ;;  %v865_v29 = vadd.f32 1.1283791, %v864_v30  ;;  %v1183_v61 = vadd.f32 0.18741608, %v1182_v19  ;;  %v1509_v39 = vmul.f32 %v1508_v49, %v3806_v23 }
 0x1e6   : > { %v2205_v28 = vclamps-f32 %v3830_v31, 1.0  ;;  %v878_v14 = vmul.f32 %v2450_v22, %v3812_v43  ;;  %v886_v4 = vand.u32 2147483647, %v3812_v43  ;;  %v3860_v38 = vmin.f32 %v1814_v27, 16.0 }
 0x1e7   : > { %v1479_v15 = vsub.f32 1.0, %v1478_v2  ;;  %v888_v26 = vand.u32 2147483648, %v3812_v43  ;;  %v1499_v62 = vadd.f32 0.0036580483, %v1498_v10  ;;  %v1510_v36 = vadd.f32 0.014752088, %v1509_v39 }
 0x1e8   : > { %v3865_v34 = vmul.f32 %v3845_v40, %v3792_v12  ;;  %v879_v55 = vsub.f32 1.0, %v878_v14  ;;  %v1816_v1 = vmul.f32 2.1237322e-06, %v3860_v38  ;;  %v1827_v60 = vmul.f32 3.8918573e-05, %v3860_v38 }
 0x1e9   : > { %v866_v37 = vmul.f32 %v865_v29, %v3704_v35  ;;  %vm882_vm8 = vweird.f32 %v3812_v43  ;;  %v1184_v6 = vmul.f32 %v1183_v61, %v3736_v24  ;;  %v1511_v51 = vmul.f32 %v1510_v36, %v3806_v23 }
 0x1ea   : > { %v2452_v13 = vpop.eup %2451  ;;  %v880_v56 = vmul.f32 %v2450_v22, %v879_v55  ;;  %vm883_vm9 = vweird.f32 %v2450_v22  ;;  %v1817_v32 = vadd.f32 0.00028619796, %v1816_v1  ;;  %v1828_v3 = vadd.f32 0.001143296, %v1827_v60 }
 0x1eb   : > { %vm3873_vm10 = vcmp.eq.f32.partialorder %v886_v4, 8.507059e+37  ;;  %v889_v54 = vor.u32 1.1754944e-38, %v888_v26  ;;  %v1198_v57 = vmul.f32 %v2452_v13, %v3835_v45  ;;  %v1512_v20 = vadd.f32 0.112945676, %v1511_v51  ;;  %vm884_vm11 = vmor %vm882_vm8, %vm883_vm9 }
 0x1ec   : > { %v881_v35 = vadd.f32 %v2450_v22, %v880_v56  ;;  %v1500_v11 = vmul.f32 %v1499_v62, %v3806_v23  ;;  %v1818_v24 = vmul.f32 %v1817_v32, %v3860_v38  ;;  %v1829_v30 = vmul.f32 %v1828_v3, %v3860_v38 }
 0x1ed   : > { %v1185_v19 = vadd.f32 1.1283791, %v1184_v6  ;;  %v1199_v17 = vsub.f32 1.0, %v1198_v57  ;;  %v1206_v63 = vand.u32 2147483647, %v3835_v45  ;;  %v1513_v27 = vmul.f32 %v1512_v20, %v3806_v23 }
 0x1ee   : > { %v885_v2 = vsel %vm884_vm11, %v2450_v22, %v881_v35  ;;  %vm1203_vm12 = vweird.f32 %v2452_v13  ;;  %v1208_v10 = vand.u32 2147483648, %v3835_v45  ;;  %v1830_v49 = vadd.f32 0.014752088, %v1829_v30 }
 0x1ef   : > { %v890_v29 = vsel %vm3873_vm10, %v889_v54, %v885_v2  ;;  %v1200_v61 = vmul.f32 %v2452_v13, %v1199_v17  ;;  %v1514_v39 = vadd.f32 0.4994258, %v1513_v27  ;;  %v1819_v14 = vadd.f32 0.0036580483, %v1818_v24 }
 0x1f0   : > { %v1480_v43 = vmul.f32 %v3823_v16, %v1479_v15  ;;  %v891_v4 = vmul.f32 %v890_v29, %v866_v37  ;;  %v1501_v26 = vadd.f32 0.05243302, %v1500_v11  ;;  %v1831_v62 = vmul.f32 %v1830_v49, %v3860_v38 }
 0x1f1   : > { %v1799_v36 = vsub.f32 1.0, %v3865_v34  ;;  %v1201_v55 = vadd.f32 %v2452_v13, %v1200_v61  ;;  %vm1202_vm13 = vweird.f32 %v3835_v45  ;;  %v1515_v22 = vmul.f32 %v1514_v39, %v3806_v23 }
 0x1f2   : > { %v2198_v1 = vclamps-f32 %v891_v4, 1.0  ;;  %v1186_v60 = vmul.f32 %v1185_v19, %v3719_v59  ;;  %vm1204_vm14 = vmor %vm1202_vm13, %vm1203_vm12  ;;  %v1209_v6 = vor.u32 1.1754944e-38, %v1208_v10  ;;  %v1832_v51 = vadd.f32 0.112945676, %v1831_v62 }
 0x1f3   : > { %v1205_v56 = vsel %vm1204_vm14, %v2452_v13, %v1201_v55  ;;  %vm1207_vm15 = vcmp.eq.f32.partialorder %v1206_v63, 8.507059e+37  ;;  %v3895_v15 = vadd.f32 1.0, %v1515_v22  ;;  %v1820_v37 = vmul.f32 %v1819_v14, %v3860_v38 }
 0x1f4   : > { %v1861_v32 = vadd.f32 1.0, %v2198_v1  ;;  %v1210_v34 = vsel %vm1207_vm15, %v1209_v6, %v1205_v56  ;;  %v1502_v3 = vmul.f32 %v1501_v26, %v3806_v23  ;;  %v1833_v45 = vmul.f32 %v1832_v51, %v3860_v38 }
 0x1f5   : > { %v1481_v48 = vadd.f32 %v3823_v16, %v1480_v43  ;;  %vm1483_vm0 = vweird.f32 %v3823_v16  ;;  %v1211_v59 = vmul.f32 %v1210_v34, %v1186_v60  ;;  %2453 = vrcp.f32 %v3895_v15 }
 0x1f6   : > { %v1868_v13 = vadd.f32 1.0, %v2205_v28  ;;  %v1783_v54 = vadd.f32 0.18741608, %v3852_v50  ;;  %v1893_v57 = vmul.f32 %v1861_v32, %v3833_v53  ;;  %v1834_v20 = vadd.f32 0.4994258, %v1833_v45 }
 0x1f7   : > { %vm1482_vm1 = vweird.f32 %v3774_v8  ;;  %v1800_v35 = vmul.f32 %v3845_v40, %v1799_v36  ;;  %v2206_v11 = vclamps-f32 %v1211_v59, 1.0  ;;  %v1821_v24 = vadd.f32 0.05243302, %v1820_v37 }
 0x1f8   : > { %vm3909_vm2 = vmor %vm1482_vm1, %vm1483_vm0  ;;  %v2267_v19 = vpack.c.bf16 %v1893_v57, %v3848_v18  ;;  %v525_v31 = vmul.f32 0.5, %v3709_v0  ;;  %v1503_v28 = vadd.f32 0.18741608, %v1502_v3  ;;  %v1835_v50 = vmul.f32 %v1834_v20, %v3860_v38 }
 0x1f9   : > { %v1465_v53 = vadd.f32 1.1283791, %v3840_v9  ;;  %v1485_v17 = vsel %vm3909_vm2, %v3823_v16, %v1481_v48  ;;  %vm1487_vm3 = vcmp.eq.f32.partialorder %v1486_v46, 8.507059e+37  ;;  %v1869_v63 = vadd.f32 1.0, %v2206_v11 }
 0x1fa   : > { %v1900_v27 = vmul.f32 %v1868_v13, %v3820_v58  ;;  %v1489_v18 = vor.u32 1.1754944e-38, %v1488_v25  ;;  %v1784_v0 = vmul.f32 %v1783_v54, %v3683_v42  ;;  %2331 = vst [vmem:[%s2918_s17 + $0x18] sm:$0xff] %v2267_v19   ;;  %v3927_v2 = vadd.f32 1.0, %v1835_v50 }
 0x1fb   : > { %v2454_v10 = vpop.eup %2453  ;;  %v1801_v9 = vadd.f32 %v3845_v40, %v1800_v35  ;;  %vm1803_vm4 = vweird.f32 %v3845_v40  ;;  %v1901_v16 = vmul.f32 %v1869_v63, %v525_v31  ;;  %v1822_v46 = vmul.f32 %v1821_v24, %v3860_v38 }
 0x1fc   : > { %v1490_v49 = vsel %vm1487_vm3, %v1489_v18, %v1485_v17  ;;  %v1504_v58 = vmul.f32 %v1503_v28, %v3806_v23  ;;  %v1518_v8 = vmul.f32 %v2454_v10, %v3895_v15  ;;  %2455 = vrcp.f32 %v3927_v2 }
 0x1fd   : > { %v1466_v42 = vmul.f32 %v1465_v53, %v3647_v21  ;;  %vm1802_vm5 = vweird.f32 %v3792_v12  ;;  %v1808_v25 = vand.u32 2147483648, %v3792_v12  ;;  %v2287_v29 = vpack.c.bf16 %v1901_v16, %v1900_v27 }
 0x1fe   : > { %v1785_v61 = vadd.f32 1.1283791, %v1784_v0  ;;  %vm3938_vm6 = vmor %vm1802_vm5, %vm1803_vm4  ;;  %v1806_v14 = vand.u32 2147483647, %v3792_v12  ;;  %v1519_v43 = vsub.f32 1.0, %v1518_v8  ;;  %v1528_v21 = vand.u32 2147483648, %v3895_v15 }
 0x1ff   : > { %v1491_v23 = vmul.f32 %v1490_v49, %v1466_v42  ;;  %v1805_v4 = vsel %vm3938_vm6, %v3845_v40, %v1801_v9  ;;  %2335 = vst [vmem:[%s2918_s17 + $0x38] sm:$0xff] %v2287_v29   ;;  %v1823_v26 = vadd.f32 0.18741608, %v1822_v46  ;;  %v1505_v62 = vadd.f32 1.1283791, %v1504_v58 }
 0x200   : > { %v1520_v36 = vmul.f32 %v2454_v10, %v1519_v43  ;;  %vm1523_vm7 = vweird.f32 %v2454_v10  ;;  %v1526_v55 = vand.u32 2147483647, %v3895_v15  ;;  %v1809_v22 = vor.u32 1.1754944e-38, %v1808_v25 }
 0x201   : > { %v1786_v60 = vmul.f32 %v1785_v61, %v3663_v7  ;;  %vm1807_vm8 = vcmp.eq.f32.partialorder %v1806_v14, 8.507059e+37  ;;  %vm1522_vm9 = vweird.f32 %v3895_v15  ;;  %v1529_v40 = vor.u32 1.1754944e-38, %v1528_v21 }
 0x202   : > { %v2456_v1 = vpop.eup %2455  ;;  %v1521_v12 = vadd.f32 %v2454_v10, %v1520_v36  ;;  %v1810_v6 = vsel %vm1807_vm8, %v1809_v22, %v1805_v4  ;;  %vm1524_vm10 = vmor %vm1522_vm9, %vm1523_vm7  ;;  %v1824_v51 = vmul.f32 %v1823_v26, %v3860_v38  ;;  %v2213_v37 = vclamps-f32 %v1491_v23, 1.0 }
 0x203   : > { %v1838_v56 = vmul.f32 %v2456_v1, %v3927_v2  ;;  %v1506_v32 = vmul.f32 %v1505_v62, %v3779_v52  ;;  %vm1527_vm11 = vcmp.eq.f32.partialorder %v1526_v55, 8.507059e+37  ;;  %v1811_v48 = vmul.f32 %v1810_v6, %v1786_v60 }
 0x204   : > { %v1525_v34 = vsel %vm1524_vm10, %v2454_v10, %v1521_v12  ;;  %v1848_v59 = vand.u32 2147483648, %v3927_v2  ;;  %v1825_v13 = vadd.f32 1.1283791, %v1824_v51  ;;  %vm1843_vm12 = vweird.f32 %v2456_v1 }
 0x205   : > { %v1530_v3 = vsel %vm1527_vm11, %v1529_v40, %v1525_v34  ;;  %v1839_v45 = vsub.f32 1.0, %v1838_v56  ;;  %v1846_v54 = vand.u32 2147483647, %v3927_v2  ;;  %v1876_v57 = vadd.f32 1.0, %v2213_v37 }
 0x206   : > { %v1531_v7 = vmul.f32 %v1530_v3, %v1506_v32  ;;  %vm1842_vm13 = vweird.f32 %v3927_v2  ;;  %v532_v52 = vmul.f32 0.5, %v3630_v5  ;;  %v533_v35 = vmul.f32 0.5, %v3766_v33 }
 0x207   : > { %v1840_v15 = vmul.f32 %v2456_v1, %v1839_v45  ;;  %vm1844_vm14 = vmor %vm1842_vm13, %vm1843_vm12  ;;  %v1849_v24 = vor.u32 1.1754944e-38, %v1848_v59  ;;  %v2221_v30 = vclamps-f32 %v1811_v48, 1.0  ;;  %v1826_v19 = vmul.f32 %v1825_v13, %v3817_v41 }
 0x208   : > { %v2214_v38 = vclamps-f32 %v1531_v7, 1.0  ;;  %vm1847_vm15 = vcmp.eq.f32.partialorder %v1846_v54, 8.507059e+37  ;;  %v1908_v28 = vmul.f32 %v1876_v57, %v532_v52  ;;  %v540_v5 = vmul.f32 0.5, %v3650_v44 }
 0x209   : > { %v1841_v20 = vadd.f32 %v2456_v1, %v1840_v15  ;;  %v1884_v27 = vadd.f32 1.0, %v2221_v30  ;;  %v541_v33 = vmul.f32 0.5, %v3795_v47 }
 0x20a   : > { %v1877_v11 = vadd.f32 1.0, %v2214_v38 }
 0x20b   : > { %v1845_v31 = vsel %vm1844_vm14, %v2456_v1, %v1841_v20  ;;  %v1916_v2 = vmul.f32 %v1884_v27, %v540_v5 }
 0x20c   : > { %v1909_v50 = vmul.f32 %v1877_v11, %v533_v35  ;;  %v1850_v53 = vsel %vm1847_vm15, %v1849_v24, %v1845_v31 }
 0x20d   : > { %v1851_v17 = vmul.f32 %v1850_v53, %v1826_v19 }
 0x20e   : > { %v2307_v63 = vpack.c.bf16 %v1909_v50, %v1908_v28 }
 0x20f   : > { %v2222_v18 = vclamps-f32 %v1851_v17, 1.0 }
 0x210   : > { %2339 = vst [vmem:[%s2918_s17 + $0x58] sm:$0xff] %v2307_v63  }
 0x211   : > { %v1885_v0 = vadd.f32 1.0, %v2222_v18 }
 0x213   : > { %v1917_v10 = vmul.f32 %v1885_v0, %v541_v33 }
 0x215   : > { %v2327_v9 = vpack.c.bf16 %v1917_v10, %v1916_v2 }
 0x217   : > { %2343 = vst [vmem:[%s2918_s17 + $0x78] sm:$0xff] %v2327_v9  }
 0x218 PF: > { %s13_s14 = sadd.s32 1, %s2481_s14   ;;  %s4027_s12 = smov %s2477_s13 }
 0x219   : > { %p10_p5 = scmp.ge.s32.totalorder %s13_s14, 4   ;;  %s4028_s13 = smov %s4030_s15 }
 0x21b   :  { %12 = sbr.rel (!%p10_p5) target bundleno = 2 (0x2), region = 68 }

// kernel: bottleneck_forward.7
= control target key start
LH: loop header
LB: loop body
LE: loop exit
PB: predicated region body
PF: predicated region fallthrough
CT: control target
= control target key end

     0   :  { %s1131_s15 = smov 0   ;;  %s1133_s16 = smov 0   ;;  %s1459_s0 = inlined_call_operand.vmem [shape: bf16[128,128], index: 0, kind: input, shape index: {}]   ;;  %s1460_s1 = inlined_call_operand.vmem [shape: bf16[128,128], index: 1, kind: input, shape index: {}]   ;;  %s1461_s2 = inlined_call_operand.vmem [shape: f32[1,128], index: 2, kind: input, shape index: {}]   ;;  %s1462_s3 = inlined_call_operand.vmem [shape: bf16[128,128], index: 3, kind: input, shape index: {}]   ;;  %s1463_s4 = inlined_call_operand.vmem [shape: f32[128,128], index: 4, kind: output, shape index: {}]  }
   0x1   :  { %s1135_s17 = smov 0  }
   0x2 LB: > { %s26_s18 = sadd.s32 1, %s1100_s16  ;;  %p921_p0 = scmp.ge.s32.totalorder %s1104_s17, 1  ;;  %s1104_s17 = sphi %s1135_s17, %s14_s17   ;;  %s1100_s16 = sphi %s1133_s16, %s1469_s16   ;;  %s1096_s15 = sphi %s1131_s15, %s1468_s15  }
   0x3   : > { %p28_p1 = scmp.ge.s32.totalorder %s26_s18, 2  ;;  %p210_p2 = scmp.lt.s32.totalorder %s1104_s17, 3 }
   0x5   : > { %s1471_s18 = smov (%p28_p1, %s26_s18), 0  ;;  %p211_p3 = pnand %p921_p0, %p210_p2 }
   0x6   : > { %s922_s27 = sshll.u32 (!%p211_p3), %s1096_s15, 3 }
   0x7   : > { %214 = sbr.rel (%p211_p3) target bundleno = 287 (0x11f), region = 36  ;;  %p255_p4 = scmp.lt.s32.totalorder (!%p211_p3), %s922_s27, 15 }
   0xc   : > { %v997_v0 = vld [vmem:[%s1460_s1 + $0x38] sm:$0xff]  ;;  %v996_v1 = vld [vmem:[%s1460_s1 + $0x30] sm:$0xff]  ;;  %v995_v2 = vld [vmem:[%s1460_s1 + $0x28] sm:$0xff]  ;;  %s1473_s27 = smov (!%p255_p4, %s922_s27), 15 }
   0xd   : > { %385 = vmatpush.bf16.msra.mxu0 %v997_v0  ;;  %1017 = vmatpush.bf16.msra.mxu1 %v997_v0  ;;  %v994_v3 = vld [vmem:[%s1460_s1 + $0x20] sm:$0xff]  ;;  %v993_v4 = vld [vmem:[%s1460_s1 + $0x18] sm:$0xff]  ;;  %v992_v5 = vld [vmem:[%s1460_s1 + $0x10] sm:$0xff]  ;;  %s923_s8 = sshll.u32 %s1473_s27, 2  ;;  %s927_s22 = sshll.u32 %s1473_s27, 3 }
   0xe   : > { %1018 = vmatpush.bf16.msra.mxu2 %v997_v0  ;;  %1019 = vmatpush.bf16.msra.mxu3 %v997_v0  ;;  %v991_v6 = vld [vmem:[%s1460_s1 + $0x8] sm:$0xff]  ;;  %v990_v7 = vld [vmem:[%s1460_s1] sm:$0xff]  ;;  %s258_s13 = scalar_lea.vmem %s1459_s0, %s923_s8  ;;  %s274_s19 = scalar_lea.vmem %s1462_s3, %s923_s8 }
   0xf   : > { %v986_v8 = vld [vmem:[%s258_s13] sm:$0xff]  ;;  %v987_v9 = vld [vmem:[%s258_s13 + $0x8] sm:$0xff]  ;;  %v988_v10 = vld [vmem:[%s258_s13 + $0x10] sm:$0xff]  ;;  %s1367_s25 = scalar_lea.vmem %s1463_s4, %s927_s22 }
  0x10   : > { %v989_v11 = vld [vmem:[%s258_s13 + $0x18] sm:$0xff]  ;;  %v999_v12 = vld [vmem:[%s274_s19] sm:$0xff]   ;;  %v1185_v13 = vld [vmem:[%s274_s19 + $0x8] sm:$0xff]  }
  0x11   : > { %386 = vmatpush.bf16.msra.mxu0 %v996_v1  ;;  %1020 = vmatpush.bf16.msra.mxu1 %v996_v1  ;;  %v1190_v14 = vld [vmem:[%s1461_s2] ss:$0 sm:$0xff]  ;;  %v1000_v15 = vunpack.c.l.bf16 %v999_v12  ;;  %v1004_v16 = vunpack.c.l.bf16 %v1185_v13  ;;  %v1199_v23 = vld [vmem:[%s274_s19 + $0x10] sm:$0xff]   ;;  %v1201_v24 = vld [vmem:[%s274_s19 + $0x18] sm:$0xff]   ;;  %v1001_v46 = vunpack.c.h.bf16 %v999_v12 }
  0x12   : > { %1021 = vmatpush.bf16.msra.mxu2 %v996_v1  ;;  %1022 = vmatpush.bf16.msra.mxu3 %v996_v1  ;;  %v1008_v27 = vunpack.c.l.bf16 %v1199_v23  ;;  %v1012_v28 = vunpack.c.l.bf16 %v1201_v24 }
  0x15   : > { %387 = vmatpush.bf16.msra.mxu0 %v995_v2  ;;  %1023 = vmatpush.bf16.msra.mxu1 %v995_v2 }
  0x16   : > { %1024 = vmatpush.bf16.msra.mxu2 %v995_v2  ;;  %1025 = vmatpush.bf16.msra.mxu3 %v995_v2 }
  0x19   : > { %388 = vmatpush.bf16.msra.mxu0 %v994_v3  ;;  %1026 = vmatpush.bf16.msra.mxu1 %v994_v3 }
  0x1a   : > { %1027 = vmatpush.bf16.msra.mxu2 %v994_v3  ;;  %1028 = vmatpush.bf16.msra.mxu3 %v994_v3 }
  0x1d   : > { %389 = vmatpush.bf16.msra.mxu0 %v993_v4  ;;  %1029 = vmatpush.bf16.msra.mxu1 %v993_v4 }
  0x1e   : > { %1030 = vmatpush.bf16.msra.mxu2 %v993_v4  ;;  %1031 = vmatpush.bf16.msra.mxu3 %v993_v4 }
  0x21   : > { %390 = vmatpush.bf16.msra.mxu0 %v992_v5  ;;  %1032 = vmatpush.bf16.msra.mxu1 %v992_v5 }
  0x22   : > { %1033 = vmatpush.bf16.msra.mxu2 %v992_v5  ;;  %1034 = vmatpush.bf16.msra.mxu3 %v992_v5 }
  0x25   : > { %391 = vmatpush.bf16.msra.mxu0 %v991_v6  ;;  %1035 = vmatpush.bf16.msra.mxu1 %v991_v6 }
  0x26   : > { %1036 = vmatpush.bf16.msra.mxu2 %v991_v6  ;;  %1037 = vmatpush.bf16.msra.mxu3 %v991_v6 }
  0x29   : > { %392 = vmatpush.bf16.msra.mxu0 %v990_v7  ;;  %1038 = vmatpush.bf16.msra.mxu1 %v990_v7 }
  0x2a   : > { %1039 = vmatpush.bf16.msra.mxu2 %v990_v7  ;;  %1040 = vmatpush.bf16.msra.mxu3 %v990_v7 }
  0x2c   : > { %393 = vmatmul.bf16.vlgmr.msra.gmra.mxu0 %v986_v8  ;;  %398 = vmatmul.bf16.vlgmr.msra.gmra.mxu1 %v987_v9 }
  0x2d   : > { %403 = vmatmul.bf16.vlgmr.msra.gmra.mxu2 %v988_v10  ;;  %408 = vmatmul.bf16.vlgmr.msra.gmra.mxu3 %v989_v11 }
  0xa9   : > { %v394_v17 = vpop.f32.mrf.mxu0  ;;  %v399_v18 = vpop.f32.mrf.mxu1 }
  0xaa   : > { %v395_v19 = vadd.f32 %v1190_v14, %v394_v17  ;;  %v400_v20 = vadd.f32 %v1190_v14, %v399_v18 }
  0xac   : > { %v1195_v21 = vadd.f32 %v1000_v15, %v395_v19  ;;  %v1197_v22 = vadd.f32 %v1004_v16, %v400_v20 }
  0xae   : > { %v1204_v25 = vmul.f32 0.70710677, %v1195_v21  ;;  %v1207_v26 = vmul.f32 0.70710677, %v1197_v22 }
  0xb0   : > { %v454_v29 = vmul.f32 %v1204_v25, %v1204_v25  ;;  %v534_v30 = vmul.f32 %v1207_v26, %v1207_v26  ;;  %v404_v31 = vpop.f32.mrf.mxu2  ;;  %v409_v32 = vpop.f32.mrf.mxu3 }
  0xb1   : > { %v405_v33 = vadd.f32 %v1190_v14, %v404_v31  ;;  %v410_v34 = vadd.f32 %v1190_v14, %v409_v32  ;;  %v396_v37 = vpop.f32.mrf.mxu0 }
  0xb2   : > { %v1217_v35 = vmin.f32 %v454_v29, 16.0  ;;  %v1219_v36 = vmin.f32 %v534_v30, 16.0  ;;  %v397_v45 = vadd.f32 %v1190_v14, %v396_v37 }
  0xb3   : > { %v1221_v38 = vadd.f32 %v1008_v27, %v405_v33  ;;  %v1223_v39 = vadd.f32 %v1012_v28, %v410_v34 }
  0xb4   : > { %v456_v40 = vmul.f32 2.1237322e-06, %v1217_v35  ;;  %v467_v41 = vmul.f32 3.8918573e-05, %v1217_v35  ;;  %v536_v42 = vmul.f32 2.1237322e-06, %v1219_v36  ;;  %v1246_v59 = vadd.f32 %v1001_v46, %v397_v45  ;;  %v401_v45 = vpop.f32.mrf.mxu1 }
  0xb5   : > { %v547_v43 = vmul.f32 3.8918573e-05, %v1219_v36  ;;  %v1230_v44 = vmul.f32 0.70710677, %v1221_v38  ;;  %v1236_v52 = vmul.f32 0.70710677, %v1223_v39 }
  0xb6   : > { %v457_v47 = vadd.f32 0.00028619796, %v456_v40  ;;  %v468_v48 = vadd.f32 0.001143296, %v467_v41  ;;  %v537_v49 = vadd.f32 0.00028619796, %v536_v42 }
  0xb7   : > { %v548_v50 = vadd.f32 0.001143296, %v547_v43  ;;  %v614_v51 = vmul.f32 %v1230_v44, %v1230_v44  ;;  %v694_v58 = vmul.f32 %v1236_v52, %v1236_v52  ;;  %v1257_v9 = vmul.f32 0.70710677, %v1246_v59 }
  0xb8   : > { %v458_v53 = vmul.f32 %v457_v47, %v1217_v35  ;;  %v469_v54 = vmul.f32 %v468_v48, %v1217_v35  ;;  %v538_v55 = vmul.f32 %v537_v49, %v1219_v36 }
  0xb9   : > { %v549_v56 = vmul.f32 %v548_v50, %v1219_v36  ;;  %v1242_v57 = vmin.f32 %v614_v51, 16.0  ;;  %v1253_v5 = vmin.f32 %v694_v58, 16.0  ;;  %v1005_v58 = vunpack.c.h.bf16 %v1185_v13 }
  0xba   : > { %v459_v60 = vadd.f32 0.0036580483, %v458_v53  ;;  %v470_v61 = vadd.f32 0.014752088, %v469_v54  ;;  %v539_v62 = vadd.f32 0.0036580483, %v538_v55 }
  0xbb   : > { %v550_v63 = vadd.f32 0.014752088, %v549_v56  ;;  %v616_v0 = vmul.f32 2.1237322e-06, %v1242_v57  ;;  %v627_v1 = vmul.f32 3.8918573e-05, %v1242_v57  ;;  %v402_v56 = vadd.f32 %v1190_v14, %v401_v45 }
  0xbc   : > { %v460_v2 = vmul.f32 %v459_v60, %v1217_v35  ;;  %v471_v3 = vmul.f32 %v470_v61, %v1217_v35  ;;  %v540_v4 = vmul.f32 %v539_v62, %v1219_v36  ;;  %v696_v18 = vmul.f32 2.1237322e-06, %v1253_v5 }
  0xbd   : > { %v551_v6 = vmul.f32 %v550_v63, %v1219_v36  ;;  %v617_v7 = vadd.f32 0.00028619796, %v616_v0  ;;  %v628_v8 = vadd.f32 0.001143296, %v627_v1  ;;  %v707_v28 = vmul.f32 3.8918573e-05, %v1253_v5  ;;  %v406_v1 = vpop.f32.mrf.mxu2 }
  0xbe   : > { %v461_v10 = vadd.f32 0.05243302, %v460_v2  ;;  %v472_v11 = vadd.f32 0.112945676, %v471_v3  ;;  %v541_v12 = vadd.f32 0.05243302, %v540_v4  ;;  %v494_v62 = vmul.f32 %v1257_v9, %v1257_v9 }
  0xbf   : > { %v552_v15 = vadd.f32 0.112945676, %v551_v6  ;;  %v618_v16 = vmul.f32 %v617_v7, %v1242_v57  ;;  %v629_v17 = vmul.f32 %v628_v8, %v1242_v57  ;;  %v697_v32 = vadd.f32 0.00028619796, %v696_v18 }
  0xc0   : > { %v462_v19 = vmul.f32 %v461_v10, %v1217_v35  ;;  %v473_v20 = vmul.f32 %v472_v11, %v1217_v35  ;;  %v542_v27 = vmul.f32 %v541_v12, %v1219_v36  ;;  %v708_v48 = vadd.f32 0.001143296, %v707_v28 }
  0xc1   : > { %v553_v29 = vmul.f32 %v552_v15, %v1219_v36  ;;  %v619_v30 = vadd.f32 0.0036580483, %v618_v16  ;;  %v630_v31 = vadd.f32 0.014752088, %v629_v17  ;;  %v698_v43 = vmul.f32 %v697_v32, %v1253_v5 }
  0xc2   : > { %v463_v33 = vadd.f32 0.18741608, %v462_v19  ;;  %v474_v34 = vadd.f32 0.4994258, %v473_v20  ;;  %v543_v37 = vadd.f32 0.18741608, %v542_v27  ;;  %v1297_v10 = vadd.f32 %v1005_v58, %v402_v56 }
  0xc3   : > { %v554_v40 = vadd.f32 0.4994258, %v553_v29  ;;  %v620_v41 = vmul.f32 %v619_v30, %v1242_v57  ;;  %v631_v42 = vmul.f32 %v630_v31, %v1242_v57  ;;  %v699_v55 = vadd.f32 0.0036580483, %v698_v43 }
  0xc4   : > { %v464_v46 = vmul.f32 %v463_v33, %v1217_v35  ;;  %v475_v47 = vmul.f32 %v474_v34, %v1217_v35  ;;  %v544_v49 = vmul.f32 %v543_v37, %v1219_v36  ;;  %v1288_v13 = vmul.f32 0.5, %v1195_v21 }
  0xc5   : > { %v555_v50 = vmul.f32 %v554_v40, %v1219_v36  ;;  %v621_v51 = vadd.f32 0.05243302, %v620_v41  ;;  %v632_v53 = vadd.f32 0.112945676, %v631_v42  ;;  %v709_v36 = vmul.f32 %v708_v48, %v1253_v5 }
  0xc6   : > { %v1274_v54 = vadd.f32 1.0, %v475_v47  ;;  %v465_v63 = vadd.f32 1.1283791, %v464_v46  ;;  %v545_v0 = vadd.f32 1.1283791, %v544_v49  ;;  %v1291_v2 = vmul.f32 0.5, %v1197_v22 }
  0xc7   : > { %v1278_v60 = vadd.f32 1.0, %v555_v50  ;;  %v622_v61 = vmul.f32 %v621_v51, %v1242_v57  ;;  %v633_v35 = vmul.f32 %v632_v53, %v1242_v57  ;;  %v700_v4 = vmul.f32 %v699_v55, %v1253_v5 }
  0xc8   : > { %1066 = vrcp.f32 %v1274_v54  ;;  %v486_v6 = vand.u32 2147483647, %v1274_v54  ;;  %v1295_v8 = vmin.f32 %v494_v62, 16.0  ;;  %v488_v11 = vand.u32 2147483648, %v1274_v54 }
  0xc9   : > { %1068 = vrcp.f32 %v1278_v60  ;;  %v623_v3 = vadd.f32 0.18741608, %v622_v61  ;;  %v634_v7 = vadd.f32 0.4994258, %v633_v35  ;;  %v710_v12 = vadd.f32 0.014752088, %v709_v36 }
  0xca   : > { %v407_v15 = vadd.f32 %v1190_v14, %v406_v1  ;;  %v1009_v21 = vunpack.c.h.bf16 %v1199_v23  ;;  %v466_v22 = vmul.f32 %v465_v63, %v1204_v25  ;;  %vm482_vm0 = vweird.f32 %v1274_v54 }
  0xcb   : > { %v546_v16 = vmul.f32 %v545_v0, %v1207_v26  ;;  %v635_v17 = vmul.f32 %v634_v7, %v1242_v57  ;;  %vm562_vm1 = vweird.f32 %v1278_v60  ;;  %v566_v19 = vand.u32 2147483647, %v1278_v60 }
  0xcc   : > { %v624_v20 = vmul.f32 %v623_v3, %v1242_v57  ;;  %v701_v27 = vadd.f32 0.05243302, %v700_v4  ;;  %v711_v28 = vmul.f32 %v710_v12, %v1253_v5  ;;  %vm1311_vm2 = vcmp.eq.f32.partialorder %v486_v6, 8.507059e+37 }
  0xcd   : > { %v1315_v26 = vadd.f32 1.0, %v635_v17  ;;  %v496_v30 = vmul.f32 2.1237322e-06, %v1295_v8  ;;  %v507_v31 = vmul.f32 3.8918573e-05, %v1295_v8  ;;  %v489_v32 = vor.u32 1.1754944e-38, %v488_v11 }
  0xce   : > { %v1067_v18 = vpop.eup %1066  ;;  %v568_v57 = vand.u32 2147483648, %v1278_v60  ;;  %v712_v34 = vadd.f32 0.112945676, %v711_v28  ;;  %v1323_v40 = vmul.f32 0.70710677, %v1297_v10  ;;  %v1325_v41 = vadd.f32 %v1009_v21, %v407_v15 }
  0xcf   : > { %v1069_v29 = vpop.eup %1068  ;;  %v478_v23 = vmul.f32 %v1067_v18, %v1274_v54  ;;  %1070 = vrcp.f32 %v1315_v26  ;;  %v625_v43 = vadd.f32 1.1283791, %v624_v20  ;;  %v702_v45 = vmul.f32 %v701_v27, %v1253_v5 }
  0xd0   : > { %v558_v33 = vmul.f32 %v1069_v29, %v1278_v60  ;;  %v713_v46 = vmul.f32 %v712_v34, %v1253_v5  ;;  %vm483_vm3 = vweird.f32 %v1067_v18  ;;  %v497_v48 = vadd.f32 0.00028619796, %v496_v30 }
  0xd1   : > { %v479_v37 = vsub.f32 1.0, %v478_v23  ;;  %v508_v49 = vadd.f32 0.001143296, %v507_v31  ;;  %vm563_vm4 = vweird.f32 %v1069_v29  ;;  %vm1329_vm5 = vcmp.eq.f32.partialorder %v566_v19, 8.507059e+37  ;;  %vm484_vm6 = vmor %vm482_vm0, %vm483_vm3 }
  0xd2   : > { %v559_v42 = vsub.f32 1.0, %v558_v33  ;;  %v714_v53 = vadd.f32 0.4994258, %v713_v46  ;;  %v498_v56 = vmul.f32 %v497_v48, %v1295_v8  ;;  %v574_v61 = vmul.f32 %v1323_v40, %v1323_v40  ;;  %vm564_vm7 = vmor %vm562_vm1, %vm563_vm4 }
  0xd3   : > { %v480_v47 = vmul.f32 %v1067_v18, %v479_v37  ;;  %v509_v58 = vmul.f32 %v508_v49, %v1295_v8  ;;  %v569_v62 = vor.u32 1.1754944e-38, %v568_v57  ;;  %v703_v36 = vadd.f32 0.18741608, %v702_v45 }
  0xd4   : > { %v560_v50 = vmul.f32 %v1069_v29, %v559_v42  ;;  %v715_v63 = vmul.f32 %v714_v53, %v1253_v5  ;;  %v626_v3 = vmul.f32 %v625_v43, %v1230_v44  ;;  %v1343_v6 = vmin.f32 %v574_v61, 16.0 }
  0xd5   : > { %v481_v55 = vadd.f32 %v1067_v18, %v480_v47  ;;  %v1071_v0 = vpop.eup %1070  ;;  %v510_v4 = vadd.f32 0.014752088, %v509_v58  ;;  %v499_v12 = vadd.f32 0.0036580483, %v498_v56  ;;  %v646_v60 = vand.u32 2147483647, %v1315_v26 }
  0xd6   : > { %v561_v35 = vadd.f32 %v1069_v29, %v560_v50  ;;  %v638_v11 = vmul.f32 %v1071_v0, %v1315_v26  ;;  %v1351_v17 = vadd.f32 1.0, %v715_v63  ;;  %v648_v19 = vand.u32 2147483648, %v1315_v26 }
  0xd7   : > { %v485_v1 = vsel %vm484_vm6, %v1067_v18, %v481_v55  ;;  %v511_v20 = vmul.f32 %v510_v4, %v1295_v8  ;;  %v576_v28 = vmul.f32 2.1237322e-06, %v1343_v6  ;;  %vm643_vm8 = vweird.f32 %v1071_v0 }
  0xd8   : > { %v490_v54 = vsel %vm1311_vm2, %v489_v32, %v485_v1  ;;  %v565_v7 = vsel %vm564_vm7, %v1069_v29, %v561_v35  ;;  %v639_v44 = vsub.f32 1.0, %v638_v11  ;;  %1072 = vrcp.f32 %v1351_v17 }
  0xd9   : > { %v491_v15 = vmul.f32 %v490_v54, %v466_v22  ;;  %v570_v21 = vsel %vm1329_vm5, %v569_v62, %v565_v7  ;;  %v1359_v22 = vmul.f32 0.70710677, %v1325_v41  ;;  %v500_v25 = vmul.f32 %v499_v12, %v1295_v8 }
  0xda   : > { %v571_v18 = vmul.f32 %v570_v21, %v546_v16  ;;  %v640_v23 = vmul.f32 %v1071_v0, %v639_v44  ;;  %vm642_vm9 = vweird.f32 %v1315_v26  ;;  %v704_v30 = vmul.f32 %v703_v36, %v1253_v5 }
  0xdb   : > { %v976_v27 = vclamps-f32 %v491_v15, 1.0  ;;  %v512_v31 = vadd.f32 0.112945676, %v511_v20  ;;  %vm647_vm10 = vcmp.eq.f32.partialorder %v646_v60, 8.507059e+37  ;;  %v649_v57 = vor.u32 1.1754944e-38, %v648_v19  ;;  %vm644_vm11 = vmor %vm642_vm9, %vm643_vm8 }
  0xdc   : > { %v978_v29 = vclamps-f32 %v571_v18, 1.0  ;;  %v641_v33 = vadd.f32 %v1071_v0, %v640_v23  ;;  %v577_v26 = vadd.f32 0.00028619796, %v576_v28  ;;  %v587_v5 = vmul.f32 3.8918573e-05, %v1343_v6 }
  0xdd   : > { %v774_v16 = vadd.f32 1.0, %v976_v27  ;;  %v513_v37 = vmul.f32 %v512_v31, %v1295_v8  ;;  %v501_v45 = vadd.f32 0.05243302, %v500_v25  ;;  %v654_v46 = vmul.f32 %v1359_v22, %v1359_v22 }
  0xde   : > { %v776_v32 = vadd.f32 1.0, %v978_v29  ;;  %v645_v43 = vsel %vm644_vm11, %v1071_v0, %v641_v33  ;;  %v1073_v47 = vpop.eup %1072  ;;  %v442_v48 = vmul.f32 0.5, %v1221_v38  ;;  %v705_v53 = vadd.f32 1.1283791, %v704_v30 }
  0xdf   : > { %v782_v34 = vmul.f32 %v774_v16, %v1288_v13  ;;  %v650_v49 = vsel %vm647_vm10, %v649_v57, %v645_v43  ;;  %v514_v50 = vadd.f32 0.4994258, %v513_v37  ;;  %v588_v13 = vadd.f32 0.001143296, %v587_v5 }
  0xe0   : > { %v784_v42 = vmul.f32 %v776_v32, %v1291_v2  ;;  %v651_v51 = vmul.f32 %v650_v49, %v626_v3  ;;  %v718_v55 = vmul.f32 %v1073_v47, %v1351_v17  ;;  %v726_v56 = vand.u32 2147483647, %v1351_v17  ;;  %v411_v2 = vpop.f32.mrf.mxu3 }
  0xe1   : > { %790 = vst [vmem:[%s1367_s25] sm:$0xff] %v782_v34  ;;  %v515_v58 = vmul.f32 %v514_v50, %v1295_v8  ;;  %v578_v61 = vmul.f32 %v577_v26, %v1343_v6  ;;  %v589_v35 = vmul.f32 %v588_v13, %v1343_v6  ;;  %v1383_v62 = vmin.f32 %v654_v46, 16.0 }
  0xe2   : > { %792 = vst [vmem:[%s1367_s25 + $0x10] sm:$0xff] %v784_v42  ;;  %v980_v38 = vclamps-f32 %v651_v51, 1.0  ;;  %v719_v36 = vsub.f32 1.0, %v718_v55  ;;  %v728_v63 = vand.u32 2147483648, %v1351_v17  ;;  %v502_v0 = vmul.f32 %v501_v45, %v1295_v8 }
  0xe3   : > { %vm723_vm12 = vweird.f32 %v1073_v47  ;;  %v1387_v1 = vadd.f32 1.0, %v515_v58  ;;  %v590_v3 = vadd.f32 0.014752088, %v589_v35  ;;  %v412_v4 = vadd.f32 %v1190_v14, %v411_v2 }
  0xe4   : > { %v778_v54 = vadd.f32 1.0, %v980_v38  ;;  %v720_v7 = vmul.f32 %v1073_v47, %v719_v36  ;;  %v656_v11 = vmul.f32 2.1237322e-06, %v1383_v62  ;;  %v1013_v12 = vunpack.c.h.bf16 %v1201_v24 }
  0xe5   : > { %vm722_vm13 = vweird.f32 %v1351_v17  ;;  %1074 = vrcp.f32 %v1387_v1  ;;  %v579_v15 = vadd.f32 0.0036580483, %v578_v61  ;;  %v503_v18 = vadd.f32 0.18741608, %v502_v0 }
  0xe6   : > { %v786_v21 = vmul.f32 %v778_v54, %v442_v48  ;;  %v721_v60 = vadd.f32 %v1073_v47, %v720_v7  ;;  %v591_v44 = vmul.f32 %v590_v3, %v1343_v6  ;;  %v706_v19 = vmul.f32 %v705_v53, %v1236_v52  ;;  %vm724_vm14 = vmor %vm722_vm13, %vm723_vm12 }
  0xe7   : > { %v729_v14 = vor.u32 1.1754944e-38, %v728_v63  ;;  %v657_v20 = vadd.f32 0.00028619796, %v656_v11  ;;  %v667_v27 = vmul.f32 3.8918573e-05, %v1383_v62  ;;  %vm727_vm15 = vcmp.eq.f32.partialorder %v726_v56, 8.507059e+37 }
  0xe8   : > { %794 = vst [vmem:[%s1367_s25 + $0x20] sm:$0xff] %v786_v21  ;;  %v725_v24 = vsel %vm724_vm14, %v1073_v47, %v721_v60  ;;  %v592_v17 = vadd.f32 0.112945676, %v591_v44  ;;  %v1399_v28 = vadd.f32 %v1013_v12, %v412_v4  ;;  %v580_v23 = vmul.f32 %v579_v15, %v1343_v6 }
  0xe9   : > { %v730_v29 = vsel %vm727_vm15, %v729_v14, %v725_v24  ;;  %v668_v25 = vadd.f32 0.001143296, %v667_v27  ;;  %v504_v30 = vmul.f32 %v503_v18, %v1295_v8  ;;  %v658_v32 = vmul.f32 %v657_v20, %v1383_v62 }
  0xea   : > { %v731_v16 = vmul.f32 %v730_v29, %v706_v19  ;;  %v593_v52 = vmul.f32 %v592_v17, %v1343_v6  ;;  %v1407_v57 = vmul.f32 0.70710677, %v1399_v28  ;;  %v444_v34 = vmul.f32 0.5, %v1223_v39 }
  0xeb   : > { %v1075_v31 = vpop.eup %1074  ;;  %v669_v33 = vmul.f32 %v668_v25, %v1383_v62  ;;  %v581_v5 = vadd.f32 0.05243302, %v580_v23  ;;  %v505_v46 = vadd.f32 1.1283791, %v504_v30  ;;  %v528_v48 = vand.u32 2147483648, %v1387_v1 }
  0xec   : > { %v982_v37 = vclamps-f32 %v731_v16, 1.0  ;;  %v518_v26 = vmul.f32 %v1075_v31, %v1387_v1  ;;  %v594_v42 = vadd.f32 0.4994258, %v593_v52  ;;  %v734_v8 = vmul.f32 %v1407_v57, %v1407_v57 }
  0xed   : > { %v670_v43 = vadd.f32 0.014752088, %v669_v33  ;;  %v659_v50 = vadd.f32 0.0036580483, %v658_v32  ;;  %vm523_vm0 = vweird.f32 %v1075_v31  ;;  %v526_v55 = vand.u32 2147483647, %v1387_v1 }
  0xee   : > { %v780_v45 = vadd.f32 1.0, %v982_v37  ;;  %v519_v47 = vsub.f32 1.0, %v518_v26  ;;  %v595_v49 = vmul.f32 %v594_v42, %v1343_v6  ;;  %v1416_v13 = vmin.f32 %v734_v8, 16.0 }
  0xef   : > { %v671_v39 = vmul.f32 %v670_v43, %v1383_v62  ;;  %v582_v56 = vmul.f32 %v581_v5, %v1343_v6  ;;  %vm522_vm1 = vweird.f32 %v1387_v1  ;;  %v506_v36 = vmul.f32 %v505_v46, %v1257_v9 }
  0xf0   : > { %v788_v51 = vmul.f32 %v780_v45, %v444_v34  ;;  %v520_v53 = vmul.f32 %v1075_v31, %v519_v47  ;;  %v596_v2 = vadd.f32 1.0, %v595_v49  ;;  %v736_v61 = vmul.f32 2.1237322e-06, %v1416_v13  ;;  %vm524_vm2 = vmor %vm522_vm1, %vm523_vm0 }
  0xf1   : > { %v672_v58 = vadd.f32 0.112945676, %v671_v39  ;;  %v747_v38 = vmul.f32 3.8918573e-05, %v1416_v13  ;;  %v529_v63 = vor.u32 1.1754944e-38, %v528_v48  ;;  %v660_v0 = vmul.f32 %v659_v50, %v1383_v62 }
  0xf2   : > { %796 = vst [vmem:[%s1367_s25 + $0x30] sm:$0xff] %v788_v51  ;;  %v521_v35 = vadd.f32 %v1075_v31, %v520_v53  ;;  %1076 = vrcp.f32 %v596_v2  ;;  %vm527_vm3 = vcmp.eq.f32.partialorder %v526_v55, 8.507059e+37  ;;  %v737_v54 = vadd.f32 0.00028619796, %v736_v61 }
  0xf3   : > { %v673_v4 = vmul.f32 %v672_v58, %v1383_v62  ;;  %v583_v11 = vadd.f32 0.18741608, %v582_v56  ;;  %v748_v12 = vadd.f32 0.001143296, %v747_v38  ;;  %v661_v1 = vadd.f32 0.05243302, %v660_v0 }
  0xf4   : > { %v525_v3 = vsel %vm524_vm2, %v1075_v31, %v521_v35  ;;  %v738_v60 = vmul.f32 %v737_v54, %v1416_v13  ;;  %v439_v27 = vmul.f32 0.5, %v1246_v59  ;;  %v608_v32 = vand.u32 2147483648, %v596_v2 }
  0xf5   : > { %v530_v7 = vsel %vm527_vm3, %v529_v63, %v525_v3  ;;  %v674_v21 = vadd.f32 0.4994258, %v673_v4  ;;  %v749_v9 = vmul.f32 %v748_v12, %v1416_v13  ;;  %v584_v14 = vmul.f32 %v583_v11, %v1343_v6 }
  0xf6   : > { %v531_v15 = vmul.f32 %v530_v7, %v506_v36  ;;  %v662_v29 = vmul.f32 %v661_v1, %v1383_v62  ;;  %v739_v25 = vadd.f32 0.0036580483, %v738_v60  ;;  %v606_v6 = vand.u32 2147483647, %v596_v2 }
  0xf7   : > { %v675_v44 = vmul.f32 %v674_v21, %v1383_v62  ;;  %v750_v20 = vadd.f32 0.014752088, %v749_v9  ;;  %v585_v31 = vadd.f32 1.1283791, %v584_v14  ;;  %vm602_vm5 = vweird.f32 %v596_v2 }
  0xf8   : > { %v977_v18 = vclamps-f32 %v531_v15, 1.0  ;;  %v1077_v19 = vpop.eup %1076  ;;  %v663_v37 = vadd.f32 0.18741608, %v662_v29  ;;  %v740_v59 = vmul.f32 %v739_v25, %v1416_v13  ;;  %v609_v42 = vor.u32 1.1754944e-38, %v608_v32 }
  0xf9   : > { %v598_v17 = vmul.f32 %v1077_v19, %v596_v2  ;;  %v676_v23 = vadd.f32 1.0, %v675_v44  ;;  %v751_v16 = vmul.f32 %v750_v20, %v1416_v13  ;;  %vm603_vm4 = vweird.f32 %v1077_v19 }
  0xfa   : > { %v775_v24 = vadd.f32 1.0, %v977_v18  ;;  %vm604_vm6 = vmor %vm602_vm5, %vm603_vm4  ;;  %v586_v43 = vmul.f32 %v585_v31, %v1323_v40  ;;  %vm607_vm7 = vcmp.eq.f32.partialorder %v606_v6, 8.507059e+37  ;;  %v664_v48 = vmul.f32 %v663_v37, %v1383_v62 }
  0xfb   : > { %v599_v52 = vsub.f32 1.0, %v598_v17  ;;  %1078 = vrcp.f32 %v676_v23  ;;  %v752_v34 = vadd.f32 0.112945676, %v751_v16  ;;  %v741_v49 = vadd.f32 0.05243302, %v740_v59 }
  0xfc   : > { %v783_v30 = vmul.f32 %v775_v24, %v439_v27  ;;  %v441_v53 = vmul.f32 0.5, %v1297_v10  ;;  %v665_v2 = vadd.f32 1.1283791, %v664_v48  ;;  %v688_v58 = vand.u32 2147483648, %v676_v23 }
  0xfd   : > { %v600_v33 = vmul.f32 %v1077_v19, %v599_v52  ;;  %v753_v5 = vmul.f32 %v752_v34, %v1416_v13  ;;  %v742_v40 = vmul.f32 %v741_v49, %v1416_v13  ;;  %v686_v36 = vand.u32 2147483647, %v676_v23 }
  0xfe   : > { %791 = vst [vmem:[%s1367_s25 + $0x8] sm:$0xff] %v783_v30  ;;  %vm682_vm9 = vweird.f32 %v676_v23  ;;  %v689_v0 = vor.u32 1.1754944e-38, %v688_v58  ;;  %v666_v10 = vmul.f32 %v665_v2, %v1359_v22  ;;  %v443_v1 = vmul.f32 0.5, %v1325_v41 }
  0xff   : > { %v601_v26 = vadd.f32 %v1077_v19, %v600_v33  ;;  %v754_v45 = vadd.f32 0.4994258, %v753_v5  ;;  %v743_v3 = vadd.f32 0.18741608, %v742_v40  ;;  %vm687_vm11 = vcmp.eq.f32.partialorder %v686_v36, 8.507059e+37 }
 0x101   : > { %v605_v8 = vsel %vm604_vm6, %v1077_v19, %v601_v26  ;;  %v1079_v46 = vpop.eup %1078  ;;  %v755_v51 = vmul.f32 %v754_v45, %v1416_v13  ;;  %v744_v12 = vmul.f32 %v743_v3, %v1416_v13 }
 0x102   : > { %v610_v47 = vsel %vm607_vm7, %v609_v42, %v605_v8  ;;  %v678_v39 = vmul.f32 %v1079_v46, %v676_v23  ;;  %vm683_vm8 = vweird.f32 %v1079_v46  ;;  %v445_v23 = vmul.f32 0.5, %v1399_v28 }
 0x103   : > { %v611_v50 = vmul.f32 %v610_v47, %v586_v43  ;;  %v756_v61 = vadd.f32 1.0, %v755_v51  ;;  %vm684_vm10 = vmor %vm682_vm9, %vm683_vm8  ;;  %v745_v18 = vadd.f32 1.1283791, %v744_v12 }
 0x104   : > { %v679_v56 = vsub.f32 1.0, %v678_v39 }
 0x105   : > { %v979_v55 = vclamps-f32 %v611_v50, 1.0  ;;  %1080 = vrcp.f32 %v756_v61  ;;  %v768_v44 = vand.u32 2147483648, %v756_v61  ;;  %v766_v22 = vand.u32 2147483647, %v756_v61 }
 0x106   : > { %v680_v38 = vmul.f32 %v1079_v46, %v679_v56  ;;  %vm762_vm13 = vweird.f32 %v756_v61  ;;  %v746_v13 = vmul.f32 %v745_v18, %v1407_v57 }
 0x107   : > { %v777_v35 = vadd.f32 1.0, %v979_v55  ;;  %v769_v27 = vor.u32 1.1754944e-38, %v768_v44  ;;  %vm767_vm15 = vcmp.eq.f32.partialorder %v766_v22, 8.507059e+37 }
 0x108   : > { %v681_v63 = vadd.f32 %v1079_v46, %v680_v38 }
 0x109   : > { %v785_v62 = vmul.f32 %v777_v35, %v441_v53 }
 0x10a   : > { %v685_v4 = vsel %vm684_vm10, %v1079_v46, %v681_v63 }
 0x10b   : > { %793 = vst [vmem:[%s1367_s25 + $0x18] sm:$0xff] %v785_v62  ;;  %v690_v54 = vsel %vm687_vm11, %v689_v0, %v685_v4  ;;  %v1081_v11 = vpop.eup %1080 }
 0x10c   : > { %v691_v7 = vmul.f32 %v690_v54, %v666_v10  ;;  %v758_v21 = vmul.f32 %v1081_v11, %v756_v61  ;;  %vm763_vm12 = vweird.f32 %v1081_v11 }
 0x10d   : > { %vm764_vm14 = vmor %vm762_vm13, %vm763_vm12 }
 0x10e   : > { %v981_v15 = vclamps-f32 %v691_v7, 1.0  ;;  %v759_v9 = vsub.f32 1.0, %v758_v21 }
 0x110   : > { %v779_v60 = vadd.f32 1.0, %v981_v15  ;;  %v760_v14 = vmul.f32 %v1081_v11, %v759_v9 }
 0x112   : > { %v787_v19 = vmul.f32 %v779_v60, %v443_v1  ;;  %v761_v20 = vadd.f32 %v1081_v11, %v760_v14 }
 0x114   : > { %795 = vst [vmem:[%s1367_s25 + $0x28] sm:$0xff] %v787_v19  ;;  %v765_v24 = vsel %vm764_vm14, %v1081_v11, %v761_v20 }
 0x115   : > { %v770_v17 = vsel %vm767_vm15, %v769_v27, %v765_v24 }
 0x116   : > { %v771_v41 = vmul.f32 %v770_v17, %v746_v13 }
 0x118   : > { %v983_v29 = vclamps-f32 %v771_v41, 1.0 }
 0x11a   : > { %v781_v25 = vadd.f32 1.0, %v983_v29 }
 0x11c   : > { %v789_v16 = vmul.f32 %v781_v25, %v445_v23 }
 0x11e   : > { %797 = vst [vmem:[%s1367_s25 + $0x38] sm:$0xff] %v789_v16 }
 0x11f PF: > { %s14_s17 = sadd.s32 1, %s1104_s17   ;;  %s1468_s15 = smov %s1100_s16 }
 0x120   : > { %p11_p5 = scmp.ge.s32.totalorder %s14_s17, 4   ;;  %s1469_s16 = smov %s1471_s18 }
 0x122   :  { %13 = sbr.rel (!%p11_p5) target bundleno = 2 (0x2), region = 75 }

// kernel: bottleneck_forward.5
= control target key start
LH: loop header
LB: loop body
LE: loop exit
PB: predicated region body
PF: predicated region fallthrough
CT: control target
= control target key end

     0   :  { %s2773_s12 = smov 0   ;;  %s2775_s13 = smov 0   ;;  %s3434_s0 = inlined_call_operand.vmem [shape: bf16[2,9,9,512], index: 0, kind: input, shape index: {}]   ;;  %s3435_s1 = inlined_call_operand.vmem [shape: bf16[9,128,128], index: 1, kind: input, shape index: {}]   ;;  %s3436_s2 = inlined_call_operand.vmem [shape: f32[1,128], index: 2, kind: input, shape index: {}]   ;;  %s3437_s3 = inlined_call_operand.vmem [shape: bf16[128,128], index: 3, kind: output, shape index: {}]  }
   0x1   :  { %s2777_s14 = smov 0  }
   0x2 LB: > { %s25_s15 = sadd.s32 1, %s2747_s13  ;;  %p1994_p0 = scmp.ge.s32.totalorder %s2751_s14, 1  ;;  %s2751_s14 = sphi %s2777_s14, %s13_s14   ;;  %s2747_s13 = sphi %s2775_s13, %s3440_s13   ;;  %s2743_s12 = sphi %s2773_s12, %s3439_s12  }
   0x3   : > { %p27_p1 = scmp.ge.s32.totalorder %s25_s15, 2  ;;  %p168_p2 = scmp.lt.s32.totalorder %s2751_s14, 3 }
   0x5   : > { %s3442_s15 = smov (%p27_p1, %s25_s15), 0  ;;  %p169_p3 = pnand %p1994_p0, %p168_p2 }
   0x6   : > { %p202_p4 = scmp.lt.s32.totalorder (!%p169_p3), %s2743_s12, 1  ;;  %s1996_s6 = sshll.u32 (!%p169_p3), %s2743_s12, 3 }
   0x7   : > { %172 = sbr.rel (%p169_p3) target bundleno = 399 (0x18f), region = 32  ;;  %p3290_p5 = scmp.lt.s32.totalorder (!%p169_p3), %s1996_s6, 15 }
   0xc   : > { %v2563_v0 = vld [vmem:[%s3435_s1 + $0x38] sm:$0xff]  ;;  %v2562_v2 = vld [vmem:[%s3435_s1 + $0x30] sm:$0xff]  ;;  %v2561_v6 = vld [vmem:[%s3435_s1 + $0x28] sm:$0xff]  ;;  %s203_s30 = scalar_select %p202_p4, %s2743_s12, 1  ;;  %vm518_vm0 = vcmask 1046528  }
   0xd   : > { %v2583_v1 = vld [vmem:[%s3435_s1 + $0xb8] sm:$0xff]  ;;  %2671 = vmatpush.bf16.msra.mxu1 %v2563_v0  ;;  %311 = vmatpush.bf16.msra.mxu0 %v2563_v0  ;;  %v2582_v3 = vld [vmem:[%s3435_s1 + $0xb0] sm:$0xff]  ;;  %v2581_v7 = vld [vmem:[%s3435_s1 + $0xa8] sm:$0xff]  ;;  %s3444_s6 = smov (!%p3290_p5, %s1996_s6), 15 }
   0xe   : > { %620 = vmatpush.bf16.msra.mxu2 %v2583_v1  ;;  %v2595_v4 = vld [vmem:[%s3435_s1 + $0xf8] sm:$0xff]  ;;  %v2594_v5 = vld [vmem:[%s3435_s1 + $0xf0] sm:$0xff]  ;;  %v2593_v8 = vld [vmem:[%s3435_s1 + $0xe8] sm:$0xff]  ;;  %s2687_s10 = smul.u32 288, %s203_s30  ;;  %s1997_s12 = sshll.u32 %s3444_s6, 2 }
   0xf   : > { %742 = vmatpush.bf16.msra.mxu3 %v2595_v4  ;;  %v2560_v9 = vld [vmem:[%s3435_s1 + $0x20] sm:$0xff]  ;;  %v2559_v12 = vld [vmem:[%s3435_s1 + $0x18] sm:$0xff]  ;;  %v2558_v19 = vld [vmem:[%s3435_s1 + $0x10] sm:$0xff] }
  0x10   : > { %v2580_v10 = vld [vmem:[%s3435_s1 + $0xa0] sm:$0xff]  ;;  %s2837_s23 = scalar_lea.vmem %s3434_s0, %s2687_s10  ;;  %v2579_v13 = vld [vmem:[%s3435_s1 + $0x98] sm:$0xff]  ;;  %v2578_v20 = vld [vmem:[%s3435_s1 + $0x90] sm:$0xff]  ;;  %s3333_s10 = scalar_lea.vmem %s3437_s3, %s1997_s12 }
  0x11   : > { %2672 = vmatpush.bf16.msra.mxu1 %v2562_v2  ;;  %312 = vmatpush.bf16.msra.mxu0 %v2562_v2  ;;  %v2592_v11 = vld [vmem:[%s3435_s1 + $0xe0] sm:$0xff]  ;;  %v471_v15 = vld [vmem:[%s2837_s23 + $0x10] sm:$0x1]  ;;  %v2591_v18 = vld [vmem:[%s3435_s1 + $0xd8] sm:$0xff] }
  0x12   : > { %621 = vmatpush.bf16.msra.mxu2 %v2582_v3  ;;  %v470_v14 = vld [vmem:[%s2837_s23] sm:$0xf]  ;;  %v473_v17 = vld [vmem:[%s2837_s23 + $0x30] sm:$0x1]  ;;  %v487_v22 = vunpack.c.l.bf16 %v471_v15  ;;  %v2557_v26 = vld [vmem:[%s3435_s1 + $0x8] sm:$0xff] }
  0x13   : > { %743 = vmatpush.bf16.msra.mxu3 %v2594_v5  ;;  %v472_v16 = vld [vmem:[%s2837_s23 + $0x20] sm:$0xf]  ;;  %v486_v21 = vunpack.c.l.bf16 %v470_v14  ;;  %v489_v24 = vunpack.c.l.bf16 %v473_v17  ;;  %v2590_v25 = vld [vmem:[%s3435_s1 + $0xd0] sm:$0xff]  ;;  %v2577_v27 = vld [vmem:[%s3435_s1 + $0x88] sm:$0xff] }
  0x14   : > { %v488_v23 = vunpack.c.l.bf16 %v472_v16  ;;  %v520_v29 = vrot.slane %v487_v22, 1  ;;  %v2556_v32 = vld [vmem:[%s3435_s1] sm:$0xff]  ;;  %v2589_v34 = vld [vmem:[%s3435_s1 + $0xc8] sm:$0xff]  ;;  %v2575_v38 = vld [vmem:[%s3435_s1 + $0x78] sm:$0xff] }
  0x15   : > { %2673 = vmatpush.bf16.msra.mxu1 %v2561_v6  ;;  %313 = vmatpush.bf16.msra.mxu0 %v2561_v6  ;;  %v519_v28 = vrot.slane %v486_v21, 1  ;;  %v523_v31 = vrot.slane %v489_v24, 1  ;;  %v2008_v33 = vld [vmem:[%s2837_s23 + $0x80] sm:$0xf]  ;;  %v2607_v42 = vld [vmem:[%s3435_s1 + $0x138] sm:$0xff]  ;;  %v2574_v45 = vld [vmem:[%s3435_s1 + $0x70] sm:$0xff] }
  0x16   : > { %622 = vmatpush.bf16.msra.mxu2 %v2581_v7  ;;  %v522_v30 = vrot.slane %v488_v23, 1  ;;  %v2554_v35 = vld [vmem:[%s2837_s23 + $0x9c] sm:$0xf0]  ;;  %v2627_v43 = vld [vmem:[%s3435_s1 + $0x1b8] sm:$0xff]  ;;  %v2606_v48 = vld [vmem:[%s3435_s1 + $0x130] sm:$0xff] }
  0x17   : > { %744 = vmatpush.bf16.msra.mxu3 %v2593_v8  ;;  %v2000_v36 = vld [vmem:[%s2837_s23] sm:$0xf]  ;;  %v521_v40 = vsel %vm518_vm0, %v519_v28, %v520_v29  ;;  %v2009_v44 = vor.u32 %v2554_v35, %v2008_v33  ;;  %v2160_v50 = vld [vmem:[%s2837_s23 + $0x8] sm:$0xf]  ;;  %v475_v53 = vld [vmem:[%s2837_s23 + $0x50] sm:$0x1] }
  0x18   : > { %v2552_v37 = vld [vmem:[%s2837_s23 + $0x1c] sm:$0xf0]  ;;  %v524_v41 = vsel %vm518_vm0, %v522_v30, %v523_v31  ;;  %v2584_v51 = vld [vmem:[%s2837_s23 + $0x24] sm:$0xf0]  ;;  %v2639_v54 = vld [vmem:[%s3435_s1 + $0x1f8] sm:$0xff]  ;;  %v491_v61 = vunpack.c.l.bf16 %v475_v53 }
  0x19   : > { %2674 = vmatpush.bf16.msra.mxu1 %v2560_v9  ;;  %314 = vmatpush.bf16.msra.mxu0 %v2560_v9  ;;  %v2576_v39 = vld [vmem:[%s3435_s1 + $0x80] sm:$0xff]  ;;  %v2001_v46 = vor.u32 %v2552_v37, %v2000_v36  ;;  %v551_v47 = vpack.c.bf16 %v524_v41, %v521_v40  ;;  %v477_v56 = vld [vmem:[%s2837_s23 + $0x70] sm:$0x1]  ;;  %v2161_v58 = vor.u32 %v2584_v51, %v2160_v50  ;;  %v2573_v59 = vld [vmem:[%s3435_s1 + $0x68] sm:$0xff] }
  0x1a   : > { %623 = vmatpush.bf16.msra.mxu2 %v2580_v10  ;;  %v2588_v49 = vld [vmem:[%s3435_s1 + $0xc0] sm:$0xff]  ;;  %v2626_v57 = vld [vmem:[%s3435_s1 + $0x1b0] sm:$0xff]  ;;  %v493_v63 = vunpack.c.l.bf16 %v477_v56  ;;  %v2605_v1 = vld [vmem:[%s3435_s1 + $0x128] sm:$0xff]  ;;  %v526_v5 = vrot.slane %v491_v61, 1 }
  0x1b   : > { %745 = vmatpush.bf16.msra.mxu3 %v2592_v11  ;;  %v474_v52 = vld [vmem:[%s2837_s23 + $0x40] sm:$0xf]  ;;  %v2638_v0 = vld [vmem:[%s3435_s1 + $0x1f0] sm:$0xff]  ;;  %v2625_v2 = vld [vmem:[%s3435_s1 + $0x1a8] sm:$0xff] }
  0x1c   : > { %v476_v55 = vld [vmem:[%s2837_s23 + $0x60] sm:$0xf]  ;;  %v490_v60 = vunpack.c.l.bf16 %v474_v52  ;;  %v529_v7 = vrot.slane %v493_v63, 1  ;;  %v2637_v8 = vld [vmem:[%s3435_s1 + $0x1e8] sm:$0xff]  ;;  %v2571_v15 = vld [vmem:[%s3435_s1 + $0x58] sm:$0xff] }
  0x1d   : > { %2675 = vmatpush.bf16.msra.mxu1 %v2559_v12  ;;  %315 = vmatpush.bf16.msra.mxu0 %v2559_v12  ;;  %v492_v62 = vunpack.c.l.bf16 %v476_v55  ;;  %v2572_v3 = vld [vmem:[%s3435_s1 + $0x60] sm:$0xff]  ;;  %v2164_v22 = vld [vmem:[%s2837_s23 + $0x48] sm:$0xf]  ;;  %v2570_v24 = vld [vmem:[%s3435_s1 + $0x50] sm:$0xff] }
  0x1e   : > { %624 = vmatpush.bf16.msra.mxu2 %v2579_v13  ;;  %v525_v4 = vrot.slane %v490_v60, 1  ;;  %v2604_v9 = vld [vmem:[%s3435_s1 + $0x120] sm:$0xff]  ;;  %v2585_v23 = vld [vmem:[%s2837_s23 + $0x64] sm:$0xf0]  ;;  %v481_v29 = vld [vmem:[%s2837_s23 + $0xb0] sm:$0x1] }
  0x1f   : > { %746 = vmatpush.bf16.msra.mxu3 %v2591_v18  ;;  %v528_v6 = vrot.slane %v492_v62, 1  ;;  %v2624_v10 = vld [vmem:[%s3435_s1 + $0x1a0] sm:$0xff]  ;;  %v2603_v18 = vld [vmem:[%s3435_s1 + $0x118] sm:$0xff]  ;;  %v2165_v30 = vor.u32 %v2585_v23, %v2164_v22  ;;  %v497_v36 = vunpack.c.l.bf16 %v481_v29  ;;  %v2224_v51 = vld [vmem:[%s2837_s23 + $0xc] sm:$0xf] }
  0x20   : > { %v2012_v11 = vld [vmem:[%s2837_s23 + $0xc0] sm:$0xf]  ;;  %v527_v16 = vsel %vm518_vm0, %v525_v4, %v526_v5  ;;  %v2623_v31 = vld [vmem:[%s3435_s1 + $0x198] sm:$0xff]  ;;  %v2564_v50 = vld [vmem:[%s2837_s23 + $0x20] sm:$0xf0] }
  0x21   : > { %2676 = vmatpush.bf16.msra.mxu1 %v2558_v19  ;;  %316 = vmatpush.bf16.msra.mxu0 %v2558_v19  ;;  %v2555_v12 = vld [vmem:[%s2837_s23 + $0xdc] sm:$0xf0]  ;;  %v530_v17 = vsel %vm518_vm0, %v528_v6, %v529_v7  ;;  %v2635_v40 = vld [vmem:[%s3435_s1 + $0x1d8] sm:$0xff]  ;;  %v2596_v52 = vld [vmem:[%s2837_s23 + $0x28] sm:$0xf0] }
  0x22   : > { %625 = vmatpush.bf16.msra.mxu2 %v2578_v20  ;;  %v2004_v13 = vld [vmem:[%s2837_s23 + $0x40] sm:$0xf]  ;;  %v2013_v19 = vor.u32 %v2555_v12, %v2012_v11  ;;  %v552_v21 = vpack.c.bf16 %v530_v17, %v527_v16  ;;  %v2614_v55 = vld [vmem:[%s3435_s1 + $0x170] sm:$0xff]  ;;  %v2586_v60 = vld [vmem:[%s2837_s23 + $0xa4] sm:$0xf0] }
  0x23   : > { %747 = vmatpush.bf16.msra.mxu3 %v2590_v25  ;;  %v2553_v14 = vld [vmem:[%s2837_s23 + $0x5c] sm:$0xf0]  ;;  %v2602_v25 = vld [vmem:[%s3435_s1 + $0x110] sm:$0xff]  ;;  %v2613_v62 = vld [vmem:[%s3435_s1 + $0x168] sm:$0xff] }
  0x24   : > { %v2005_v20 = vor.u32 %v2553_v14, %v2004_v13  ;;  %v480_v28 = vld [vmem:[%s2837_s23 + $0xa0] sm:$0xf]  ;;  %v2646_v61 = vld [vmem:[%s3435_s1 + $0x230] sm:$0xff]  ;;  %v2645_v11 = vld [vmem:[%s3435_s1 + $0x228] sm:$0xff] }
  0x25   : > { %2677 = vmatpush.bf16.msra.mxu1 %v2557_v26  ;;  %317 = vmatpush.bf16.msra.mxu0 %v2557_v26  ;;  %v478_v26 = vld [vmem:[%s2837_s23 + $0x80] sm:$0xf]  ;;  %v496_v35 = vunpack.c.l.bf16 %v480_v28  ;;  %v2633_v13 = vld [vmem:[%s3435_s1 + $0x1c8] sm:$0xff] }
  0x26   : > { %626 = vmatpush.bf16.msra.mxu2 %v2577_v27  ;;  %v479_v27 = vld [vmem:[%s2837_s23 + $0x90] sm:$0x1]  ;;  %v494_v33 = vunpack.c.l.bf16 %v478_v26  ;;  %v2636_v37 = vld [vmem:[%s3435_s1 + $0x1e0] sm:$0xff]  ;;  %v2228_v22 = vld [vmem:[%s2837_s23 + $0x4c] sm:$0xf] }
  0x27   : > { %748 = vmatpush.bf16.msra.mxu3 %v2589_v34  ;;  %v495_v34 = vunpack.c.l.bf16 %v479_v27  ;;  %v2568_v41 = vld [vmem:[%s3435_s1 + $0x40] sm:$0xff]  ;;  %v2597_v23 = vld [vmem:[%s2837_s23 + $0x68] sm:$0xf0]  ;;  %v2610_v26 = vld [vmem:[%s3435_s1 + $0x150] sm:$0xff] }
  0x28   : > { %v482_v63 = vld [vmem:[%s2837_s23 + $0xc0] sm:$0xf]  ;;  %v2229_v28 = vor.u32 %v2597_v23, %v2228_v22 }
  0x29   : > { %2678 = vmatpush.bf16.msra.mxu1 %v2556_v32  ;;  %318 = vmatpush.bf16.msra.mxu0 %v2556_v32  ;;  %v2569_v32 = vld [vmem:[%s3435_s1 + $0x48] sm:$0xff]  ;;  %v498_v5 = vunpack.c.l.bf16 %v482_v63  ;;  %v2612_v12 = vld [vmem:[%s3435_s1 + $0x160] sm:$0xff]  ;;  %v904_v63 = vld [vmem:[%s2837_s23 + $0x38] sm:$0x1] }
  0x2a   : > { %627 = vmatpush.bf16.msra.mxu2 %v2576_v39  ;;  %v2622_v39 = vld [vmem:[%s3435_s1 + $0x190] sm:$0xff]  ;;  %v2644_v14 = vld [vmem:[%s3435_s1 + $0x220] sm:$0xff] }
  0x2b   : > { %749 = vmatpush.bf16.msra.mxu3 %v2588_v49  ;;  %v2647_v49 = vld [vmem:[%s3435_s1 + $0x238] sm:$0xff] }
  0x2c   : > { %329 = vmatmul.bf16.vlgmr.msra.gmra.mxu1 %v2009_v44  ;;  %319 = vmatmul.bf16.vlgmr.msra.gmra.mxu0 %v2001_v46  ;;  %v534_v44 = vrot.slane %v496_v35, 1  ;;  %v2615_v46 = vld [vmem:[%s3435_s1 + $0x178] sm:$0xff] }
  0x2d   : > { %433 = vmatpush.bf16.msrb.mxu1 %v2575_v38  ;;  %864 = vmatpush.bf16.msrb.mxu0 %v2607_v42  ;;  %v2601_v38 = vld [vmem:[%s3435_s1 + $0x108] sm:$0xff]  ;;  %v531_v42 = vrot.slane %v494_v33, 1  ;;  %v2643_v35 = vld [vmem:[%s3435_s1 + $0x218] sm:$0xff] }
  0x2e   : > { %1173 = vmatpush.bf16.msrb.mxu2 %v2627_v43  ;;  %750 = vmatmul.bf16.vlgmr.msra.gmra.mxu3 %v2161_v58  ;;  %v532_v43 = vrot.slane %v495_v34, 1  ;;  %v2609_v33 = vld [vmem:[%s3435_s1 + $0x148] sm:$0xff]  ;;  %v2632_v34 = vld [vmem:[%s3435_s1 + $0x1c0] sm:$0xff] }
  0x2f   : > { %628 = vmatmul.bf16.vlgmr.msra.gmra.mxu2 %v551_v47  ;;  %1295 = vmatpush.bf16.msrb.mxu3 %v2639_v54  ;;  %v2600_v47 = vld [vmem:[%s3435_s1 + $0x100] sm:$0xff] }
  0x30   : > { %v533_v53 = vsel %vm518_vm0, %v531_v42, %v532_v43  ;;  %v2598_v42 = vld [vmem:[%s2837_s23 + $0xa8] sm:$0xf0]  ;;  %v2344_v43 = vld [vmem:[%s2837_s23 + $0x20] sm:$0xf] }
  0x31   : > { %434 = vmatpush.bf16.msrb.mxu1 %v2574_v45  ;;  %865 = vmatpush.bf16.msrb.mxu0 %v2606_v48  ;;  %v535_v45 = vrot.slane %v497_v36, 1  ;;  %v2048_v48 = vld [vmem:[%s2837_s23 + $0x4] sm:$0xf] }
  0x32   : > { %1174 = vmatpush.bf16.msrb.mxu2 %v2626_v57  ;;  %v2049_v56 = vor.u32 %v2564_v50, %v2048_v48  ;;  %v2225_v57 = vor.u32 %v2596_v52, %v2224_v51  ;;  %v2608_v36 = vld [vmem:[%s3435_s1 + $0x140] sm:$0xff] }
  0x33   : > { %1296 = vmatpush.bf16.msrb.mxu3 %v2638_v0  ;;  %v536_v54 = vsel %vm518_vm0, %v534_v44, %v535_v45  ;;  %v483_v0 = vld [vmem:[%s2837_s23 + $0xd0] sm:$0x1]  ;;  %v2616_v44 = vld [vmem:[%s2837_s23 + $0x3c] sm:$0xf0]  ;;  %v2416_v48 = vld [vmem:[%s2837_s23 + $0x24] sm:$0xf] }
  0x34   : > { %v553_v58 = vpack.c.bf16 %v536_v54, %v533_v53  ;;  %v499_v6 = vunpack.c.l.bf16 %v483_v0  ;;  %v2640_v51 = vld [vmem:[%s3435_s1 + $0x200] sm:$0xff]  ;;  %v2236_v54 = vld [vmem:[%s2837_s23 + $0xcc] sm:$0xf] }
  0x35   : > { %435 = vmatpush.bf16.msrb.mxu1 %v2573_v59  ;;  %866 = vmatpush.bf16.msrb.mxu0 %v2605_v1  ;;  %v2168_v59 = vld [vmem:[%s2837_s23 + $0x88] sm:$0xf]  ;;  %v484_v1 = vld [vmem:[%s2837_s23 + $0xe0] sm:$0xf]  ;;  %v2060_v52 = vld [vmem:[%s2837_s23 + $0xc4] sm:$0xf] }
  0x36   : > { %1175 = vmatpush.bf16.msrb.mxu2 %v2625_v2  ;;  %v485_v2 = vld [vmem:[%s2837_s23 + $0xf0] sm:$0x1]  ;;  %v2169_v4 = vor.u32 %v2586_v60, %v2168_v59  ;;  %v500_v7 = vunpack.c.l.bf16 %v484_v1  ;;  %v538_v16 = vrot.slane %v499_v6, 1  ;;  %v2567_v53 = vld [vmem:[%s2837_s23 + $0xe0] sm:$0xf0] }
  0x37   : > { %1297 = vmatpush.bf16.msrb.mxu3 %v2637_v8  ;;  %v501_v8 = vunpack.c.l.bf16 %v485_v2  ;;  %v2061_v59 = vor.u32 %v2567_v53, %v2060_v52  ;;  %v2420_v1 = vld [vmem:[%s2837_s23 + $0x64] sm:$0xf]  ;;  %v2481_v6 = vld [vmem:[%s2837_s23 + $0x50] sm:$0x1] }
  0x38   : > { %v540_v17 = vrot.slane %v500_v7, 1  ;;  %v2629_v2 = vld [vmem:[%s2837_s23 + $0x80] sm:$0xf0] }
  0x39   : > { %436 = vmatpush.bf16.msrb.mxu1 %v2572_v3  ;;  %867 = vmatpush.bf16.msrb.mxu0 %v2604_v9  ;;  %v2621_v3 = vld [vmem:[%s3435_s1 + $0x188] sm:$0xff]  ;;  %v2620_v9 = vld [vmem:[%s3435_s1 + $0x180] sm:$0xff] }
  0x3a   : > { %1176 = vmatpush.bf16.msrb.mxu2 %v2624_v10  ;;  %v2634_v10 = vld [vmem:[%s3435_s1 + $0x1d0] sm:$0xff] }
  0x3b   : > { %1298 = vmatpush.bf16.msrb.mxu3 %v2636_v37  ;;  %v2642_v37 = vld [vmem:[%s3435_s1 + $0x210] sm:$0xff] }
  0x3c   : > { %334 = vmatmul.bf16.gmra.mxu1 %v2013_v19  ;;  %324 = vmatmul.bf16.gmra.mxu0 %v2005_v20  ;;  %v2611_v19 = vld [vmem:[%s3435_s1 + $0x158] sm:$0xff]  ;;  %v2052_v20 = vld [vmem:[%s2837_s23 + $0x44] sm:$0xf] }
  0x3d   : > { %437 = vmatpush.bf16.msrb.mxu1 %v2571_v15  ;;  %868 = vmatpush.bf16.msrb.mxu0 %v2603_v18  ;;  %v537_v15 = vrot.slane %v498_v5, 1  ;;  %v541_v18 = vrot.slane %v501_v8, 1  ;;  %v2480_v5 = vld [vmem:[%s2837_s23 + $0x40] sm:$0xf] }
  0x3e   : > { %1177 = vmatpush.bf16.msrb.mxu2 %v2623_v31  ;;  %755 = vmatmul.bf16.gmra.mxu3 %v2165_v30  ;;  %v2172_v30 = vld [vmem:[%s2837_s23 + $0xc8] sm:$0xf] }
  0x3f   : > { %633 = vmatmul.bf16.gmra.mxu2 %v552_v21  ;;  %1299 = vmatpush.bf16.msrb.mxu3 %v2635_v40  ;;  %v2565_v21 = vld [vmem:[%s2837_s23 + $0x60] sm:$0xf0]  ;;  %v2587_v31 = vld [vmem:[%s2837_s23 + $0xe4] sm:$0xf0] }
  0x40   : > { %v2053_v27 = vor.u32 %v2565_v21, %v2052_v20  ;;  %v2566_v40 = vld [vmem:[%s2837_s23 + $0xa0] sm:$0xf0] }
  0x41   : > { %438 = vmatpush.bf16.msrb.mxu1 %v2570_v24  ;;  %869 = vmatpush.bf16.msrb.mxu0 %v2602_v25  ;;  %v539_v24 = vsel %vm518_vm0, %v537_v15, %v538_v16  ;;  %v542_v25 = vsel %vm518_vm0, %v540_v17, %v541_v18  ;;  %v1351_v15 = vunpack.c.l.bf16 %v2481_v6  ;;  %v911_v6 = vld [vmem:[%s2837_s23 + $0xa8] sm:$0xf] }
  0x42   : > { %1178 = vmatpush.bf16.msrb.mxu2 %v2622_v39  ;;  %v554_v29 = vpack.c.bf16 %v542_v25, %v539_v24  ;;  %v2641_v39 = vld [vmem:[%s3435_s1 + $0x208] sm:$0xff] }
  0x43   : > { %1300 = vmatpush.bf16.msrb.mxu3 %v2634_v10  ;;  %v920_v10 = vunpack.c.l.bf16 %v904_v63  ;;  %v1384_v23 = vrot.slane %v1351_v15, 1  ;;  %v2490_v15 = vld [vmem:[%s2837_s23 + $0xe0] sm:$0xf] }
  0x45   : > { %439 = vmatpush.bf16.msrb.mxu1 %v2569_v32  ;;  %870 = vmatpush.bf16.msrb.mxu0 %v2601_v38  ;;  %v2173_v32 = vor.u32 %v2587_v31, %v2172_v30  ;;  %v2056_v38 = vld [vmem:[%s2837_s23 + $0x84] sm:$0xf]  ;;  %v905_v30 = vld [vmem:[%s2837_s23 + $0x48] sm:$0xf] }
  0x46   : > { %1179 = vmatpush.bf16.msrb.mxu2 %v2621_v3  ;;  %v2057_v45 = vor.u32 %v2566_v40, %v2056_v38  ;;  %v2478_v3 = vld [vmem:[%s2837_s23 + $0x20] sm:$0xf]  ;;  %v2630_v38 = vld [vmem:[%s2837_s23 + $0xc0] sm:$0xf0]  ;;  %v2483_v40 = vld [vmem:[%s2837_s23 + $0x70] sm:$0x1] }
  0x47   : > { %1301 = vmatpush.bf16.msrb.mxu3 %v2633_v13 }
  0x49   : > { %440 = vmatpush.bf16.msrb.mxu1 %v2568_v41  ;;  %871 = vmatpush.bf16.msrb.mxu0 %v2600_v47  ;;  %v2232_v41 = vld [vmem:[%s2837_s23 + $0x8c] sm:$0xf]  ;;  %v2345_v47 = vor.u32 %v2616_v44, %v2344_v43  ;;  %v921_v43 = vunpack.c.l.bf16 %v905_v30 }
  0x4a   : > { %1180 = vmatpush.bf16.msrb.mxu2 %v2620_v9 }
  0x4b   : > { %1302 = vmatpush.bf16.msrb.mxu3 %v2632_v34  ;;  %v907_v34 = vld [vmem:[%s2837_s23 + $0x68] sm:$0xf]  ;;  %v955_v52 = vrot.slane %v921_v43, 1 }
  0x4c   : > { %441 = vmatmul.bf16.vlgmr.msrb.gmra.mxu1 %v2049_v56  ;;  %872 = vmatmul.bf16.vlgmr.msrb.gmra.mxu0 %v2225_v57  ;;  %v2348_v56 = vld [vmem:[%s2837_s23 + $0x60] sm:$0xf] }
  0x4d   : > { %1050 = vmatpush.bf16.msra.mxu1 %v2615_v46  ;;  %1481 = vmatpush.bf16.msra.mxu0 %v2647_v49  ;;  %v2233_v46 = vor.u32 %v2598_v42, %v2232_v41  ;;  %v2617_v57 = vld [vmem:[%s2837_s23 + $0x7c] sm:$0xf0]  ;;  %v2485_v42 = vld [vmem:[%s2837_s23 + $0x90] sm:$0x1] }
  0x4e   : > { %760 = vmatmul.bf16.gmra.mxu3 %v2169_v4  ;;  %2679 = vmatpush.bf16.msra.mxu2 %v2647_v49  ;;  %v2628_v49 = vld [vmem:[%s2837_s23 + $0x40] sm:$0xf0]  ;;  %v2349_v0 = vor.u32 %v2617_v57, %v2348_v56  ;;  %v2479_v4 = vld [vmem:[%s2837_s23 + $0x30] sm:$0x1]  ;;  %v2484_v41 = vld [vmem:[%s2837_s23 + $0x80] sm:$0xf] }
  0x4f   : > { %638 = vmatmul.bf16.gmra.mxu2 %v553_v58  ;;  %v2417_v50 = vor.u32 %v2628_v49, %v2416_v48  ;;  %v901_v58 = vld [vmem:[%s2837_s23 + $0x8] sm:$0xf]  ;;  %v1349_v13 = vunpack.c.l.bf16 %v2479_v4  ;;  %v1353_v49 = vunpack.c.l.bf16 %v2483_v40 }
  0x50   : > { %v917_v7 = vunpack.c.l.bf16 %v901_v58 }
  0x51   : > { %1051 = vmatpush.bf16.msra.mxu1 %v2614_v55  ;;  %1482 = vmatpush.bf16.msra.mxu0 %v2646_v61  ;;  %v2599_v55 = vld [vmem:[%s2837_s23 + $0xe8] sm:$0xf0]  ;;  %v1381_v21 = vrot.slane %v1349_v13, 1  ;;  %v1387_v57 = vrot.slane %v1353_v49, 1  ;;  %v2488_v13 = vld [vmem:[%s2837_s23 + $0xc0] sm:$0xf] }
  0x52   : > { %2680 = vmatpush.bf16.msra.mxu2 %v2646_v61  ;;  %v2237_v60 = vor.u32 %v2599_v55, %v2236_v54  ;;  %v902_v61 = vld [vmem:[%s2837_s23 + $0x18] sm:$0x1]  ;;  %v949_v16 = vrot.slane %v917_v7, 1 }
  0x53   : > { %v918_v8 = vunpack.c.l.bf16 %v902_v61  ;;  %v912_v7 = vld [vmem:[%s2837_s23 + $0xb8] sm:$0x1] }
  0x55   : > { %1052 = vmatpush.bf16.msra.mxu1 %v2613_v62  ;;  %1483 = vmatpush.bf16.msra.mxu0 %v2645_v11  ;;  %v903_v62 = vld [vmem:[%s2837_s23 + $0x28] sm:$0xf]  ;;  %v950_v17 = vrot.slane %v918_v8, 1  ;;  %v2486_v8 = vld [vmem:[%s2837_s23 + $0xa0] sm:$0xf] }
  0x56   : > { %2681 = vmatpush.bf16.msra.mxu2 %v2645_v11  ;;  %v919_v9 = vunpack.c.l.bf16 %v903_v62  ;;  %v2421_v11 = vor.u32 %v2629_v2, %v2420_v1  ;;  %v2619_v1 = vld [vmem:[%s2837_s23 + $0xfc] sm:$0xf0]  ;;  %v909_v2 = vld [vmem:[%s2837_s23 + $0x88] sm:$0xf] }
  0x57   : > { %v951_v24 = vsel %vm518_vm0, %v949_v16, %v950_v17  ;;  %v925_v16 = vunpack.c.l.bf16 %v909_v2  ;;  %v2491_v17 = vld [vmem:[%s2837_s23 + $0xf0] sm:$0x1] }
  0x58   : > { %v952_v18 = vrot.slane %v919_v9, 1 }
  0x59   : > { %1053 = vmatpush.bf16.msra.mxu1 %v2612_v12  ;;  %1484 = vmatpush.bf16.msra.mxu0 %v2644_v14  ;;  %v1348_v12 = vunpack.c.l.bf16 %v2478_v3  ;;  %v910_v3 = vld [vmem:[%s2837_s23 + $0x98] sm:$0x1] }
  0x5a   : > { %2682 = vmatpush.bf16.msra.mxu2 %v2644_v14  ;;  %v1350_v14 = vunpack.c.l.bf16 %v2480_v5 }
  0x5b   : > { %v1380_v20 = vrot.slane %v1348_v12, 1  ;;  %v2487_v12 = vld [vmem:[%s2837_s23 + $0xb0] sm:$0x1] }
  0x5c   : > { %446 = vmatmul.bf16.gmra.mxu1 %v2053_v27  ;;  %877 = vmatmul.bf16.gmra.mxu0 %v2229_v28  ;;  %v1383_v22 = vrot.slane %v1350_v14, 1  ;;  %v2352_v28 = vld [vmem:[%s2837_s23 + $0xa0] sm:$0xf]  ;;  %v2489_v14 = vld [vmem:[%s2837_s23 + $0xd0] sm:$0x1] }
  0x5d   : > { %1054 = vmatpush.bf16.msra.mxu1 %v2611_v19  ;;  %1485 = vmatpush.bf16.msra.mxu0 %v2643_v35  ;;  %v953_v19 = vrot.slane %v920_v10, 1  ;;  %v2428_v10 = vld [vmem:[%s2837_s23 + $0xe4] sm:$0xf] }
  0x5e   : > { %765 = vmatmul.bf16.gmra.mxu3 %v2173_v32  ;;  %2683 = vmatpush.bf16.msra.mxu2 %v2643_v35  ;;  %v1385_v27 = vsel %vm518_vm0, %v1383_v22, %v1384_v23  ;;  %v908_v35 = vld [vmem:[%s2837_s23 + $0x78] sm:$0x1]  ;;  %v928_v22 = vunpack.c.l.bf16 %v912_v7 }
  0x5f   : > { %643 = vmatmul.bf16.gmra.mxu2 %v554_v29  ;;  %v954_v25 = vsel %vm518_vm0, %v952_v18, %v953_v19  ;;  %v2618_v29 = vld [vmem:[%s2837_s23 + $0xbc] sm:$0xf0]  ;;  %v2493_v19 = vld [vmem:[%s2837_s23 + $0x110] sm:$0x1] }
  0x60   : > { %v981_v31 = vpack.c.bf16 %v954_v25, %v951_v24  ;;  %v2492_v18 = vld [vmem:[%s2837_s23 + $0x100] sm:$0xf]  ;;  %v1356_v24 = vunpack.c.l.bf16 %v2486_v8  ;;  %v1357_v25 = vunpack.c.l.bf16 %v2487_v12 }
  0x61   : > { %1055 = vmatpush.bf16.msra.mxu1 %v2610_v26  ;;  %1486 = vmatpush.bf16.msra.mxu0 %v2642_v37  ;;  %v1382_v26 = vsel %vm518_vm0, %v1380_v20, %v1381_v21  ;;  %v926_v20 = vunpack.c.l.bf16 %v910_v3  ;;  %v927_v21 = vunpack.c.l.bf16 %v911_v6  ;;  %v1362_v30 = vunpack.c.l.bf16 %v2492_v18 }
  0x62   : > { %2684 = vmatpush.bf16.msra.mxu2 %v2642_v37  ;;  %v1412_v32 = vpack.c.bf16 %v1385_v27, %v1382_v26  ;;  %v2424_v37 = vld [vmem:[%s2837_s23 + $0xa4] sm:$0xf]  ;;  %v1358_v26 = vunpack.c.l.bf16 %v2488_v13  ;;  %v1359_v27 = vunpack.c.l.bf16 %v2489_v14 }
  0x65   : > { %1056 = vmatpush.bf16.msra.mxu1 %v2609_v33  ;;  %1487 = vmatpush.bf16.msra.mxu0 %v2641_v39  ;;  %v906_v33 = vld [vmem:[%s2837_s23 + $0x58] sm:$0x1] }
  0x66   : > { %2685 = vmatpush.bf16.msra.mxu2 %v2641_v39  ;;  %v2482_v39 = vld [vmem:[%s2837_s23 + $0x60] sm:$0xf]  ;;  %v922_v44 = vunpack.c.l.bf16 %v906_v33  ;;  %v962_v33 = vrot.slane %v926_v20, 1 }
  0x67   : > { %v1352_v48 = vunpack.c.l.bf16 %v2482_v39  ;;  %v1396_v39 = vrot.slane %v1359_v27, 1 }
  0x68   : > { %v956_v53 = vrot.slane %v922_v44, 1 }
  0x69   : > { %1057 = vmatpush.bf16.msra.mxu1 %v2608_v36  ;;  %1488 = vmatpush.bf16.msra.mxu0 %v2640_v51  ;;  %v2353_v36 = vor.u32 %v2618_v29, %v2352_v28  ;;  %v1386_v56 = vrot.slane %v1352_v48, 1  ;;  %v1360_v28 = vunpack.c.l.bf16 %v2490_v15  ;;  %v1361_v29 = vunpack.c.l.bf16 %v2491_v17 }
  0x6a   : > { %2686 = vmatpush.bf16.msra.mxu2 %v2640_v51  ;;  %v1355_v51 = vunpack.c.l.bf16 %v2485_v42  ;;  %v1401_v42 = vrot.slane %v1362_v30, 1 }
  0x6b   : > { %v1388_v62 = vsel %vm518_vm0, %v1386_v56, %v1387_v57  ;;  %v1398_v40 = vrot.slane %v1360_v28, 1  ;;  %v914_v56 = vld [vmem:[%s2837_s23 + $0xd8] sm:$0x1]  ;;  %v915_v57 = vld [vmem:[%s2837_s23 + $0xe8] sm:$0xf] }
  0x6c   : > { %451 = vmatmul.bf16.gmra.mxu1 %v2057_v45  ;;  %882 = vmatmul.bf16.gmra.mxu0 %v2233_v46  ;;  %v923_v45 = vunpack.c.l.bf16 %v907_v34  ;;  %v924_v46 = vunpack.c.l.bf16 %v908_v35  ;;  %v964_v34 = vrot.slane %v927_v21, 1  ;;  %v965_v35 = vrot.slane %v928_v22, 1 }
  0x6e   : > { %1303 = vmatmul.bf16.vlgmr.msrb.gmra.mxu3 %v2417_v50  ;;  %v1354_v50 = vunpack.c.l.bf16 %v2484_v41  ;;  %v958_v54 = vrot.slane %v923_v45, 1  ;;  %v959_v55 = vrot.slane %v924_v46, 1  ;;  %v1399_v41 = vrot.slane %v1361_v29, 1 }
  0x6f   : > { %1181 = vmatmul.bf16.vlgmr.msrb.gmra.mxu2 %v2345_v47  ;;  %v2425_v47 = vor.u32 %v2630_v38, %v2424_v37  ;;  %v1393_v37 = vrot.slane %v1357_v25, 1  ;;  %v1395_v38 = vrot.slane %v1358_v26, 1  ;;  %v966_v45 = vsel %vm518_vm0, %v964_v34, %v965_v35 }
  0x70   : > { %v1389_v58 = vrot.slane %v1354_v50, 1  ;;  %v960_v61 = vsel %vm518_vm0, %v958_v54, %v959_v55  ;;  %v1400_v48 = vsel %vm518_vm0, %v1398_v40, %v1399_v41  ;;  %v913_v55 = vld [vmem:[%s2837_s23 + $0xc8] sm:$0xf] }
  0x7c   : > { %456 = vmatmul.bf16.gmra.mxu1 %v2061_v59  ;;  %887 = vmatmul.bf16.gmra.mxu0 %v2237_v60  ;;  %v1390_v59 = vrot.slane %v1355_v51, 1  ;;  %v957_v60 = vsel %vm518_vm0, %v955_v52, %v956_v53 }
  0x7d   : > { %v982_v4 = vpack.c.bf16 %v960_v61, %v957_v60  ;;  %v930_v60 = vunpack.c.l.bf16 %v914_v56  ;;  %v931_v61 = vunpack.c.l.bf16 %v915_v57 }
  0x7e   : > { %1308 = vmatmul.bf16.gmra.mxu3 %v2421_v11  ;;  %v1391_v63 = vsel %vm518_vm0, %v1389_v58, %v1390_v59  ;;  %v2631_v11 = vld [vmem:[%s2837_s23 + $0x100] sm:$0xf0]  ;;  %v916_v58 = vld [vmem:[%s2837_s23 + $0xf8] sm:$0x1]  ;;  %v929_v59 = vunpack.c.l.bf16 %v913_v55 }
  0x7f   : > { %1186 = vmatmul.bf16.gmra.mxu2 %v2349_v0  ;;  %v2356_v0 = vld [vmem:[%s2837_s23 + $0xe0] sm:$0xf]  ;;  %v1413_v5 = vpack.c.bf16 %v1391_v63, %v1388_v62  ;;  %v2429_v23 = vor.u32 %v2631_v11, %v2428_v10  ;;  %v932_v62 = vunpack.c.l.bf16 %v916_v58  ;;  %v968_v3 = vrot.slane %v930_v60, 1 }
  0x80   : > { %v2357_v9 = vor.u32 %v2619_v1, %v2356_v0  ;;  %v967_v2 = vrot.slane %v929_v59, 1 }
  0x82   : > { %v969_v6 = vsel %vm518_vm0, %v967_v2, %v968_v3 }
  0x8c   : > { %1058 = vmatmul.bf16.vlgmr.msra.gmra.mxu1 %v981_v31  ;;  %1489 = vmatmul.bf16.vlgmr.msra.gmra.mxu0 %v1412_v32  ;;  %v1363_v31 = vunpack.c.l.bf16 %v2493_v19  ;;  %v961_v32 = vrot.slane %v925_v16, 1 }
  0x8e   : > { %1313 = vmatmul.bf16.gmra.mxu3 %v2425_v47  ;;  %v1402_v43 = vrot.slane %v1363_v31, 1  ;;  %v963_v44 = vsel %vm518_vm0, %v961_v32, %v962_v33  ;;  %v1397_v47 = vsel %vm518_vm0, %v1395_v38, %v1396_v39 }
  0x8f   : > { %1191 = vmatmul.bf16.gmra.mxu2 %v2353_v36  ;;  %v1392_v36 = vrot.slane %v1356_v24, 1  ;;  %v983_v50 = vpack.c.bf16 %v966_v45, %v963_v44 }
  0x90   : > { %v1403_v49 = vsel %vm518_vm0, %v1401_v42, %v1402_v43 }
  0x91   : > { %v1394_v46 = vsel %vm518_vm0, %v1392_v36, %v1393_v37  ;;  %v1415_v54 = vpack.c.bf16 %v1403_v49, %v1400_v48 }
  0x92   : > { %v1414_v51 = vpack.c.bf16 %v1397_v47, %v1394_v46 }
  0x9c   : > { %1063 = vmatmul.bf16.gmra.mxu1 %v982_v4  ;;  %1494 = vmatmul.bf16.gmra.mxu0 %v1413_v5  ;;  %v970_v4 = vrot.slane %v931_v61, 1  ;;  %v971_v5 = vrot.slane %v932_v62, 1 }
  0x9e   : > { %1318 = vmatmul.bf16.gmra.mxu3 %v2429_v23  ;;  %v972_v7 = vsel %vm518_vm0, %v970_v4, %v971_v5 }
  0x9f   : > { %1196 = vmatmul.bf16.gmra.mxu2 %v2357_v9  ;;  %v3141_v9 = vld [vmem:[%s3436_s2] ss:$0 sm:$0xff]  ;;  %v984_v10 = vpack.c.bf16 %v972_v7, %v969_v6 }
  0xa9   : > { %v330_v52 = vpop.f32.mrf.mxu1  ;;  %v320_v53 = vpop.f32.mrf.mxu0 }
  0xaa   : > { %v340_v20 = vadd.f32 %v3141_v9, %v320_v53  ;;  %v344_v45 = vadd.f32 %v3141_v9, %v330_v52 }
  0xac   : > { %1068 = vmatmul.bf16.gmra.mxu1 %v983_v50  ;;  %1499 = vmatmul.bf16.gmra.mxu0 %v1414_v51 }
  0xaf   : > { %1504 = vmatmul.bf16.vlgmr.msra.gmra.mxu2 %v1415_v54 }
  0xb1   : > { %v332_v0 = vpop.f32.mrf.mxu1  ;;  %v3134_v1 = vpop.f32.mrf.mxu0 }
  0xb2   : > { %v629_v63 = vpop.f32.mrf.mxu2  ;;  %v751_v8 = vpop.f32.mrf.mxu3  ;;  %v345_v53 = vadd.f32 %v3141_v9, %v332_v0 }
  0xb9   : > { %v335_v12 = vpop.f32.mrf.mxu1  ;;  %v325_v13 = vpop.f32.mrf.mxu0 }
  0xba   : > { %v3143_v11 = vpop.f32.mrf.mxu2  ;;  %v346_v14 = vadd.f32 %v3141_v9, %v335_v12  ;;  %v3146_v16 = vpop.f32.mrf.mxu3  ;;  %v342_v33 = vadd.f32 %v3141_v9, %v325_v13 }
  0xbc   : > { %1073 = vmatmul.bf16.gmra.mxu1 %v984_v10  ;;  %v341_v10 = vadd.f32 %v3141_v9, %v3134_v1 }
  0xc1   : > { %v337_v17 = vpop.f32.mrf.mxu1  ;;  %v3148_v18 = vpop.f32.mrf.mxu0 }
  0xc2   : > { %v634_v15 = vpop.f32.mrf.mxu2  ;;  %v347_v19 = vadd.f32 %v3141_v9, %v337_v17  ;;  %v756_v25 = vpop.f32.mrf.mxu3 }
  0xc9   : > { %v442_v22 = vpop.f32.mrf.mxu1  ;;  %v873_v23 = vpop.f32.mrf.mxu0 }
  0xca   : > { %v3152_v21 = vpop.f32.mrf.mxu2  ;;  %v462_v24 = vadd.f32 %v442_v22, %v340_v20  ;;  %v3154_v32 = vpop.f32.mrf.mxu3 }
  0xcc   : > { %v649_v26 = vadd.f32 %v629_v63, %v462_v24 }
  0xce   : > { %v771_v27 = vadd.f32 %v751_v8, %v649_v26 }
  0xd0   : > { %v893_v28 = vadd.f32 %v873_v23, %v771_v27 }
  0xd1   : > { %v444_v29 = vpop.f32.mrf.mxu1  ;;  %v875_v30 = vpop.f32.mrf.mxu0 }
  0xd2   : > { %v639_v31 = vpop.f32.mrf.mxu2  ;;  %v761_v40 = vpop.f32.mrf.mxu3  ;;  %v463_v13 = vadd.f32 %v444_v29, %v341_v10 }
  0xd4   : > { %v650_v23 = vadd.f32 %v3143_v11, %v463_v13 }
  0xd6   : > { %v772_v27 = vadd.f32 %v3146_v16, %v650_v23 }
  0xd9   : > { %v447_v34 = vpop.f32.mrf.mxu1  ;;  %v878_v35 = vpop.f32.mrf.mxu0 }
  0xda   : > { %v464_v36 = vadd.f32 %v447_v34, %v342_v33  ;;  %v641_v38 = vpop.f32.mrf.mxu2  ;;  %v763_v46 = vpop.f32.mrf.mxu3 }
  0xdc   : > { %v651_v37 = vadd.f32 %v634_v15, %v464_v36 }
  0xde   : > { %v773_v39 = vadd.f32 %v756_v25, %v651_v37  ;;  %v343_v37 = vadd.f32 %v3141_v9, %v3148_v18 }
  0xe0   : > { %v3157_v41 = vadd.f32 %v878_v35, %v773_v39  ;;  %v894_v35 = vadd.f32 %v875_v30, %v772_v27 }
  0xe1   : > { %v449_v42 = vpop.f32.mrf.mxu1  ;;  %v3159_v43 = vpop.f32.mrf.mxu0 }
  0xe2   : > { %v644_v44 = vpop.f32.mrf.mxu2  ;;  %v766_v59 = vpop.f32.mrf.mxu3  ;;  %v465_v39 = vadd.f32 %v449_v42, %v343_v37 }
  0xe9   : > { %v452_v47 = vpop.f32.mrf.mxu1  ;;  %v883_v48 = vpop.f32.mrf.mxu0 }
  0xea   : > { %v466_v49 = vadd.f32 %v452_v47, %v344_v45  ;;  %v646_v54 = vpop.f32.mrf.mxu2  ;;  %v768_v5 = vpop.f32.mrf.mxu3 }
  0xec   : > { %v653_v50 = vadd.f32 %v639_v31, %v466_v49 }
  0xee   : > { %v775_v51 = vadd.f32 %v761_v40, %v653_v50 }
  0xf0   : > { %v3163_v55 = vadd.f32 %v883_v48, %v775_v51 }
  0xf1   : > { %v454_v56 = vpop.f32.mrf.mxu1  ;;  %v885_v57 = vpop.f32.mrf.mxu0 }
  0xf2   : > { %v467_v58 = vadd.f32 %v454_v56, %v345_v53  ;;  %v1182_v2 = vpop.f32.mrf.mxu2  ;;  %v1304_v20 = vpop.f32.mrf.mxu3 }
  0xf4   : > { %v654_v60 = vadd.f32 %v641_v38, %v467_v58 }
  0xf6   : > { %v776_v61 = vadd.f32 %v763_v46, %v654_v60 }
  0xf8   : > { %v3165_v62 = vadd.f32 %v885_v57, %v776_v61 }
  0xf9   : > { %v457_v52 = vpop.f32.mrf.mxu1  ;;  %v888_v63 = vpop.f32.mrf.mxu0 }
  0xfa   : > { %v468_v3 = vadd.f32 %v457_v52, %v346_v14  ;;  %v1184_v15 = vpop.f32.mrf.mxu2  ;;  %v1306_v1 = vpop.f32.mrf.mxu3 }
  0xfc   : > { %v655_v4 = vadd.f32 %v644_v44, %v468_v3  ;;  %v652_v44 = vadd.f32 %v3152_v21, %v465_v39 }
  0xfe   : > { %v777_v6 = vadd.f32 %v766_v59, %v655_v4 }
 0x100   : > { %v3167_v7 = vadd.f32 %v888_v63, %v777_v6 }
 0x101   : > { %v459_v0 = vpop.f32.mrf.mxu1  ;;  %v890_v8 = vpop.f32.mrf.mxu0 }
 0x102   : > { %v469_v12 = vadd.f32 %v459_v0, %v347_v19  ;;  %v1187_v33 = vpop.f32.mrf.mxu2  ;;  %v1309_v50 = vpop.f32.mrf.mxu3 }
 0x104   : > { %v656_v17 = vadd.f32 %v646_v54, %v469_v12  ;;  %v774_v54 = vadd.f32 %v3154_v32, %v652_v44 }
 0x106   : > { %v778_v22 = vadd.f32 %v768_v5, %v656_v17 }
 0x108   : > { %v3172_v24 = vadd.f32 %v890_v8, %v778_v22 }
 0x109   : > { %v1059_v14 = vpop.f32.mrf.mxu1  ;;  %v1490_v25 = vpop.f32.mrf.mxu0 }
 0x10a   : > { %v1079_v26 = vadd.f32 %v1059_v14, %v893_v28  ;;  %v1189_v45 = vpop.f32.mrf.mxu2  ;;  %v1311_v22 = vpop.f32.mrf.mxu3 }
 0x10c   : > { %v1202_v31 = vadd.f32 %v1182_v2, %v1079_v26 }
 0x10e   : > { %v1324_v34 = vadd.f32 %v1304_v20, %v1202_v31 }
 0x110   : > { %v3175_v19 = vadd.f32 %v1490_v25, %v1324_v34 }
 0x111   : > { %v1061_v29 = vpop.f32.mrf.mxu1  ;;  %v1492_v36 = vpop.f32.mrf.mxu0 }
 0x112   : > { %v3180_v11 = vmul.f32 0.70710677, %v3175_v19  ;;  %v1080_v38 = vadd.f32 %v1061_v29, %v894_v35  ;;  %v1192_v0 = vpop.f32.mrf.mxu2 }
 0x114   : > { %v1534_v16 = vmul.f32 %v3180_v11, %v3180_v11  ;;  %v1203_v28 = vadd.f32 %v1184_v15, %v1080_v38 }
 0x116   : > { %v3184_v40 = vmin.f32 %v1534_v16, 16.0  ;;  %v1325_v30 = vadd.f32 %v1306_v1, %v1203_v28 }
 0x118   : > { %v1536_v46 = vmul.f32 2.1237322e-06, %v3184_v40  ;;  %v1547_v47 = vmul.f32 3.8918573e-05, %v3184_v40  ;;  %v3189_v9 = vadd.f32 %v1492_v36, %v1325_v30 }
 0x119   : > { %v1064_v18 = vpop.f32.mrf.mxu1  ;;  %v1495_v53 = vpop.f32.mrf.mxu0 }
 0x11a   : > { %v1537_v48 = vadd.f32 0.00028619796, %v1536_v46  ;;  %v1548_v49 = vadd.f32 0.001143296, %v1547_v47  ;;  %v1081_v42 = vadd.f32 %v1064_v18, %v3157_v41  ;;  %v3193_v51 = vmul.f32 0.70710677, %v3189_v9  ;;  %v3234_v18 = vpop.f32.mrf.mxu2 }
 0x11b   : > { %v896_v41 = vadd.f32 %v3159_v43, %v774_v54 }
 0x11c   : > { %v1538_v21 = vmul.f32 %v1537_v48, %v3184_v40  ;;  %v1549_v56 = vmul.f32 %v1548_v49, %v3184_v40  ;;  %v1204_v57 = vadd.f32 %v1187_v33, %v1081_v42  ;;  %v1574_v58 = vmul.f32 %v3193_v51, %v3193_v51 }
 0x11e   : > { %v1539_v59 = vadd.f32 0.0036580483, %v1538_v21  ;;  %v1550_v60 = vadd.f32 0.014752088, %v1549_v56  ;;  %v1326_v61 = vadd.f32 %v1309_v50, %v1204_v57  ;;  %v3200_v52 = vmin.f32 %v1574_v58, 16.0 }
 0x120   : > { %v1551_v63 = vmul.f32 %v1550_v60, %v3184_v40  ;;  %v3204_v2 = vadd.f32 %v1495_v53, %v1326_v61  ;;  %v1576_v32 = vmul.f32 2.1237322e-06, %v3200_v52  ;;  %v1587_v3 = vmul.f32 3.8918573e-05, %v3200_v52 }
 0x121   : > { %v1066_v4 = vpop.f32.mrf.mxu1  ;;  %v1540_v5 = vmul.f32 %v1539_v59, %v3184_v40  ;;  %v1497_v14 = vpop.f32.mrf.mxu0 }
 0x122   : > { %v1552_v6 = vadd.f32 0.112945676, %v1551_v63  ;;  %v1082_v8 = vadd.f32 %v1066_v4, %v896_v41  ;;  %v1577_v10 = vadd.f32 0.00028619796, %v1576_v32  ;;  %v1588_v12 = vadd.f32 0.001143296, %v1587_v3  ;;  %v1314_v63 = vpop.f32.mrf.mxu3 }
 0x123   : > { %v3210_v13 = vmul.f32 0.70710677, %v3204_v2  ;;  %v1541_v25 = vadd.f32 0.05243302, %v1540_v5 }
 0x124   : > { %v1553_v43 = vmul.f32 %v1552_v6, %v3184_v40  ;;  %v1205_v15 = vadd.f32 %v1189_v45, %v1082_v8  ;;  %v1578_v17 = vmul.f32 %v1577_v10, %v3200_v52  ;;  %v1589_v20 = vmul.f32 %v1588_v12, %v3200_v52 }
 0x125   : > { %v1614_v23 = vmul.f32 %v3210_v13, %v3210_v13  ;;  %v1542_v30 = vmul.f32 %v1541_v25, %v3184_v40  ;;  %v1197_v25 = vpop.f32.mrf.mxu2 }
 0x126   : > { %v1554_v26 = vadd.f32 0.4994258, %v1553_v43  ;;  %v1327_v27 = vadd.f32 %v1311_v22, %v1205_v15  ;;  %v1579_v31 = vadd.f32 0.0036580483, %v1578_v17  ;;  %v1590_v33 = vadd.f32 0.014752088, %v1589_v20 }
 0x127   : > { %v3217_v34 = vmin.f32 %v1614_v23, 16.0  ;;  %v1543_v53 = vadd.f32 0.18741608, %v1542_v30 }
 0x128   : > { %v1555_v35 = vmul.f32 %v1554_v26, %v3184_v40  ;;  %v3220_v1 = vadd.f32 %v1497_v14, %v1327_v27  ;;  %v1580_v29 = vmul.f32 %v1579_v31, %v3200_v52  ;;  %v1591_v36 = vmul.f32 %v1590_v33, %v3200_v52 }
 0x129   : > { %v1616_v37 = vmul.f32 2.1237322e-06, %v3217_v34  ;;  %v1069_v38 = vpop.f32.mrf.mxu1  ;;  %v1627_v16 = vmul.f32 3.8918573e-05, %v3217_v34  ;;  %v1544_v5 = vmul.f32 %v1543_v53, %v3184_v40  ;;  %v1500_v17 = vpop.f32.mrf.mxu0 }
 0x12a   : > { %v3225_v39 = vadd.f32 1.0, %v1555_v35  ;;  %v3229_v28 = vmul.f32 0.70710677, %v3220_v1  ;;  %v1592_v44 = vadd.f32 0.112945676, %v1591_v36  ;;  %v1083_v46 = vadd.f32 %v1069_v38, %v3163_v55 }
 0x12b   : > { %v1617_v45 = vadd.f32 0.00028619796, %v1616_v37  ;;  %v1581_v47 = vadd.f32 0.05243302, %v1580_v29  ;;  %v1628_v42 = vadd.f32 0.001143296, %v1627_v16 }
 0x12c   : > { %2713 = vrcp.f32 %v3225_v39  ;;  %v1593_v48 = vmul.f32 %v1592_v44, %v3200_v52  ;;  %v1654_v50 = vmul.f32 %v3229_v28, %v3229_v28  ;;  %v1206_v21 = vadd.f32 %v1192_v0, %v1083_v46 }
 0x12d   : > { %v1618_v49 = vmul.f32 %v1617_v45, %v3217_v34  ;;  %v1582_v56 = vmul.f32 %v1581_v47, %v3200_v52  ;;  %v1629_v55 = vmul.f32 %v1628_v42, %v3217_v34  ;;  %v1566_v23 = vand.u32 2147483647, %v3225_v39 }
 0x12e   : > { %v1594_v54 = vadd.f32 0.4994258, %v1593_v48  ;;  %v3242_v58 = vmin.f32 %v1654_v50, 16.0  ;;  %v1328_v8 = vadd.f32 %v1314_v63, %v1206_v21  ;;  %v1568_v40 = vand.u32 2147483648, %v3225_v39 }
 0x12f   : > { %v1619_v57 = vadd.f32 0.0036580483, %v1618_v49  ;;  %v1630_v41 = vadd.f32 0.014752088, %v1629_v55  ;;  %v1583_v10 = vadd.f32 0.18741608, %v1582_v56  ;;  %vm1562_vm2 = vweird.f32 %v3225_v39 }
 0x130   : > { %v1595_v59 = vmul.f32 %v1594_v54, %v3200_v52  ;;  %v1656_v32 = vmul.f32 2.1237322e-06, %v3242_v58  ;;  %v1667_v3 = vmul.f32 3.8918573e-05, %v3242_v58  ;;  %v3258_v33 = vadd.f32 %v1500_v17, %v1328_v8  ;;  %v1316_v54 = vpop.f32.mrf.mxu3 }
 0x131   : > { %v1620_v61 = vmul.f32 %v1619_v57, %v3217_v34  ;;  %v1071_v4 = vpop.f32.mrf.mxu1  ;;  %v1631_v12 = vmul.f32 %v1630_v41, %v3217_v34  ;;  %v1545_v35 = vadd.f32 1.1283791, %v1544_v5  ;;  %v1584_v29 = vmul.f32 %v1583_v10, %v3200_v52  ;;  %v1502_v17 = vpop.f32.mrf.mxu0 }
 0x132   : > { %v2714_v60 = vpop.eup %2713  ;;  %v3250_v0 = vadd.f32 1.0, %v1595_v59  ;;  %v1657_v43 = vadd.f32 0.00028619796, %v1656_v32  ;;  %v1668_v15 = vadd.f32 0.001143296, %v1667_v3  ;;  %v1569_v44 = vor.u32 1.1754944e-38, %v1568_v40 }
 0x133   : > { %v1558_v6 = vmul.f32 %v2714_v60, %v3225_v39  ;;  %v1621_v22 = vadd.f32 0.05243302, %v1620_v61  ;;  %vm1563_vm1 = vweird.f32 %v2714_v60  ;;  %v1632_v14 = vadd.f32 0.112945676, %v1631_v12 }
 0x134   : > { %2715 = vrcp.f32 %v3250_v0  ;;  %v1658_v27 = vmul.f32 %v1657_v43, %v3242_v58  ;;  %v1669_v31 = vmul.f32 %v1668_v15, %v3242_v58  ;;  %vm1564_vm3 = vmor %vm1562_vm2, %vm1563_vm1  ;;  %v3266_v46 = vmul.f32 0.70710677, %v3258_v33 }
 0x135   : > { %v1559_v20 = vsub.f32 1.0, %v1558_v6  ;;  %v1633_v36 = vmul.f32 %v1632_v14, %v3217_v34  ;;  %v1622_v38 = vmul.f32 %v1621_v22, %v3217_v34  ;;  %v1084_v47 = vadd.f32 %v1071_v4, %v3165_v62  ;;  %v3284_v6 = vpop.f32.mrf.mxu2 }
 0x136   : > { %v1659_v16 = vadd.f32 0.0036580483, %v1658_v27  ;;  %v1670_v30 = vadd.f32 0.014752088, %v1669_v31  ;;  %vm1567_vm4 = vcmp.eq.f32.partialorder %v1566_v23, 8.507059e+37  ;;  %v1546_v49 = vmul.f32 %v1545_v35, %v3180_v11 }
 0x137   : > { %v1560_v26 = vmul.f32 %v2714_v60, %v1559_v20  ;;  %v1634_v45 = vadd.f32 0.4994258, %v1633_v36  ;;  %v1585_v50 = vadd.f32 1.1283791, %v1584_v29  ;;  %v1623_v56 = vadd.f32 0.18741608, %v1622_v38 }
 0x138   : > { %v1671_v52 = vmul.f32 %v1670_v30, %v3242_v58  ;;  %v1660_v55 = vmul.f32 %v1659_v16, %v3242_v58  ;;  %v1694_v61 = vmul.f32 %v3266_v46, %v3266_v46  ;;  %v1207_v11 = vadd.f32 %v3234_v18, %v1084_v47 }
 0x139   : > { %v1561_v37 = vadd.f32 %v2714_v60, %v1560_v26  ;;  %v1074_v21 = vpop.f32.mrf.mxu1  ;;  %v1635_v57 = vmul.f32 %v1634_v45, %v3217_v34  ;;  %v1608_v41 = vand.u32 2147483648, %v3250_v0  ;;  %v1606_v5 = vand.u32 2147483647, %v3250_v0 }
 0x13a   : > { %v2716_v39 = vpop.eup %2715  ;;  %v1672_v62 = vadd.f32 0.112945676, %v1671_v52  ;;  %v1085_v3 = vadd.f32 %v1074_v21, %v3167_v7  ;;  %v3286_v8 = vmin.f32 %v1694_v61, 16.0  ;;  %vm1602_vm6 = vweird.f32 %v3250_v0 }
 0x13b   : > { %v1565_v48 = vsel %vm1564_vm3, %v2714_v60, %v1561_v37  ;;  %v1598_v53 = vmul.f32 %v2716_v39, %v3250_v0  ;;  %v3279_v63 = vadd.f32 1.0, %v1635_v57  ;;  %vm1603_vm5 = vweird.f32 %v2716_v39 }
 0x13c   : > { %v1570_v42 = vsel %vm1567_vm4, %v1569_v44, %v1565_v48  ;;  %v1673_v32 = vmul.f32 %v1672_v62, %v3242_v58  ;;  %v1624_v18 = vmul.f32 %v1623_v56, %v3217_v34  ;;  %v1329_v7 = vadd.f32 %v1316_v54, %v1207_v11  ;;  %vm1604_vm7 = vmor %vm1602_vm6, %vm1603_vm5 }
 0x13d   : > { %v1571_v59 = vmul.f32 %v1570_v42, %v1546_v49  ;;  %v1599_v60 = vsub.f32 1.0, %v1598_v53  ;;  %2717 = vrcp.f32 %v3279_v63  ;;  %v1661_v43 = vadd.f32 0.05243302, %v1660_v55  ;;  %v1505_v57 = vpop.f32.mrf.mxu2 }
 0x13e   : > { %v1674_v15 = vadd.f32 0.4994258, %v1673_v32  ;;  %v1609_v20 = vor.u32 1.1754944e-38, %v1608_v41  ;;  %v1696_v22 = vmul.f32 2.1237322e-06, %v3286_v8  ;;  %v1208_v40 = vadd.f32 %v1197_v25, %v1085_v3 }
 0x13f   : > { %v1600_v4 = vmul.f32 %v2716_v39, %v1599_v60  ;;  %v2542_v10 = vclamps-f32 %v1571_v59, 1.0  ;;  %v1707_v23 = vmul.f32 3.8918573e-05, %v3286_v8  ;;  %v1586_v0 = vmul.f32 %v1585_v50, %v3193_v51  ;;  %v1319_v51 = vpop.f32.mrf.mxu3 }
 0x140   : > { %vm1607_vm8 = vcmp.eq.f32.partialorder %v1606_v5, 8.507059e+37  ;;  %v1675_v14 = vmul.f32 %v1674_v15, %v3242_v58  ;;  %v1625_v27 = vadd.f32 1.1283791, %v1624_v18  ;;  %v3307_v35 = vadd.f32 %v1502_v17, %v1329_v7 }
 0x141   : > { %v1601_v12 = vadd.f32 %v2716_v39, %v1600_v4  ;;  %v1708_v31 = vadd.f32 0.001143296, %v1707_v23  ;;  %v1854_v29 = vadd.f32 1.0, %v2542_v10  ;;  %v1662_v25 = vmul.f32 %v1661_v43, %v3242_v58 }
 0x142   : > { %v3310_v37 = vadd.f32 1.0, %v1675_v14  ;;  %v1697_v16 = vadd.f32 0.00028619796, %v1696_v22  ;;  %v3314_v44 = vmul.f32 0.70710677, %v3307_v35  ;;  %v1330_v45 = vadd.f32 %v1319_v51, %v1208_v40 }
 0x143   : > { %v1605_v34 = vsel %vm1604_vm7, %v2716_v39, %v1601_v12  ;;  %v2718_v38 = vpop.eup %2717  ;;  %v1709_v30 = vmul.f32 %v1708_v31, %v3286_v8  ;;  %v1518_v47 = vmul.f32 0.5, %v3175_v19  ;;  %v1519_v39 = vmul.f32 0.5, %v3189_v9 }
 0x144   : > { %v1610_v26 = vsel %vm1607_vm8, %v1609_v20, %v1605_v34  ;;  %v1638_v52 = vmul.f32 %v2718_v38, %v3279_v63  ;;  %v1626_v49 = vmul.f32 %v1625_v27, %v3210_v13  ;;  %v1646_v42 = vand.u32 2147483647, %v3279_v63  ;;  %v1076_v13 = vpop.f32.mrf.mxu1 }
 0x145   : > { %v1611_v36 = vmul.f32 %v1610_v26, %v1586_v0  ;;  %v1648_v50 = vand.u32 2147483648, %v3279_v63  ;;  %2719 = vrcp.f32 %v3310_v37  ;;  %v1663_v21 = vadd.f32 0.18741608, %v1662_v25 }
 0x146   : > { %v1639_v54 = vsub.f32 1.0, %v1638_v52  ;;  %v1710_v56 = vadd.f32 0.014752088, %v1709_v30  ;;  %v1862_v19 = vmul.f32 %v1854_v29, %v1518_v47  ;;  %v1698_v9 = vmul.f32 %v1697_v16, %v3286_v8 }
 0x147   : > { %v2543_v48 = vclamps-f32 %v1611_v36, 1.0  ;;  %v1734_v55 = vmul.f32 %v3314_v44, %v3314_v44  ;;  %v3327_v62 = vadd.f32 %v1505_v57, %v1330_v45  ;;  %vm1643_vm9 = vweird.f32 %v2718_v38  ;;  %v1321_v47 = vpop.f32.mrf.mxu3 }
 0x148   : > { %v1640_v60 = vmul.f32 %v2718_v38, %v1639_v54  ;;  %v1711_v61 = vmul.f32 %v1710_v56, %v3286_v8  ;;  %vm1642_vm10 = vweird.f32 %v3279_v63  ;;  %v1649_v11 = vor.u32 1.1754944e-38, %v1648_v50 }
 0x149   : > { %v1855_v53 = vadd.f32 1.0, %v2543_v48  ;;  %v3336_v41 = vmin.f32 %v1734_v55, 16.0  ;;  %v3339_v32 = vmul.f32 0.70710677, %v3327_v62  ;;  %v1086_v18 = vadd.f32 %v1076_v13, %v3172_v24  ;;  %vm1644_vm11 = vmor %vm1642_vm10, %vm1643_vm9  ;;  %v1507_v55 = vpop.f32.mrf.mxu2 }
 0x14a   : > { %v1641_v4 = vadd.f32 %v2718_v38, %v1640_v60  ;;  %v1712_v5 = vadd.f32 0.112945676, %v1711_v61  ;;  %v1664_v10 = vmul.f32 %v1663_v21, %v3242_v58  ;;  %vm1647_vm12 = vcmp.eq.f32.partialorder %v1646_v42, 8.507059e+37 }
 0x14b   : > { %v1863_v59 = vmul.f32 %v1855_v53, %v1519_v39  ;;  %v2720_v7 = vpop.eup %2719  ;;  %v1736_v12 = vmul.f32 2.1237322e-06, %v3336_v41  ;;  %v1747_v43 = vmul.f32 3.8918573e-05, %v3336_v41  ;;  %v1774_v63 = vmul.f32 %v3339_v32, %v3339_v32 }
 0x14c   : > { %v1645_v15 = vsel %vm1644_vm11, %v2718_v38, %v1641_v4  ;;  %v1678_v17 = vmul.f32 %v2720_v7, %v3310_v37  ;;  %v1699_v20 = vadd.f32 0.0036580483, %v1698_v9  ;;  %v1713_v24 = vmul.f32 %v1712_v5, %v3286_v8 }
 0x14d   : > { %v2651_v3 = vpack.c.bf16 %v1863_v59, %v1862_v19  ;;  %v1650_v22 = vsel %vm1647_vm12, %v1649_v11, %v1645_v15  ;;  %v1737_v23 = vadd.f32 0.00028619796, %v1736_v12  ;;  %v1748_v40 = vadd.f32 0.001143296, %v1747_v43 }
 0x14e   : > { %v1679_v0 = vsub.f32 1.0, %v1678_v17  ;;  %v1688_v58 = vand.u32 2147483648, %v3310_v37  ;;  %v3351_v34 = vmin.f32 %v1774_v63, 16.0  ;;  %v1209_v14 = vadd.f32 %v3284_v6, %v1086_v18 }
 0x14f   : > { %2652 = vst [vmem:[%s3333_s10] sm:$0xff] %v2651_v3   ;;  %v1665_v26 = vadd.f32 1.1283791, %v1664_v10  ;;  %v1714_v27 = vadd.f32 0.4994258, %v1713_v24  ;;  %v1738_v31 = vmul.f32 %v1737_v23, %v3336_v41  ;;  %v1749_v29 = vmul.f32 %v1748_v40, %v3336_v41 }
 0x150   : > { %v1651_v36 = vmul.f32 %v1650_v22, %v1626_v49  ;;  %v1680_v25 = vmul.f32 %v2720_v7, %v1679_v0  ;;  %vm1683_vm13 = vweird.f32 %v2720_v7  ;;  %v1686_v51 = vand.u32 2147483647, %v3310_v37 }
 0x151   : > { %v1700_v38 = vmul.f32 %v1699_v20, %v3286_v8  ;;  %v1715_v16 = vmul.f32 %v1714_v27, %v3286_v8  ;;  %v1750_v30 = vadd.f32 0.014752088, %v1749_v29  ;;  %v1787_v45 = vmul.f32 3.8918573e-05, %v3351_v34 }
 0x152   : > { %v1681_v6 = vadd.f32 %v2720_v7, %v1680_v25  ;;  %vm1682_vm14 = vweird.f32 %v3310_v37  ;;  %v1689_v39 = vor.u32 1.1754944e-38, %v1688_v58  ;;  %v1331_v48 = vadd.f32 %v1321_v47, %v1209_v14 }
 0x153   : > { %vm1684_vm15 = vmor %vm1682_vm14, %vm1683_vm13  ;;  %v3361_v52 = vadd.f32 1.0, %v1715_v16  ;;  %v1739_v49 = vadd.f32 0.0036580483, %v1738_v31  ;;  %v1751_v42 = vmul.f32 %v1750_v30, %v3336_v41  ;;  %v1788_v50 = vadd.f32 0.001143296, %v1787_v45 }
 0x154   : > { %v2544_v53 = vclamps-f32 %v1651_v36, 1.0  ;;  %v1666_v54 = vmul.f32 %v1665_v26, %v3229_v28  ;;  %v1685_v21 = vsel %vm1684_vm15, %v2720_v7, %v1681_v6  ;;  %vm1687_vm0 = vcmp.eq.f32.partialorder %v1686_v51, 8.507059e+37 }
 0x155   : > { %v1690_v56 = vsel %vm1687_vm0, %v1689_v39, %v1685_v21  ;;  %v1701_v57 = vadd.f32 0.05243302, %v1700_v38  ;;  %2721 = vrcp.f32 %v3361_v52  ;;  %v1752_v37 = vadd.f32 0.112945676, %v1751_v42 }
 0x156   : > { %v1691_v19 = vmul.f32 %v1690_v56, %v1666_v54  ;;  %v1776_v9 = vmul.f32 2.1237322e-06, %v3351_v34  ;;  %v1740_v13 = vmul.f32 %v1739_v49, %v3336_v41  ;;  %v1789_v59 = vmul.f32 %v1788_v50, %v3351_v34 }
 0x157   : > { %v3369_v60 = vadd.f32 %v1507_v55, %v1331_v48  ;;  %v1856_v61 = vadd.f32 1.0, %v2544_v53  ;;  %v1753_v28 = vmul.f32 %v1752_v37, %v3336_v41  ;;  %v1520_v3 = vmul.f32 0.5, %v3204_v2 }
 0x158   : > { %v2545_v11 = vclamps-f32 %v1691_v19, 1.0  ;;  %v1702_v4 = vmul.f32 %v1701_v57, %v3286_v8  ;;  %v1790_v5 = vadd.f32 0.014752088, %v1789_v59  ;;  %v1521_v7 = vmul.f32 0.5, %v3220_v1 }
 0x159   : > { %v3375_v18 = vmul.f32 0.70710677, %v3369_v60  ;;  %v1754_v12 = vadd.f32 0.4994258, %v1753_v28  ;;  %v1777_v43 = vadd.f32 0.00028619796, %v1776_v9  ;;  %v1864_v2 = vmul.f32 %v1856_v61, %v1520_v3 }
 0x15a   : > { %v1857_v10 = vadd.f32 1.0, %v2545_v11  ;;  %v1741_v15 = vadd.f32 0.05243302, %v1740_v13  ;;  %v1791_v17 = vmul.f32 %v1790_v5, %v3351_v34  ;;  %v1703_v23 = vadd.f32 0.18741608, %v1702_v4 }
 0x15b   : > { %v2722_v63 = vpop.eup %2721  ;;  %v1814_v20 = vmul.f32 %v3375_v18, %v3375_v18  ;;  %v1755_v40 = vmul.f32 %v1754_v12, %v3336_v41  ;;  %v1778_v26 = vmul.f32 %v1777_v43, %v3351_v34  ;;  %v1728_v16 = vand.u32 2147483648, %v3361_v52 }
 0x15c   : > { %v1865_v22 = vmul.f32 %v1857_v10, %v1521_v7  ;;  %v1718_v24 = vmul.f32 %v2722_v63, %v3361_v52  ;;  %v1792_v0 = vadd.f32 0.112945676, %v1791_v17  ;;  %v1742_v27 = vmul.f32 %v1741_v15, %v3336_v41 }
 0x15d   : > { %v3383_v1 = vmin.f32 %v1814_v20, 16.0  ;;  %v1756_v31 = vadd.f32 1.0, %v1755_v40  ;;  %v1704_v38 = vmul.f32 %v1703_v23, %v3286_v8  ;;  %vm1723_vm1 = vweird.f32 %v2722_v63 }
 0x15e   : > { %v2656_v58 = vpack.c.bf16 %v1865_v22, %v1864_v2  ;;  %v1719_v14 = vsub.f32 1.0, %v1718_v24  ;;  %v1793_v29 = vmul.f32 %v1792_v0, %v3351_v34  ;;  %v1779_v45 = vadd.f32 0.0036580483, %v1778_v26 }
 0x15f   : > { %v1816_v36 = vmul.f32 2.1237322e-06, %v3383_v1  ;;  %v1827_v51 = vmul.f32 3.8918573e-05, %v3383_v1  ;;  %2723 = vrcp.f32 %v1756_v31  ;;  %vm1722_vm2 = vweird.f32 %v3361_v52 }
 0x160   : > { %2668 = vst [vmem:[%s3333_s10 + $0x8] sm:$0xff] %v2656_v58   ;;  %v1720_v25 = vmul.f32 %v2722_v63, %v1719_v14  ;;  %v1794_v47 = vadd.f32 0.4994258, %v1793_v29  ;;  %v1726_v39 = vand.u32 2147483647, %v3361_v52  ;;  %vm1724_vm3 = vmor %vm1722_vm2, %vm1723_vm1  ;;  %v1729_v21 = vor.u32 1.1754944e-38, %v1728_v16 }
 0x161   : > { %v1817_v6 = vadd.f32 0.00028619796, %v1816_v36  ;;  %v1743_v48 = vadd.f32 0.18741608, %v1742_v27  ;;  %v1828_v49 = vadd.f32 0.001143296, %v1827_v51  ;;  %v1780_v56 = vmul.f32 %v1779_v45, %v3351_v34 }
 0x162   : > { %v1721_v30 = vadd.f32 %v2722_v63, %v1720_v25  ;;  %v1795_v42 = vmul.f32 %v1794_v47, %v3351_v34  ;;  %v1705_v8 = vadd.f32 1.1283791, %v1704_v38  ;;  %vm1727_vm4 = vcmp.eq.f32.partialorder %v1726_v39, 8.507059e+37 }
 0x163   : > { %v1818_v50 = vmul.f32 %v1817_v6, %v3383_v1  ;;  %v1829_v54 = vmul.f32 %v1828_v49, %v3383_v1  ;;  %v1744_v52 = vmul.f32 %v1743_v48, %v3336_v41  ;;  %v1781_v11 = vadd.f32 0.05243302, %v1780_v56 }
 0x164   : > { %v1725_v53 = vsel %vm1724_vm3, %v2722_v63, %v1721_v30  ;;  %v3399_v57 = vadd.f32 1.0, %v1795_v42  ;;  %v1706_v59 = vmul.f32 %v1705_v8, %v3266_v46  ;;  %v1766_v5 = vand.u32 2147483647, %v1756_v31 }
 0x165   : > { %v2724_v19 = vpop.eup %2723  ;;  %v1830_v37 = vadd.f32 0.014752088, %v1829_v54  ;;  %v1730_v9 = vsel %vm1727_vm4, %v1729_v21, %v1725_v53  ;;  %v1819_v13 = vadd.f32 0.0036580483, %v1818_v50  ;;  %v1745_v4 = vadd.f32 1.1283791, %v1744_v52 }
 0x166   : > { %v1758_v55 = vmul.f32 %v2724_v19, %v1756_v31  ;;  %2725 = vrcp.f32 %v3399_v57  ;;  %v1731_v3 = vmul.f32 %v1730_v9, %v1706_v59  ;;  %v1768_v7 = vand.u32 2147483648, %v1756_v31 }
 0x167   : > { %v1831_v28 = vmul.f32 %v1830_v37, %v3383_v1  ;;  %vm1763_vm5 = vweird.f32 %v2724_v19  ;;  %v1820_v41 = vmul.f32 %v1819_v13, %v3383_v1  ;;  %vm1762_vm6 = vweird.f32 %v1756_v31 }
 0x168   : > { %v1759_v61 = vsub.f32 1.0, %v1758_v55  ;;  %v1782_v15 = vmul.f32 %v1781_v11, %v3351_v34  ;;  %v1746_v17 = vmul.f32 %v1745_v4, %v3314_v44  ;;  %vm1764_vm7 = vmor %vm1762_vm6, %vm1763_vm5  ;;  %vm1767_vm8 = vcmp.eq.f32.partialorder %v1766_v5, 8.507059e+37 }
 0x169   : > { %v1832_v12 = vadd.f32 0.112945676, %v1831_v28  ;;  %v1769_v20 = vor.u32 1.1754944e-38, %v1768_v7  ;;  %v2546_v22 = vclamps-f32 %v1731_v3, 1.0  ;;  %v1821_v23 = vadd.f32 0.05243302, %v1820_v41 }
 0x16a   : > { %v1760_v10 = vmul.f32 %v2724_v19, %v1759_v61  ;;  %v1783_v27 = vadd.f32 0.18741608, %v1782_v15  ;;  %v1522_v51 = vmul.f32 0.5, %v3258_v33  ;;  %v1523_v38 = vmul.f32 0.5, %v3307_v35 }
 0x16b   : > { %v1833_v46 = vmul.f32 %v1832_v12, %v3383_v1  ;;  %v1858_v29 = vadd.f32 1.0, %v2546_v22  ;;  %v1822_v44 = vmul.f32 %v1821_v23, %v3383_v1  ;;  %v1808_v39 = vand.u32 2147483648, %v3399_v57 }
 0x16c   : > { %v2726_v43 = vpop.eup %2725  ;;  %v1761_v63 = vadd.f32 %v2724_v19, %v1760_v10  ;;  %v1784_v30 = vmul.f32 %v1783_v27, %v3351_v34  ;;  %vm1802_vm10 = vweird.f32 %v3399_v57  ;;  %v1806_v49 = vand.u32 2147483647, %v3399_v57 }
 0x16d   : > { %v1798_v2 = vmul.f32 %v2726_v43, %v3399_v57  ;;  %v1834_v40 = vadd.f32 0.4994258, %v1833_v46  ;;  %vm1803_vm9 = vweird.f32 %v2726_v43  ;;  %v1866_v47 = vmul.f32 %v1858_v29, %v1522_v51 }
 0x16e   : > { %v1765_v24 = vsel %vm1764_vm7, %v2724_v19, %v1761_v63  ;;  %v1823_v48 = vadd.f32 0.18741608, %v1822_v44  ;;  %vm1804_vm11 = vmor %vm1802_vm10, %vm1803_vm9  ;;  %v1785_v33 = vadd.f32 1.1283791, %v1784_v30  ;;  %v1809_v8 = vor.u32 1.1754944e-38, %v1808_v39 }
 0x16f   : > { %v1770_v0 = vsel %vm1767_vm8, %v1769_v20, %v1765_v24  ;;  %v1799_v58 = vsub.f32 1.0, %v1798_v2  ;;  %v1835_v26 = vmul.f32 %v1834_v40, %v3383_v1  ;;  %vm1807_vm12 = vcmp.eq.f32.partialorder %v1806_v49, 8.507059e+37 }
 0x170   : > { %v1771_v14 = vmul.f32 %v1770_v0, %v1746_v17  ;;  %v1824_v34 = vmul.f32 %v1823_v48, %v3383_v1  ;;  %v1786_v21 = vmul.f32 %v1785_v33, %v3339_v32  ;;  %v1524_v4 = vmul.f32 0.5, %v3327_v62 }
 0x171   : > { %v1800_v31 = vmul.f32 %v2726_v43, %v1799_v58  ;;  %v1836_v25 = vadd.f32 1.0, %v1835_v26  ;;  %v1525_v5 = vmul.f32 0.5, %v3369_v60 }
 0x172   : > { %v2547_v36 = vclamps-f32 %v1771_v14, 1.0  ;;  %v1825_v19 = vadd.f32 1.1283791, %v1824_v34 }
 0x173   : > { %2727 = vrcp.f32 %v1836_v25  ;;  %v1801_v45 = vadd.f32 %v2726_v43, %v1800_v31  ;;  %v1848_v52 = vand.u32 2147483648, %v1836_v25  ;;  %v1846_v57 = vand.u32 2147483647, %v1836_v25 }
 0x174   : > { %v1859_v16 = vadd.f32 1.0, %v2547_v36  ;;  %vm1842_vm14 = vweird.f32 %v1836_v25  ;;  %v1826_v1 = vmul.f32 %v1825_v19, %v3375_v18 }
 0x175   : > { %v1805_v35 = vsel %vm1804_vm11, %v2726_v43, %v1801_v45  ;;  %v1849_v13 = vor.u32 1.1754944e-38, %v1848_v52  ;;  %vm1847_vm0 = vcmp.eq.f32.partialorder %v1846_v57, 8.507059e+37 }
 0x176   : > { %v1867_v6 = vmul.f32 %v1859_v16, %v1523_v38  ;;  %v1810_v54 = vsel %vm1807_vm12, %v1809_v8, %v1805_v35 }
 0x177   : > { %v1811_v37 = vmul.f32 %v1810_v54, %v1786_v21 }
 0x178   : > { %v2661_v42 = vpack.c.bf16 %v1867_v6, %v1866_v47 }
 0x179   : > { %v2728_v50 = vpop.eup %2727  ;;  %v2548_v59 = vclamps-f32 %v1811_v37, 1.0 }
 0x17a   : > { %2669 = vst [vmem:[%s3333_s10 + $0x10] sm:$0xff] %v2661_v42   ;;  %v1838_v53 = vmul.f32 %v2728_v50, %v1836_v25  ;;  %vm1843_vm13 = vweird.f32 %v2728_v50 }
 0x17b   : > { %vm1844_vm15 = vmor %vm1842_vm14, %vm1843_vm13  ;;  %v1860_v32 = vadd.f32 1.0, %v2548_v59 }
 0x17c   : > { %v1839_v56 = vsub.f32 1.0, %v1838_v53 }
 0x17d   : > { %v1868_v10 = vmul.f32 %v1860_v32, %v1524_v4 }
 0x17e   : > { %v1840_v9 = vmul.f32 %v2728_v50, %v1839_v56 }
 0x180   : > { %v1841_v55 = vadd.f32 %v2728_v50, %v1840_v9 }
 0x182   : > { %v1845_v61 = vsel %vm1844_vm15, %v2728_v50, %v1841_v55 }
 0x183   : > { %v1850_v11 = vsel %vm1847_vm0, %v1849_v13, %v1845_v61 }
 0x184   : > { %v1851_v28 = vmul.f32 %v1850_v11, %v1826_v1 }
 0x186   : > { %v2549_v3 = vclamps-f32 %v1851_v28, 1.0 }
 0x188   : > { %v1861_v7 = vadd.f32 1.0, %v2549_v3 }
 0x18a   : > { %v1869_v41 = vmul.f32 %v1861_v7, %v1525_v5 }
 0x18c   : > { %v2666_v12 = vpack.c.bf16 %v1869_v41, %v1868_v10 }
 0x18e   : > { %2670 = vst [vmem:[%s3333_s10 + $0x18] sm:$0xff] %v2666_v12  }
 0x18f PF: > { %s13_s14 = sadd.s32 1, %s2751_s14   ;;  %s3439_s12 = smov %s2747_s13 }
 0x190   : > { %p10_p6 = scmp.ge.s32.totalorder %s13_s14, 4   ;;  %s3440_s13 = smov %s3442_s15 }
 0x192   :  { %12 = sbr.rel (!%p10_p6) target bundleno = 2 (0x2), region = 77 }

</bundles_post_ra>
